<compile_context>
chip_gen: v5e
topology: v5e:2x2
jax: 0.10.0
libtpu: 0.0.40
codegen_flags: <defaults>
</compile_context>

<pallas_src>
import jax
import jax.numpy as jnp
from jax.experimental import pallas as pl
from jax.experimental.pallas import tpu as pltpu

# ---------------- model dimensions (small, consistent with the module) -------
B = 2             # batch
N = 8             # number of proposals (sequence length)
DIM_PPL = 32      # dim_ppl
DIM_ANS = 24      # dim_answer
HID = 48          # hidden_size (divisible by n_heads = 6)
N_LAYER = 3
N_HEADS = 6
HEAD_DIM = HID // N_HEADS
P_STACK = N_LAYER + 1          # ppl_raw + 3 encoder layers
TOK = B * N                    # flattened (batch, proposal) tokens
BN_EPS = 1e-5
LN_EPS = 1e-5


def _layer_norm(z, g, b):
    mu = jnp.mean(z, axis=-1, keepdims=True)
    var = jnp.mean((z - mu) ** 2, axis=-1, keepdims=True)
    return (z - mu) * jax.lax.rsqrt(var + LN_EPS) * g + b


# ---------------- single fused kernel -----------------------------------------
def fused_vhp_kernel(
    x_ref, ans_ref,                                      # activations
    w_in_ref, b_in_ref, bn_g_ref, bn_b_ref,              # ppl_in + BN
    wqkv_ref, bqkv_ref, wo_ref, bo_ref,                  # attention (stacked over layers)
    ln1g_ref, ln1b_ref, w1_ref, b1_ref, w2_ref, b2_ref,  # FFN + norms (stacked)
    ln2g_ref, ln2b_ref,
    wa_ref, ba_ref, whp_ref, bhp_ref, wpred_ref, bpred_ref,   # head
    out_ref,
):
    # ---- ppl_in Linear + BatchNorm (batch statistics over all B*N tokens) ----
    x = x_ref[...]                                                    # (TOK, DIM_PPL)
    y = jnp.dot(x, w_in_ref[...], preferred_element_type=jnp.float32) + b_in_ref[...]
    mu = jnp.mean(y, axis=0, keepdims=True)                           # (1, HID)
    var = jnp.mean((y - mu) ** 2, axis=0, keepdims=True)
    p0 = (y - mu) * jax.lax.rsqrt(var + BN_EPS) * bn_g_ref[...] + bn_b_ref[...]

    scale = 1.0 / (float(HEAD_DIM) ** 0.5)
    p_list = [p0]
    h = p0                                                            # (TOK, HID)

    for l in range(N_LAYER):                                          # static unroll
        # -- fused QKV: one (TOK, HID) @ (HID, 3*HID) MXU matmul --
        qkv = jnp.dot(h, wqkv_ref[l], preferred_element_type=jnp.float32) + bqkv_ref[l]

        # head relayout: lane groups of HEAD_DIM -> head-batched (N_HEADS*B, N, HEAD_DIM)
        def to_heads(base):
            return jnp.concatenate(
                [qkv[:, base + hd * HEAD_DIM: base + (hd + 1) * HEAD_DIM]
                     .reshape(B, N, HEAD_DIM)
                 for hd in range(N_HEADS)],
                axis=0)                                               # (N_HEADS*B, N, HEAD_DIM)

        qh = to_heads(0)
        kh = to_heads(HID)
        vh = to_heads(2 * HID)

        # -- one batched score matmul, one softmax, one batched PV matmul --
        s = jnp.einsum('znd,zmd->znm', qh, kh,
                       preferred_element_type=jnp.float32) * scale    # (N_HEADS*B, N, N)
        p = jax.nn.softmax(s, axis=-1)
        oh = jnp.einsum('znm,zmd->znd', p, vh,
                        preferred_element_type=jnp.float32)           # (N_HEADS*B, N, HEAD_DIM)

        # heads back into lanes, then a single output projection
        attn = jnp.concatenate(
            [oh[hd * B:(hd + 1) * B] for hd in range(N_HEADS)], axis=-1
        ).reshape(TOK, HID)
        attn = jnp.dot(attn, wo_ref[l], preferred_element_type=jnp.float32) + bo_ref[l]

        # post-norm residual blocks
        h1 = _layer_norm(h + attn, ln1g_ref[l], ln1b_ref[l])
        ff = jnp.dot(h1, w1_ref[l], preferred_element_type=jnp.float32) + b1_ref[l]
        ff = jnp.maximum(ff, 0.0)
        ff = jnp.dot(ff, w2_ref[l], preferred_element_type=jnp.float32) + b2_ref[l]
        h = _layer_norm(h1 + ff, ln2g_ref[l], ln2b_ref[l])
        p_list.append(h)

    # ---- hybrid head: stacked projection + filter + tanh + predictor + mean ----
    lat = jnp.dot(ans_ref[...], wa_ref[...],
                  preferred_element_type=jnp.float32) + ba_ref[...]   # (B, 4*HID)
    p_all = jnp.concatenate(p_list, axis=0)                           # (4*TOK, HID)
    proj = jnp.dot(p_all, whp_ref[...],
                   preferred_element_type=jnp.float32) + bhp_ref[...] # (4*TOK, HID)
    filt = jnp.concatenate(
        [jnp.broadcast_to(lat[:, l * HID:(l + 1) * HID][:, None, :],
                          (B, N, HID)).reshape(TOK, HID)
         for l in range(P_STACK)],
        axis=0)                                                       # (4*TOK, HID)
    z = jnp.tanh(proj + filt)
    row = jnp.sum(z * wpred_ref[...], axis=-1, keepdims=True)         # (4*TOK, 1)
    acc = (row[0 * TOK:1 * TOK] + row[1 * TOK:2 * TOK]
           + row[2 * TOK:3 * TOK] + row[3 * TOK:4 * TOK])             # (TOK, 1)
    out_ref[...] = acc * (1.0 / P_STACK) + bpred_ref[...]             # mean over 4 stacked reps


# ---------------- wrapper ------------------------------------------------------
@jax.jit
def visual_hint_predictor(ppl, answer_vec, params):
    x2d = ppl.reshape(TOK, DIM_PPL)                       # flatten to 2-D at the boundary
    args = (
        x2d, answer_vec,
        params['w_in'], params['b_in'], params['bn_gamma'], params['bn_beta'],
        params['wqkv'], params['bqkv'], params['wo'], params['bo'],
        params['ln1g'], params['ln1b'], params['w1'], params['b1'],
        params['w2'], params['b2'], params['ln2g'], params['ln2b'],
        params['w_a2l'], params['b_a2l'], params['w_hp'], params['b_hp'],
        params['w_pred'], params['b_pred'],
    )
    out = pl.pallas_call(
        fused_vhp_kernel,
        out_shape=jax.ShapeDtypeStruct((TOK, 1), jnp.float32),
        in_specs=[pl.BlockSpec(memory_space=pltpu.MemorySpace.VMEM)] * len(args),
        out_specs=pl.BlockSpec(memory_space=pltpu.MemorySpace.VMEM),
    )(*args)
    return out.reshape(B, N)


# ---------------- parameters (deterministic, synthetic) ------------------------
def make_params(key):
    keys = iter(jax.random.split(key, 80))

    def nrm(shape, scale=0.1):
        return (scale * jax.random.normal(next(keys), shape)).astype(jnp.float32)

    stacked = {k: [] for k in ('wqkv', 'bqkv', 'wo', 'bo', 'ln1g', 'ln1b',
                               'w1', 'b1', 'w2', 'b2', 'ln2g', 'ln2b')}
    for _ in range(N_LAYER):
        wq, wk, wv = nrm((HID, HID)), nrm((HID, HID)), nrm((HID, HID))
        bq, bk, bv = nrm((1, HID)), nrm((1, HID)), nrm((1, HID))
        stacked['wqkv'].append(jnp.concatenate([wq, wk, wv], axis=1))   # fused QKV weight
        stacked['bqkv'].append(jnp.concatenate([bq, bk, bv], axis=1))
        stacked['wo'].append(nrm((HID, HID)));  stacked['bo'].append(nrm((1, HID)))
        stacked['ln1g'].append(jnp.ones((1, HID), jnp.float32))
        stacked['ln1b'].append(jnp.zeros((1, HID), jnp.float32))
        stacked['w1'].append(nrm((HID, HID)));  stacked['b1'].append(nrm((1, HID)))
        stacked['w2'].append(nrm((HID, HID)));  stacked['b2'].append(nrm((1, HID)))
        stacked['ln2g'].append(jnp.ones((1, HID), jnp.float32))
        stacked['ln2b'].append(jnp.zeros((1, HID), jnp.float32))

    params = {k: jnp.stack(v, axis=0) for k, v in stacked.items()}      # (N_LAYER, ...)
    params.update(
        w_in=nrm((DIM_PPL, HID)), b_in=nrm((1, HID)),
        bn_gamma=jnp.ones((1, HID), jnp.float32),
        bn_beta=jnp.zeros((1, HID), jnp.float32),
        w_a2l=nrm((DIM_ANS, P_STACK * HID)), b_a2l=nrm((1, P_STACK * HID)),
        w_hp=nrm((HID, HID)), b_hp=nrm((1, HID)),
        w_pred=nrm((1, HID)), b_pred=nrm((1, 1)),
    )
    return params


# TODO(synk): dropout layers are identity (eval-mode / deterministic forward);
# BatchNorm uses current-batch statistics rather than running_mean/var.

if __name__ == "__main__":
    key = jax.random.PRNGKey(0)
    k_ppl, k_ans, k_par = jax.random.split(key, 3)
    ppl = jax.random.normal(k_ppl, (B, N, DIM_PPL), dtype=jnp.float32)
    answer_vec = jax.random.normal(k_ans, (B, DIM_ANS), dtype=jnp.float32)
    params = make_params(k_par)

    logits = visual_hint_predictor(ppl, answer_vec, params)
    logits = jax.block_until_ready(logits)

    assert logits.shape == (B, N), logits.shape
    assert bool(jnp.all(jnp.isfinite(logits)))
    print("KERNEL_OK")
</pallas_src>

<mosaic_0001>
module attributes {stable_mosaic.version = 11 : i64} {
  func.func @fused_vhp_kernel(%arg0: memref<16x32xf32, #tpu.memory_space<vmem>>, %arg1: memref<2x24xf32, #tpu.memory_space<vmem>>, %arg2: memref<32x48xf32, #tpu.memory_space<vmem>>, %arg3: memref<1x48xf32, #tpu.memory_space<vmem>>, %arg4: memref<1x48xf32, #tpu.memory_space<vmem>>, %arg5: memref<1x48xf32, #tpu.memory_space<vmem>>, %arg6: memref<3x48x144xf32, #tpu.memory_space<vmem>>, %arg7: memref<3x1x144xf32, #tpu.memory_space<vmem>>, %arg8: memref<3x48x48xf32, #tpu.memory_space<vmem>>, %arg9: memref<3x1x48xf32, #tpu.memory_space<vmem>>, %arg10: memref<3x1x48xf32, #tpu.memory_space<vmem>>, %arg11: memref<3x1x48xf32, #tpu.memory_space<vmem>>, %arg12: memref<3x48x48xf32, #tpu.memory_space<vmem>>, %arg13: memref<3x1x48xf32, #tpu.memory_space<vmem>>, %arg14: memref<3x48x48xf32, #tpu.memory_space<vmem>>, %arg15: memref<3x1x48xf32, #tpu.memory_space<vmem>>, %arg16: memref<3x1x48xf32, #tpu.memory_space<vmem>>, %arg17: memref<3x1x48xf32, #tpu.memory_space<vmem>>, %arg18: memref<24x192xf32, #tpu.memory_space<vmem>>, %arg19: memref<1x192xf32, #tpu.memory_space<vmem>>, %arg20: memref<48x48xf32, #tpu.memory_space<vmem>>, %arg21: memref<1x48xf32, #tpu.memory_space<vmem>>, %arg22: memref<1x48xf32, #tpu.memory_space<vmem>>, %arg23: memref<1x1xf32, #tpu.memory_space<vmem>>, %arg24: memref<16x1xf32, #tpu.memory_space<vmem>>) attributes {dimension_semantics = [], scalar_prefetch = 0 : i64, scratch_operands = 0 : i64, tpu.core_type = #tpu.core_type<tc>} {
    %c0 = arith.constant 0 : index
    %c0_0 = arith.constant 0 : index
    %0 = vector.load %arg0[%c0, %c0_0] : memref<16x32xf32, #tpu.memory_space<vmem>>, vector<16x32xf32>
    %c0_1 = arith.constant 0 : index
    %c0_2 = arith.constant 0 : index
    %1 = vector.load %arg2[%c0_1, %c0_2] : memref<32x48xf32, #tpu.memory_space<vmem>>, vector<32x48xf32>
    %cst = arith.constant dense<0.000000e+00> : vector<16x48xf32>
    %2 = tpu.matmul %0, %1, %cst {dimension_numbers = #tpu.dot_dimension_numbers<[1], [0], [0], [1], [0, 0, 1, 1], [], []>} : vector<16x32xf32>, vector<32x48xf32>, vector<16x48xf32> -> vector<16x48xf32>
    %c0_3 = arith.constant 0 : index
    %c0_4 = arith.constant 0 : index
    %3 = vector.load %arg3[%c0_3, %c0_4] : memref<1x48xf32, #tpu.memory_space<vmem>>, vector<1x48xf32>
    %4 = vector.broadcast %3 : vector<1x48xf32> to vector<16x48xf32>
    %5 = arith.addf %2, %4 : vector<16x48xf32>
    %cst_5 = arith.constant dense<0.000000e+00> : vector<48xf32>
    %6 = vector.multi_reduction <add>, %5, %cst_5 [0] : vector<16x48xf32> to vector<48xf32>
    %7 = vector.shape_cast %6 : vector<48xf32> to vector<1x48xf32>
    %cst_6 = arith.constant 1.600000e+01 : f32
    %8 = vector.broadcast %cst_6 : f32 to vector<1x48xf32>
    %9 = arith.divf %7, %8 : vector<1x48xf32>
    %10 = vector.broadcast %9 : vector<1x48xf32> to vector<16x48xf32>
    %11 = arith.subf %5, %10 : vector<16x48xf32>
    %12 = arith.mulf %11, %11 : vector<16x48xf32>
    %cst_7 = arith.constant dense<0.000000e+00> : vector<48xf32>
    %13 = vector.multi_reduction <add>, %12, %cst_7 [0] : vector<16x48xf32> to vector<48xf32>
    %14 = vector.shape_cast %13 : vector<48xf32> to vector<1x48xf32>
    %cst_8 = arith.constant 1.600000e+01 : f32
    %15 = vector.broadcast %cst_8 : f32 to vector<1x48xf32>
    %16 = arith.divf %14, %15 : vector<1x48xf32>
    %17 = vector.broadcast %9 : vector<1x48xf32> to vector<16x48xf32>
    %18 = arith.subf %5, %17 : vector<16x48xf32>
    %cst_9 = arith.constant 9.99999974E-6 : f32
    %19 = vector.broadcast %cst_9 : f32 to vector<1x48xf32>
    %20 = arith.addf %16, %19 : vector<1x48xf32>
    %21 = math.rsqrt %20 : vector<1x48xf32>
    %22 = vector.broadcast %21 : vector<1x48xf32> to vector<16x48xf32>
    %23 = arith.mulf %18, %22 : vector<16x48xf32>
    %c0_10 = arith.constant 0 : index
    %c0_11 = arith.constant 0 : index
    %24 = vector.load %arg4[%c0_10, %c0_11] : memref<1x48xf32, #tpu.memory_space<vmem>>, vector<1x48xf32>
    %25 = vector.broadcast %24 : vector<1x48xf32> to vector<16x48xf32>
    %26 = arith.mulf %23, %25 : vector<16x48xf32>
    %c0_12 = arith.constant 0 : index
    %c0_13 = arith.constant 0 : index
    %27 = vector.load %arg5[%c0_12, %c0_13] : memref<1x48xf32, #tpu.memory_space<vmem>>, vector<1x48xf32>
    %28 = vector.broadcast %27 : vector<1x48xf32> to vector<16x48xf32>
    %29 = arith.addf %26, %28 : vector<16x48xf32>
    %c0_14 = arith.constant 0 : index
    %c0_15 = arith.constant 0 : index
    %c0_16 = arith.constant 0 : index
    %30 = vector.load %arg6[%c0_14, %c0_15, %c0_16] : memref<3x48x144xf32, #tpu.memory_space<vmem>>, vector<1x48x144xf32>
    %31 = vector.shape_cast %30 : vector<1x48x144xf32> to vector<48x144xf32>
    %cst_17 = arith.constant dense<0.000000e+00> : vector<16x144xf32>
    %32 = tpu.matmul %29, %31, %cst_17 {dimension_numbers = #tpu.dot_dimension_numbers<[1], [0], [0], [1], [0, 0, 1, 1], [], []>} : vector<16x48xf32>, vector<48x144xf32>, vector<16x144xf32> -> vector<16x144xf32>
    %c0_18 = arith.constant 0 : index
    %c0_19 = arith.constant 0 : index
    %c0_20 = arith.constant 0 : index
    %33 = vector.load %arg7[%c0_18, %c0_19, %c0_20] : memref<3x1x144xf32, #tpu.memory_space<vmem>>, vector<1x1x144xf32>
    %34 = vector.shape_cast %33 : vector<1x1x144xf32> to vector<1x144xf32>
    %35 = vector.broadcast %34 : vector<1x144xf32> to vector<16x144xf32>
    %36 = arith.addf %32, %35 : vector<16x144xf32>
    %37 = vector.extract_strided_slice %36 {offsets = [0, 0], sizes = [16, 8], strides = [1, 1]} : vector<16x144xf32> to vector<16x8xf32>
    %38 = vector.shape_cast %37 : vector<16x8xf32> to vector<2x8x8xf32>
    %39 = vector.extract_strided_slice %36 {offsets = [0, 8], sizes = [16, 8], strides = [1, 1]} : vector<16x144xf32> to vector<16x8xf32>
    %40 = vector.shape_cast %39 : vector<16x8xf32> to vector<2x8x8xf32>
    %41 = vector.extract_strided_slice %36 {offsets = [0, 16], sizes = [16, 8], strides = [1, 1]} : vector<16x144xf32> to vector<16x8xf32>
    %42 = vector.shape_cast %41 : vector<16x8xf32> to vector<2x8x8xf32>
    %43 = vector.extract_strided_slice %36 {offsets = [0, 24], sizes = [16, 8], strides = [1, 1]} : vector<16x144xf32> to vector<16x8xf32>
    %44 = vector.shape_cast %43 : vector<16x8xf32> to vector<2x8x8xf32>
    %45 = vector.extract_strided_slice %36 {offsets = [0, 32], sizes = [16, 8], strides = [1, 1]} : vector<16x144xf32> to vector<16x8xf32>
    %46 = vector.shape_cast %45 : vector<16x8xf32> to vector<2x8x8xf32>
    %47 = vector.extract_strided_slice %36 {offsets = [0, 40], sizes = [16, 8], strides = [1, 1]} : vector<16x144xf32> to vector<16x8xf32>
    %48 = vector.shape_cast %47 : vector<16x8xf32> to vector<2x8x8xf32>
    %49 = tpu.concatenate %38, %40, %42, %44, %46, %48 in 0 : vector<2x8x8xf32>, vector<2x8x8xf32>, vector<2x8x8xf32>, vector<2x8x8xf32>, vector<2x8x8xf32>, vector<2x8x8xf32> -> vector<12x8x8xf32>
    %50 = vector.extract_strided_slice %36 {offsets = [0, 48], sizes = [16, 8], strides = [1, 1]} : vector<16x144xf32> to vector<16x8xf32>
    %51 = vector.shape_cast %50 : vector<16x8xf32> to vector<2x8x8xf32>
    %52 = vector.extract_strided_slice %36 {offsets = [0, 56], sizes = [16, 8], strides = [1, 1]} : vector<16x144xf32> to vector<16x8xf32>
    %53 = vector.shape_cast %52 : vector<16x8xf32> to vector<2x8x8xf32>
    %54 = vector.extract_strided_slice %36 {offsets = [0, 64], sizes = [16, 8], strides = [1, 1]} : vector<16x144xf32> to vector<16x8xf32>
    %55 = vector.shape_cast %54 : vector<16x8xf32> to vector<2x8x8xf32>
    %56 = vector.extract_strided_slice %36 {offsets = [0, 72], sizes = [16, 8], strides = [1, 1]} : vector<16x144xf32> to vector<16x8xf32>
    %57 = vector.shape_cast %56 : vector<16x8xf32> to vector<2x8x8xf32>
    %58 = vector.extract_strided_slice %36 {offsets = [0, 80], sizes = [16, 8], strides = [1, 1]} : vector<16x144xf32> to vector<16x8xf32>
    %59 = vector.shape_cast %58 : vector<16x8xf32> to vector<2x8x8xf32>
    %60 = vector.extract_strided_slice %36 {offsets = [0, 88], sizes = [16, 8], strides = [1, 1]} : vector<16x144xf32> to vector<16x8xf32>
    %61 = vector.shape_cast %60 : vector<16x8xf32> to vector<2x8x8xf32>
    %62 = tpu.concatenate %51, %53, %55, %57, %59, %61 in 0 : vector<2x8x8xf32>, vector<2x8x8xf32>, vector<2x8x8xf32>, vector<2x8x8xf32>, vector<2x8x8xf32>, vector<2x8x8xf32> -> vector<12x8x8xf32>
    %63 = vector.extract_strided_slice %36 {offsets = [0, 96], sizes = [16, 8], strides = [1, 1]} : vector<16x144xf32> to vector<16x8xf32>
    %64 = vector.shape_cast %63 : vector<16x8xf32> to vector<2x8x8xf32>
    %65 = vector.extract_strided_slice %36 {offsets = [0, 104], sizes = [16, 8], strides = [1, 1]} : vector<16x144xf32> to vector<16x8xf32>
    %66 = vector.shape_cast %65 : vector<16x8xf32> to vector<2x8x8xf32>
    %67 = vector.extract_strided_slice %36 {offsets = [0, 112], sizes = [16, 8], strides = [1, 1]} : vector<16x144xf32> to vector<16x8xf32>
    %68 = vector.shape_cast %67 : vector<16x8xf32> to vector<2x8x8xf32>
    %69 = vector.extract_strided_slice %36 {offsets = [0, 120], sizes = [16, 8], strides = [1, 1]} : vector<16x144xf32> to vector<16x8xf32>
    %70 = vector.shape_cast %69 : vector<16x8xf32> to vector<2x8x8xf32>
    %71 = vector.extract_strided_slice %36 {offsets = [0, 128], sizes = [16, 8], strides = [1, 1]} : vector<16x144xf32> to vector<16x8xf32>
    %72 = vector.shape_cast %71 : vector<16x8xf32> to vector<2x8x8xf32>
    %73 = vector.extract_strided_slice %36 {offsets = [0, 136], sizes = [16, 8], strides = [1, 1]} : vector<16x144xf32> to vector<16x8xf32>
    %74 = vector.shape_cast %73 : vector<16x8xf32> to vector<2x8x8xf32>
    %75 = tpu.concatenate %64, %66, %68, %70, %72, %74 in 0 : vector<2x8x8xf32>, vector<2x8x8xf32>, vector<2x8x8xf32>, vector<2x8x8xf32>, vector<2x8x8xf32>, vector<2x8x8xf32> -> vector<12x8x8xf32>
    "tpu.trace_start"() <{level = 10 : i32, message = "znd,zmd->znm"}> : () -> ()
    %cst_21 = arith.constant dense<0.000000e+00> : vector<12x8x8xf32>
    %76 = tpu.matmul %49, %62, %cst_21 {dimension_numbers = #tpu.dot_dimension_numbers<[2], [2], [1], [1], [0, 0, 0, 1, 1, 1], [0], [0]>} : vector<12x8x8xf32>, vector<12x8x8xf32>, vector<12x8x8xf32> -> vector<12x8x8xf32>
    "tpu.trace_stop"() : () -> ()
    %cst_22 = arith.constant 0.353553385 : f32
    %77 = vector.broadcast %cst_22 : f32 to vector<12x8x8xf32>
    %78 = arith.mulf %76, %77 : vector<12x8x8xf32>
    %cst_23 = arith.constant dense<0xFF800000> : vector<12x8xf32>
    %79 = vector.multi_reduction <maximumf>, %78, %cst_23 [2] : vector<12x8x8xf32> to vector<12x8xf32>
    %cst_24 = arith.constant 0xFF800000 : f32
    %80 = vector.broadcast %cst_24 : f32 to vector<12x8xf32>
    %81 = arith.maximumf %80, %79 : vector<12x8xf32>
    %82 = vector.shape_cast %81 : vector<12x8xf32> to vector<12x8x1xf32>
    %83 = vector.broadcast %82 : vector<12x8x1xf32> to vector<12x8x8xf32>
    %84 = arith.subf %78, %83 : vector<12x8x8xf32>
    %85 = math.exp %84 : vector<12x8x8xf32>
    %cst_25 = arith.constant dense<0.000000e+00> : vector<12x8xf32>
    %86 = vector.multi_reduction <add>, %85, %cst_25 [2] : vector<12x8x8xf32> to vector<12x8xf32>
    %87 = vector.shape_cast %86 : vector<12x8xf32> to vector<12x8x1xf32>
    %88 = vector.broadcast %87 : vector<12x8x1xf32> to vector<12x8x8xf32>
    %89 = arith.divf %85, %88 : vector<12x8x8xf32>
    "tpu.trace_start"() <{level = 10 : i32, message = "znm,zmd->znd"}> : () -> ()
    %cst_26 = arith.constant dense<0.000000e+00> : vector<12x8x8xf32>
    %90 = tpu.matmul %89, %75, %cst_26 {dimension_numbers = #tpu.dot_dimension_numbers<[2], [1], [1], [2], [0, 0, 0, 1, 1, 2], [0], [0]>} : vector<12x8x8xf32>, vector<12x8x8xf32>, vector<12x8x8xf32> -> vector<12x8x8xf32>
    "tpu.trace_stop"() : () -> ()
    %91 = vector.extract_strided_slice %90 {offsets = [0, 0, 0], sizes = [2, 8, 8], strides = [1, 1, 1]} : vector<12x8x8xf32> to vector<2x8x8xf32>
    %92 = vector.extract_strided_slice %90 {offsets = [2, 0, 0], sizes = [2, 8, 8], strides = [1, 1, 1]} : vector<12x8x8xf32> to vector<2x8x8xf32>
    %93 = vector.extract_strided_slice %90 {offsets = [4, 0, 0], sizes = [2, 8, 8], strides = [1, 1, 1]} : vector<12x8x8xf32> to vector<2x8x8xf32>
    %94 = vector.extract_strided_slice %90 {offsets = [6, 0, 0], sizes = [2, 8, 8], strides = [1, 1, 1]} : vector<12x8x8xf32> to vector<2x8x8xf32>
    %95 = vector.extract_strided_slice %90 {offsets = [8, 0, 0], sizes = [2, 8, 8], strides = [1, 1, 1]} : vector<12x8x8xf32> to vector<2x8x8xf32>
    %96 = vector.extract_strided_slice %90 {offsets = [10, 0, 0], sizes = [2, 8, 8], strides = [1, 1, 1]} : vector<12x8x8xf32> to vector<2x8x8xf32>
    %97 = tpu.concatenate %91, %92, %93, %94, %95, %96 in 2 : vector<2x8x8xf32>, vector<2x8x8xf32>, vector<2x8x8xf32>, vector<2x8x8xf32>, vector<2x8x8xf32>, vector<2x8x8xf32> -> vector<2x8x48xf32>
    %98 = vector.shape_cast %97 : vector<2x8x48xf32> to vector<16x48xf32>
    %c0_27 = arith.constant 0 : index
    %c0_28 = arith.constant 0 : index
    %c0_29 = arith.constant 0 : index
    %99 = vector.load %arg8[%c0_27, %c0_28, %c0_29] : memref<3x48x48xf32, #tpu.memory_space<vmem>>, vector<1x48x48xf32>
    %100 = vector.shape_cast %99 : vector<1x48x48xf32> to vector<48x48xf32>
    %cst_30 = arith.constant dense<0.000000e+00> : vector<16x48xf32>
    %101 = tpu.matmul %98, %100, %cst_30 {dimension_numbers = #tpu.dot_dimension_numbers<[1], [0], [0], [1], [0, 0, 1, 1], [], []>} : vector<16x48xf32>, vector<48x48xf32>, vector<16x48xf32> -> vector<16x48xf32>
    %c0_31 = arith.constant 0 : index
    %c0_32 = arith.constant 0 : index
    %c0_33 = arith.constant 0 : index
    %102 = vector.load %arg9[%c0_31, %c0_32, %c0_33] : memref<3x1x48xf32, #tpu.memory_space<vmem>>, vector<1x1x48xf32>
    %103 = vector.shape_cast %102 : vector<1x1x48xf32> to vector<1x48xf32>
    %104 = vector.broadcast %103 : vector<1x48xf32> to vector<16x48xf32>
    %105 = arith.addf %101, %104 : vector<16x48xf32>
    %106 = arith.addf %29, %105 : vector<16x48xf32>
    %c0_34 = arith.constant 0 : index
    %c0_35 = arith.constant 0 : index
    %c0_36 = arith.constant 0 : index
    %107 = vector.load %arg10[%c0_34, %c0_35, %c0_36] : memref<3x1x48xf32, #tpu.memory_space<vmem>>, vector<1x1x48xf32>
    %108 = vector.shape_cast %107 : vector<1x1x48xf32> to vector<1x48xf32>
    %c0_37 = arith.constant 0 : index
    %c0_38 = arith.constant 0 : index
    %c0_39 = arith.constant 0 : index
    %109 = vector.load %arg11[%c0_37, %c0_38, %c0_39] : memref<3x1x48xf32, #tpu.memory_space<vmem>>, vector<1x1x48xf32>
    %110 = vector.shape_cast %109 : vector<1x1x48xf32> to vector<1x48xf32>
    %cst_40 = arith.constant dense<0.000000e+00> : vector<16xf32>
    %111 = vector.multi_reduction <add>, %106, %cst_40 [1] : vector<16x48xf32> to vector<16xf32>
    %112 = vector.shape_cast %111 : vector<16xf32> to vector<16x1xf32>
    %cst_41 = arith.constant 4.800000e+01 : f32
    %113 = vector.broadcast %cst_41 : f32 to vector<16x1xf32>
    %114 = arith.divf %112, %113 : vector<16x1xf32>
    %115 = vector.broadcast %114 : vector<16x1xf32> to vector<16x48xf32>
    %116 = arith.subf %106, %115 : vector<16x48xf32>
    %117 = arith.mulf %116, %116 : vector<16x48xf32>
    %cst_42 = arith.constant dense<0.000000e+00> : vector<16xf32>
    %118 = vector.multi_reduction <add>, %117, %cst_42 [1] : vector<16x48xf32> to vector<16xf32>
    %119 = vector.shape_cast %118 : vector<16xf32> to vector<16x1xf32>
    %cst_43 = arith.constant 4.800000e+01 : f32
    %120 = vector.broadcast %cst_43 : f32 to vector<16x1xf32>
    %121 = arith.divf %119, %120 : vector<16x1xf32>
    %122 = vector.broadcast %114 : vector<16x1xf32> to vector<16x48xf32>
    %123 = arith.subf %106, %122 : vector<16x48xf32>
    %cst_44 = arith.constant 9.99999974E-6 : f32
    %124 = vector.broadcast %cst_44 : f32 to vector<16x1xf32>
    %125 = arith.addf %121, %124 : vector<16x1xf32>
    %126 = math.rsqrt %125 : vector<16x1xf32>
    %127 = vector.broadcast %126 : vector<16x1xf32> to vector<16x48xf32>
    %128 = arith.mulf %123, %127 : vector<16x48xf32>
    %129 = vector.broadcast %108 : vector<1x48xf32> to vector<16x48xf32>
    %130 = arith.mulf %128, %129 : vector<16x48xf32>
    %131 = vector.broadcast %110 : vector<1x48xf32> to vector<16x48xf32>
    %132 = arith.addf %130, %131 : vector<16x48xf32>
    %c0_45 = arith.constant 0 : index
    %c0_46 = arith.constant 0 : index
    %c0_47 = arith.constant 0 : index
    %133 = vector.load %arg12[%c0_45, %c0_46, %c0_47] : memref<3x48x48xf32, #tpu.memory_space<vmem>>, vector<1x48x48xf32>
    %134 = vector.shape_cast %133 : vector<1x48x48xf32> to vector<48x48xf32>
    %cst_48 = arith.constant dense<0.000000e+00> : vector<16x48xf32>
    %135 = tpu.matmul %132, %134, %cst_48 {dimension_numbers = #tpu.dot_dimension_numbers<[1], [0], [0], [1], [0, 0, 1, 1], [], []>} : vector<16x48xf32>, vector<48x48xf32>, vector<16x48xf32> -> vector<16x48xf32>
    %c0_49 = arith.constant 0 : index
    %c0_50 = arith.constant 0 : index
    %c0_51 = arith.constant 0 : index
    %136 = vector.load %arg13[%c0_49, %c0_50, %c0_51] : memref<3x1x48xf32, #tpu.memory_space<vmem>>, vector<1x1x48xf32>
    %137 = vector.shape_cast %136 : vector<1x1x48xf32> to vector<1x48xf32>
    %138 = vector.broadcast %137 : vector<1x48xf32> to vector<16x48xf32>
    %139 = arith.addf %135, %138 : vector<16x48xf32>
    %cst_52 = arith.constant 0.000000e+00 : f32
    %140 = vector.broadcast %cst_52 : f32 to vector<16x48xf32>
    %141 = arith.maximumf %139, %140 : vector<16x48xf32>
    %c0_53 = arith.constant 0 : index
    %c0_54 = arith.constant 0 : index
    %c0_55 = arith.constant 0 : index
    %142 = vector.load %arg14[%c0_53, %c0_54, %c0_55] : memref<3x48x48xf32, #tpu.memory_space<vmem>>, vector<1x48x48xf32>
    %143 = vector.shape_cast %142 : vector<1x48x48xf32> to vector<48x48xf32>
    %cst_56 = arith.constant dense<0.000000e+00> : vector<16x48xf32>
    %144 = tpu.matmul %141, %143, %cst_56 {dimension_numbers = #tpu.dot_dimension_numbers<[1], [0], [0], [1], [0, 0, 1, 1], [], []>} : vector<16x48xf32>, vector<48x48xf32>, vector<16x48xf32> -> vector<16x48xf32>
    %c0_57 = arith.constant 0 : index
    %c0_58 = arith.constant 0 : index
    %c0_59 = arith.constant 0 : index
    %145 = vector.load %arg15[%c0_57, %c0_58, %c0_59] : memref<3x1x48xf32, #tpu.memory_space<vmem>>, vector<1x1x48xf32>
    %146 = vector.shape_cast %145 : vector<1x1x48xf32> to vector<1x48xf32>
    %147 = vector.broadcast %146 : vector<1x48xf32> to vector<16x48xf32>
    %148 = arith.addf %144, %147 : vector<16x48xf32>
    %149 = arith.addf %132, %148 : vector<16x48xf32>
    %c0_60 = arith.constant 0 : index
    %c0_61 = arith.constant 0 : index
    %c0_62 = arith.constant 0 : index
    %150 = vector.load %arg16[%c0_60, %c0_61, %c0_62] : memref<3x1x48xf32, #tpu.memory_space<vmem>>, vector<1x1x48xf32>
    %151 = vector.shape_cast %150 : vector<1x1x48xf32> to vector<1x48xf32>
    %c0_63 = arith.constant 0 : index
    %c0_64 = arith.constant 0 : index
    %c0_65 = arith.constant 0 : index
    %152 = vector.load %arg17[%c0_63, %c0_64, %c0_65] : memref<3x1x48xf32, #tpu.memory_space<vmem>>, vector<1x1x48xf32>
    %153 = vector.shape_cast %152 : vector<1x1x48xf32> to vector<1x48xf32>
    %cst_66 = arith.constant dense<0.000000e+00> : vector<16xf32>
    %154 = vector.multi_reduction <add>, %149, %cst_66 [1] : vector<16x48xf32> to vector<16xf32>
    %155 = vector.shape_cast %154 : vector<16xf32> to vector<16x1xf32>
    %cst_67 = arith.constant 4.800000e+01 : f32
    %156 = vector.broadcast %cst_67 : f32 to vector<16x1xf32>
    %157 = arith.divf %155, %156 : vector<16x1xf32>
    %158 = vector.broadcast %157 : vector<16x1xf32> to vector<16x48xf32>
    %159 = arith.subf %149, %158 : vector<16x48xf32>
    %160 = arith.mulf %159, %159 : vector<16x48xf32>
    %cst_68 = arith.constant dense<0.000000e+00> : vector<16xf32>
    %161 = vector.multi_reduction <add>, %160, %cst_68 [1] : vector<16x48xf32> to vector<16xf32>
    %162 = vector.shape_cast %161 : vector<16xf32> to vector<16x1xf32>
    %cst_69 = arith.constant 4.800000e+01 : f32
    %163 = vector.broadcast %cst_69 : f32 to vector<16x1xf32>
    %164 = arith.divf %162, %163 : vector<16x1xf32>
    %165 = vector.broadcast %157 : vector<16x1xf32> to vector<16x48xf32>
    %166 = arith.subf %149, %165 : vector<16x48xf32>
    %cst_70 = arith.constant 9.99999974E-6 : f32
    %167 = vector.broadcast %cst_70 : f32 to vector<16x1xf32>
    %168 = arith.addf %164, %167 : vector<16x1xf32>
    %169 = math.rsqrt %168 : vector<16x1xf32>
    %170 = vector.broadcast %169 : vector<16x1xf32> to vector<16x48xf32>
    %171 = arith.mulf %166, %170 : vector<16x48xf32>
    %172 = vector.broadcast %151 : vector<1x48xf32> to vector<16x48xf32>
    %173 = arith.mulf %171, %172 : vector<16x48xf32>
    %174 = vector.broadcast %153 : vector<1x48xf32> to vector<16x48xf32>
    %175 = arith.addf %173, %174 : vector<16x48xf32>
    %c1 = arith.constant 1 : index
    %c0_71 = arith.constant 0 : index
    %c0_72 = arith.constant 0 : index
    %176 = vector.load %arg6[%c1, %c0_71, %c0_72] : memref<3x48x144xf32, #tpu.memory_space<vmem>>, vector<1x48x144xf32>
    %177 = vector.shape_cast %176 : vector<1x48x144xf32> to vector<48x144xf32>
    %cst_73 = arith.constant dense<0.000000e+00> : vector<16x144xf32>
    %178 = tpu.matmul %175, %177, %cst_73 {dimension_numbers = #tpu.dot_dimension_numbers<[1], [0], [0], [1], [0, 0, 1, 1], [], []>} : vector<16x48xf32>, vector<48x144xf32>, vector<16x144xf32> -> vector<16x144xf32>
    %c1_74 = arith.constant 1 : index
    %c0_75 = arith.constant 0 : index
    %c0_76 = arith.constant 0 : index
    %179 = vector.load %arg7[%c1_74, %c0_75, %c0_76] : memref<3x1x144xf32, #tpu.memory_space<vmem>>, vector<1x1x144xf32>
    %180 = vector.shape_cast %179 : vector<1x1x144xf32> to vector<1x144xf32>
    %181 = vector.broadcast %180 : vector<1x144xf32> to vector<16x144xf32>
    %182 = arith.addf %178, %181 : vector<16x144xf32>
    %183 = vector.extract_strided_slice %182 {offsets = [0, 0], sizes = [16, 8], strides = [1, 1]} : vector<16x144xf32> to vector<16x8xf32>
    %184 = vector.shape_cast %183 : vector<16x8xf32> to vector<2x8x8xf32>
    %185 = vector.extract_strided_slice %182 {offsets = [0, 8], sizes = [16, 8], strides = [1, 1]} : vector<16x144xf32> to vector<16x8xf32>
    %186 = vector.shape_cast %185 : vector<16x8xf32> to vector<2x8x8xf32>
    %187 = vector.extract_strided_slice %182 {offsets = [0, 16], sizes = [16, 8], strides = [1, 1]} : vector<16x144xf32> to vector<16x8xf32>
    %188 = vector.shape_cast %187 : vector<16x8xf32> to vector<2x8x8xf32>
    %189 = vector.extract_strided_slice %182 {offsets = [0, 24], sizes = [16, 8], strides = [1, 1]} : vector<16x144xf32> to vector<16x8xf32>
    %190 = vector.shape_cast %189 : vector<16x8xf32> to vector<2x8x8xf32>
    %191 = vector.extract_strided_slice %182 {offsets = [0, 32], sizes = [16, 8], strides = [1, 1]} : vector<16x144xf32> to vector<16x8xf32>
    %192 = vector.shape_cast %191 : vector<16x8xf32> to vector<2x8x8xf32>
    %193 = vector.extract_strided_slice %182 {offsets = [0, 40], sizes = [16, 8], strides = [1, 1]} : vector<16x144xf32> to vector<16x8xf32>
    %194 = vector.shape_cast %193 : vector<16x8xf32> to vector<2x8x8xf32>
    %195 = tpu.concatenate %184, %186, %188, %190, %192, %194 in 0 : vector<2x8x8xf32>, vector<2x8x8xf32>, vector<2x8x8xf32>, vector<2x8x8xf32>, vector<2x8x8xf32>, vector<2x8x8xf32> -> vector<12x8x8xf32>
    %196 = vector.extract_strided_slice %182 {offsets = [0, 48], sizes = [16, 8], strides = [1, 1]} : vector<16x144xf32> to vector<16x8xf32>
    %197 = vector.shape_cast %196 : vector<16x8xf32> to vector<2x8x8xf32>
    %198 = vector.extract_strided_slice %182 {offsets = [0, 56], sizes = [16, 8], strides = [1, 1]} : vector<16x144xf32> to vector<16x8xf32>
    %199 = vector.shape_cast %198 : vector<16x8xf32> to vector<2x8x8xf32>
    %200 = vector.extract_strided_slice %182 {offsets = [0, 64], sizes = [16, 8], strides = [1, 1]} : vector<16x144xf32> to vector<16x8xf32>
    %201 = vector.shape_cast %200 : vector<16x8xf32> to vector<2x8x8xf32>
    %202 = vector.extract_strided_slice %182 {offsets = [0, 72], sizes = [16, 8], strides = [1, 1]} : vector<16x144xf32> to vector<16x8xf32>
    %203 = vector.shape_cast %202 : vector<16x8xf32> to vector<2x8x8xf32>
    %204 = vector.extract_strided_slice %182 {offsets = [0, 80], sizes = [16, 8], strides = [1, 1]} : vector<16x144xf32> to vector<16x8xf32>
    %205 = vector.shape_cast %204 : vector<16x8xf32> to vector<2x8x8xf32>
    %206 = vector.extract_strided_slice %182 {offsets = [0, 88], sizes = [16, 8], strides = [1, 1]} : vector<16x144xf32> to vector<16x8xf32>
    %207 = vector.shape_cast %206 : vector<16x8xf32> to vector<2x8x8xf32>
    %208 = tpu.concatenate %197, %199, %201, %203, %205, %207 in 0 : vector<2x8x8xf32>, vector<2x8x8xf32>, vector<2x8x8xf32>, vector<2x8x8xf32>, vector<2x8x8xf32>, vector<2x8x8xf32> -> vector<12x8x8xf32>
    %209 = vector.extract_strided_slice %182 {offsets = [0, 96], sizes = [16, 8], strides = [1, 1]} : vector<16x144xf32> to vector<16x8xf32>
    %210 = vector.shape_cast %209 : vector<16x8xf32> to vector<2x8x8xf32>
    %211 = vector.extract_strided_slice %182 {offsets = [0, 104], sizes = [16, 8], strides = [1, 1]} : vector<16x144xf32> to vector<16x8xf32>
    %212 = vector.shape_cast %211 : vector<16x8xf32> to vector<2x8x8xf32>
    %213 = vector.extract_strided_slice %182 {offsets = [0, 112], sizes = [16, 8], strides = [1, 1]} : vector<16x144xf32> to vector<16x8xf32>
    %214 = vector.shape_cast %213 : vector<16x8xf32> to vector<2x8x8xf32>
    %215 = vector.extract_strided_slice %182 {offsets = [0, 120], sizes = [16, 8], strides = [1, 1]} : vector<16x144xf32> to vector<16x8xf32>
    %216 = vector.shape_cast %215 : vector<16x8xf32> to vector<2x8x8xf32>
    %217 = vector.extract_strided_slice %182 {offsets = [0, 128], sizes = [16, 8], strides = [1, 1]} : vector<16x144xf32> to vector<16x8xf32>
    %218 = vector.shape_cast %217 : vector<16x8xf32> to vector<2x8x8xf32>
    %219 = vector.extract_strided_slice %182 {offsets = [0, 136], sizes = [16, 8], strides = [1, 1]} : vector<16x144xf32> to vector<16x8xf32>
    %220 = vector.shape_cast %219 : vector<16x8xf32> to vector<2x8x8xf32>
    %221 = tpu.concatenate %210, %212, %214, %216, %218, %220 in 0 : vector<2x8x8xf32>, vector<2x8x8xf32>, vector<2x8x8xf32>, vector<2x8x8xf32>, vector<2x8x8xf32>, vector<2x8x8xf32> -> vector<12x8x8xf32>
    "tpu.trace_start"() <{level = 10 : i32, message = "znd,zmd->znm"}> : () -> ()
    %cst_77 = arith.constant dense<0.000000e+00> : vector<12x8x8xf32>
    %222 = tpu.matmul %195, %208, %cst_77 {dimension_numbers = #tpu.dot_dimension_numbers<[2], [2], [1], [1], [0, 0, 0, 1, 1, 1], [0], [0]>} : vector<12x8x8xf32>, vector<12x8x8xf32>, vector<12x8x8xf32> -> vector<12x8x8xf32>
    "tpu.trace_stop"() : () -> ()
    %cst_78 = arith.constant 0.353553385 : f32
    %223 = vector.broadcast %cst_78 : f32 to vector<12x8x8xf32>
    %224 = arith.mulf %222, %223 : vector<12x8x8xf32>
    %cst_79 = arith.constant dense<0xFF800000> : vector<12x8xf32>
    %225 = vector.multi_reduction <maximumf>, %224, %cst_79 [2] : vector<12x8x8xf32> to vector<12x8xf32>
    %cst_80 = arith.constant 0xFF800000 : f32
    %226 = vector.broadcast %cst_80 : f32 to vector<12x8xf32>
    %227 = arith.maximumf %226, %225 : vector<12x8xf32>
    %228 = vector.shape_cast %227 : vector<12x8xf32> to vector<12x8x1xf32>
    %229 = vector.broadcast %228 : vector<12x8x1xf32> to vector<12x8x8xf32>
    %230 = arith.subf %224, %229 : vector<12x8x8xf32>
    %231 = math.exp %230 : vector<12x8x8xf32>
    %cst_81 = arith.constant dense<0.000000e+00> : vector<12x8xf32>
    %232 = vector.multi_reduction <add>, %231, %cst_81 [2] : vector<12x8x8xf32> to vector<12x8xf32>
    %233 = vector.shape_cast %232 : vector<12x8xf32> to vector<12x8x1xf32>
    %234 = vector.broadcast %233 : vector<12x8x1xf32> to vector<12x8x8xf32>
    %235 = arith.divf %231, %234 : vector<12x8x8xf32>
    "tpu.trace_start"() <{level = 10 : i32, message = "znm,zmd->znd"}> : () -> ()
    %cst_82 = arith.constant dense<0.000000e+00> : vector<12x8x8xf32>
    %236 = tpu.matmul %235, %221, %cst_82 {dimension_numbers = #tpu.dot_dimension_numbers<[2], [1], [1], [2], [0, 0, 0, 1, 1, 2], [0], [0]>} : vector<12x8x8xf32>, vector<12x8x8xf32>, vector<12x8x8xf32> -> vector<12x8x8xf32>
    "tpu.trace_stop"() : () -> ()
    %237 = vector.extract_strided_slice %236 {offsets = [0, 0, 0], sizes = [2, 8, 8], strides = [1, 1, 1]} : vector<12x8x8xf32> to vector<2x8x8xf32>
    %238 = vector.extract_strided_slice %236 {offsets = [2, 0, 0], sizes = [2, 8, 8], strides = [1, 1, 1]} : vector<12x8x8xf32> to vector<2x8x8xf32>
    %239 = vector.extract_strided_slice %236 {offsets = [4, 0, 0], sizes = [2, 8, 8], strides = [1, 1, 1]} : vector<12x8x8xf32> to vector<2x8x8xf32>
    %240 = vector.extract_strided_slice %236 {offsets = [6, 0, 0], sizes = [2, 8, 8], strides = [1, 1, 1]} : vector<12x8x8xf32> to vector<2x8x8xf32>
    %241 = vector.extract_strided_slice %236 {offsets = [8, 0, 0], sizes = [2, 8, 8], strides = [1, 1, 1]} : vector<12x8x8xf32> to vector<2x8x8xf32>
    %242 = vector.extract_strided_slice %236 {offsets = [10, 0, 0], sizes = [2, 8, 8], strides = [1, 1, 1]} : vector<12x8x8xf32> to vector<2x8x8xf32>
    %243 = tpu.concatenate %237, %238, %239, %240, %241, %242 in 2 : vector<2x8x8xf32>, vector<2x8x8xf32>, vector<2x8x8xf32>, vector<2x8x8xf32>, vector<2x8x8xf32>, vector<2x8x8xf32> -> vector<2x8x48xf32>
    %244 = vector.shape_cast %243 : vector<2x8x48xf32> to vector<16x48xf32>
    %c1_83 = arith.constant 1 : index
    %c0_84 = arith.constant 0 : index
    %c0_85 = arith.constant 0 : index
    %245 = vector.load %arg8[%c1_83, %c0_84, %c0_85] : memref<3x48x48xf32, #tpu.memory_space<vmem>>, vector<1x48x48xf32>
    %246 = vector.shape_cast %245 : vector<1x48x48xf32> to vector<48x48xf32>
    %cst_86 = arith.constant dense<0.000000e+00> : vector<16x48xf32>
    %247 = tpu.matmul %244, %246, %cst_86 {dimension_numbers = #tpu.dot_dimension_numbers<[1], [0], [0], [1], [0, 0, 1, 1], [], []>} : vector<16x48xf32>, vector<48x48xf32>, vector<16x48xf32> -> vector<16x48xf32>
    %c1_87 = arith.constant 1 : index
    %c0_88 = arith.constant 0 : index
    %c0_89 = arith.constant 0 : index
    %248 = vector.load %arg9[%c1_87, %c0_88, %c0_89] : memref<3x1x48xf32, #tpu.memory_space<vmem>>, vector<1x1x48xf32>
    %249 = vector.shape_cast %248 : vector<1x1x48xf32> to vector<1x48xf32>
    %250 = vector.broadcast %249 : vector<1x48xf32> to vector<16x48xf32>
    %251 = arith.addf %247, %250 : vector<16x48xf32>
    %252 = arith.addf %175, %251 : vector<16x48xf32>
    %c1_90 = arith.constant 1 : index
    %c0_91 = arith.constant 0 : index
    %c0_92 = arith.constant 0 : index
    %253 = vector.load %arg10[%c1_90, %c0_91, %c0_92] : memref<3x1x48xf32, #tpu.memory_space<vmem>>, vector<1x1x48xf32>
    %254 = vector.shape_cast %253 : vector<1x1x48xf32> to vector<1x48xf32>
    %c1_93 = arith.constant 1 : index
    %c0_94 = arith.constant 0 : index
    %c0_95 = arith.constant 0 : index
    %255 = vector.load %arg11[%c1_93, %c0_94, %c0_95] : memref<3x1x48xf32, #tpu.memory_space<vmem>>, vector<1x1x48xf32>
    %256 = vector.shape_cast %255 : vector<1x1x48xf32> to vector<1x48xf32>
    %cst_96 = arith.constant dense<0.000000e+00> : vector<16xf32>
    %257 = vector.multi_reduction <add>, %252, %cst_96 [1] : vector<16x48xf32> to vector<16xf32>
    %258 = vector.shape_cast %257 : vector<16xf32> to vector<16x1xf32>
    %cst_97 = arith.constant 4.800000e+01 : f32
    %259 = vector.broadcast %cst_97 : f32 to vector<16x1xf32>
    %260 = arith.divf %258, %259 : vector<16x1xf32>
    %261 = vector.broadcast %260 : vector<16x1xf32> to vector<16x48xf32>
    %262 = arith.subf %252, %261 : vector<16x48xf32>
    %263 = arith.mulf %262, %262 : vector<16x48xf32>
    %cst_98 = arith.constant dense<0.000000e+00> : vector<16xf32>
    %264 = vector.multi_reduction <add>, %263, %cst_98 [1] : vector<16x48xf32> to vector<16xf32>
    %265 = vector.shape_cast %264 : vector<16xf32> to vector<16x1xf32>
    %cst_99 = arith.constant 4.800000e+01 : f32
    %266 = vector.broadcast %cst_99 : f32 to vector<16x1xf32>
    %267 = arith.divf %265, %266 : vector<16x1xf32>
    %268 = vector.broadcast %260 : vector<16x1xf32> to vector<16x48xf32>
    %269 = arith.subf %252, %268 : vector<16x48xf32>
    %cst_100 = arith.constant 9.99999974E-6 : f32
    %270 = vector.broadcast %cst_100 : f32 to vector<16x1xf32>
    %271 = arith.addf %267, %270 : vector<16x1xf32>
    %272 = math.rsqrt %271 : vector<16x1xf32>
    %273 = vector.broadcast %272 : vector<16x1xf32> to vector<16x48xf32>
    %274 = arith.mulf %269, %273 : vector<16x48xf32>
    %275 = vector.broadcast %254 : vector<1x48xf32> to vector<16x48xf32>
    %276 = arith.mulf %274, %275 : vector<16x48xf32>
    %277 = vector.broadcast %256 : vector<1x48xf32> to vector<16x48xf32>
    %278 = arith.addf %276, %277 : vector<16x48xf32>
    %c1_101 = arith.constant 1 : index
    %c0_102 = arith.constant 0 : index
    %c0_103 = arith.constant 0 : index
    %279 = vector.load %arg12[%c1_101, %c0_102, %c0_103] : memref<3x48x48xf32, #tpu.memory_space<vmem>>, vector<1x48x48xf32>
    %280 = vector.shape_cast %279 : vector<1x48x48xf32> to vector<48x48xf32>
    %cst_104 = arith.constant dense<0.000000e+00> : vector<16x48xf32>
    %281 = tpu.matmul %278, %280, %cst_104 {dimension_numbers = #tpu.dot_dimension_numbers<[1], [0], [0], [1], [0, 0, 1, 1], [], []>} : vector<16x48xf32>, vector<48x48xf32>, vector<16x48xf32> -> vector<16x48xf32>
    %c1_105 = arith.constant 1 : index
    %c0_106 = arith.constant 0 : index
    %c0_107 = arith.constant 0 : index
    %282 = vector.load %arg13[%c1_105, %c0_106, %c0_107] : memref<3x1x48xf32, #tpu.memory_space<vmem>>, vector<1x1x48xf32>
    %283 = vector.shape_cast %282 : vector<1x1x48xf32> to vector<1x48xf32>
    %284 = vector.broadcast %283 : vector<1x48xf32> to vector<16x48xf32>
    %285 = arith.addf %281, %284 : vector<16x48xf32>
    %cst_108 = arith.constant 0.000000e+00 : f32
    %286 = vector.broadcast %cst_108 : f32 to vector<16x48xf32>
    %287 = arith.maximumf %285, %286 : vector<16x48xf32>
    %c1_109 = arith.constant 1 : index
    %c0_110 = arith.constant 0 : index
    %c0_111 = arith.constant 0 : index
    %288 = vector.load %arg14[%c1_109, %c0_110, %c0_111] : memref<3x48x48xf32, #tpu.memory_space<vmem>>, vector<1x48x48xf32>
    %289 = vector.shape_cast %288 : vector<1x48x48xf32> to vector<48x48xf32>
    %cst_112 = arith.constant dense<0.000000e+00> : vector<16x48xf32>
    %290 = tpu.matmul %287, %289, %cst_112 {dimension_numbers = #tpu.dot_dimension_numbers<[1], [0], [0], [1], [0, 0, 1, 1], [], []>} : vector<16x48xf32>, vector<48x48xf32>, vector<16x48xf32> -> vector<16x48xf32>
    %c1_113 = arith.constant 1 : index
    %c0_114 = arith.constant 0 : index
    %c0_115 = arith.constant 0 : index
    %291 = vector.load %arg15[%c1_113, %c0_114, %c0_115] : memref<3x1x48xf32, #tpu.memory_space<vmem>>, vector<1x1x48xf32>
    %292 = vector.shape_cast %291 : vector<1x1x48xf32> to vector<1x48xf32>
    %293 = vector.broadcast %292 : vector<1x48xf32> to vector<16x48xf32>
    %294 = arith.addf %290, %293 : vector<16x48xf32>
    %295 = arith.addf %278, %294 : vector<16x48xf32>
    %c1_116 = arith.constant 1 : index
    %c0_117 = arith.constant 0 : index
    %c0_118 = arith.constant 0 : index
    %296 = vector.load %arg16[%c1_116, %c0_117, %c0_118] : memref<3x1x48xf32, #tpu.memory_space<vmem>>, vector<1x1x48xf32>
    %297 = vector.shape_cast %296 : vector<1x1x48xf32> to vector<1x48xf32>
    %c1_119 = arith.constant 1 : index
    %c0_120 = arith.constant 0 : index
    %c0_121 = arith.constant 0 : index
    %298 = vector.load %arg17[%c1_119, %c0_120, %c0_121] : memref<3x1x48xf32, #tpu.memory_space<vmem>>, vector<1x1x48xf32>
    %299 = vector.shape_cast %298 : vector<1x1x48xf32> to vector<1x48xf32>
    %cst_122 = arith.constant dense<0.000000e+00> : vector<16xf32>
    %300 = vector.multi_reduction <add>, %295, %cst_122 [1] : vector<16x48xf32> to vector<16xf32>
    %301 = vector.shape_cast %300 : vector<16xf32> to vector<16x1xf32>
    %cst_123 = arith.constant 4.800000e+01 : f32
    %302 = vector.broadcast %cst_123 : f32 to vector<16x1xf32>
    %303 = arith.divf %301, %302 : vector<16x1xf32>
    %304 = vector.broadcast %303 : vector<16x1xf32> to vector<16x48xf32>
    %305 = arith.subf %295, %304 : vector<16x48xf32>
    %306 = arith.mulf %305, %305 : vector<16x48xf32>
    %cst_124 = arith.constant dense<0.000000e+00> : vector<16xf32>
    %307 = vector.multi_reduction <add>, %306, %cst_124 [1] : vector<16x48xf32> to vector<16xf32>
    %308 = vector.shape_cast %307 : vector<16xf32> to vector<16x1xf32>
    %cst_125 = arith.constant 4.800000e+01 : f32
    %309 = vector.broadcast %cst_125 : f32 to vector<16x1xf32>
    %310 = arith.divf %308, %309 : vector<16x1xf32>
    %311 = vector.broadcast %303 : vector<16x1xf32> to vector<16x48xf32>
    %312 = arith.subf %295, %311 : vector<16x48xf32>
    %cst_126 = arith.constant 9.99999974E-6 : f32
    %313 = vector.broadcast %cst_126 : f32 to vector<16x1xf32>
    %314 = arith.addf %310, %313 : vector<16x1xf32>
    %315 = math.rsqrt %314 : vector<16x1xf32>
    %316 = vector.broadcast %315 : vector<16x1xf32> to vector<16x48xf32>
    %317 = arith.mulf %312, %316 : vector<16x48xf32>
    %318 = vector.broadcast %297 : vector<1x48xf32> to vector<16x48xf32>
    %319 = arith.mulf %317, %318 : vector<16x48xf32>
    %320 = vector.broadcast %299 : vector<1x48xf32> to vector<16x48xf32>
    %321 = arith.addf %319, %320 : vector<16x48xf32>
    %c2 = arith.constant 2 : index
    %c0_127 = arith.constant 0 : index
    %c0_128 = arith.constant 0 : index
    %322 = vector.load %arg6[%c2, %c0_127, %c0_128] : memref<3x48x144xf32, #tpu.memory_space<vmem>>, vector<1x48x144xf32>
    %323 = vector.shape_cast %322 : vector<1x48x144xf32> to vector<48x144xf32>
    %cst_129 = arith.constant dense<0.000000e+00> : vector<16x144xf32>
    %324 = tpu.matmul %321, %323, %cst_129 {dimension_numbers = #tpu.dot_dimension_numbers<[1], [0], [0], [1], [0, 0, 1, 1], [], []>} : vector<16x48xf32>, vector<48x144xf32>, vector<16x144xf32> -> vector<16x144xf32>
    %c2_130 = arith.constant 2 : index
    %c0_131 = arith.constant 0 : index
    %c0_132 = arith.constant 0 : index
    %325 = vector.load %arg7[%c2_130, %c0_131, %c0_132] : memref<3x1x144xf32, #tpu.memory_space<vmem>>, vector<1x1x144xf32>
    %326 = vector.shape_cast %325 : vector<1x1x144xf32> to vector<1x144xf32>
    %327 = vector.broadcast %326 : vector<1x144xf32> to vector<16x144xf32>
    %328 = arith.addf %324, %327 : vector<16x144xf32>
    %329 = vector.extract_strided_slice %328 {offsets = [0, 0], sizes = [16, 8], strides = [1, 1]} : vector<16x144xf32> to vector<16x8xf32>
    %330 = vector.shape_cast %329 : vector<16x8xf32> to vector<2x8x8xf32>
    %331 = vector.extract_strided_slice %328 {offsets = [0, 8], sizes = [16, 8], strides = [1, 1]} : vector<16x144xf32> to vector<16x8xf32>
    %332 = vector.shape_cast %331 : vector<16x8xf32> to vector<2x8x8xf32>
    %333 = vector.extract_strided_slice %328 {offsets = [0, 16], sizes = [16, 8], strides = [1, 1]} : vector<16x144xf32> to vector<16x8xf32>
    %334 = vector.shape_cast %333 : vector<16x8xf32> to vector<2x8x8xf32>
    %335 = vector.extract_strided_slice %328 {offsets = [0, 24], sizes = [16, 8], strides = [1, 1]} : vector<16x144xf32> to vector<16x8xf32>
    %336 = vector.shape_cast %335 : vector<16x8xf32> to vector<2x8x8xf32>
    %337 = vector.extract_strided_slice %328 {offsets = [0, 32], sizes = [16, 8], strides = [1, 1]} : vector<16x144xf32> to vector<16x8xf32>
    %338 = vector.shape_cast %337 : vector<16x8xf32> to vector<2x8x8xf32>
    %339 = vector.extract_strided_slice %328 {offsets = [0, 40], sizes = [16, 8], strides = [1, 1]} : vector<16x144xf32> to vector<16x8xf32>
    %340 = vector.shape_cast %339 : vector<16x8xf32> to vector<2x8x8xf32>
    %341 = tpu.concatenate %330, %332, %334, %336, %338, %340 in 0 : vector<2x8x8xf32>, vector<2x8x8xf32>, vector<2x8x8xf32>, vector<2x8x8xf32>, vector<2x8x8xf32>, vector<2x8x8xf32> -> vector<12x8x8xf32>
    %342 = vector.extract_strided_slice %328 {offsets = [0, 48], sizes = [16, 8], strides = [1, 1]} : vector<16x144xf32> to vector<16x8xf32>
    %343 = vector.shape_cast %342 : vector<16x8xf32> to vector<2x8x8xf32>
    %344 = vector.extract_strided_slice %328 {offsets = [0, 56], sizes = [16, 8], strides = [1, 1]} : vector<16x144xf32> to vector<16x8xf32>
    %345 = vector.shape_cast %344 : vector<16x8xf32> to vector<2x8x8xf32>
    %346 = vector.extract_strided_slice %328 {offsets = [0, 64], sizes = [16, 8], strides = [1, 1]} : vector<16x144xf32> to vector<16x8xf32>
    %347 = vector.shape_cast %346 : vector<16x8xf32> to vector<2x8x8xf32>
    %348 = vector.extract_strided_slice %328 {offsets = [0, 72], sizes = [16, 8], strides = [1, 1]} : vector<16x144xf32> to vector<16x8xf32>
    %349 = vector.shape_cast %348 : vector<16x8xf32> to vector<2x8x8xf32>
    %350 = vector.extract_strided_slice %328 {offsets = [0, 80], sizes = [16, 8], strides = [1, 1]} : vector<16x144xf32> to vector<16x8xf32>
    %351 = vector.shape_cast %350 : vector<16x8xf32> to vector<2x8x8xf32>
    %352 = vector.extract_strided_slice %328 {offsets = [0, 88], sizes = [16, 8], strides = [1, 1]} : vector<16x144xf32> to vector<16x8xf32>
    %353 = vector.shape_cast %352 : vector<16x8xf32> to vector<2x8x8xf32>
    %354 = tpu.concatenate %343, %345, %347, %349, %351, %353 in 0 : vector<2x8x8xf32>, vector<2x8x8xf32>, vector<2x8x8xf32>, vector<2x8x8xf32>, vector<2x8x8xf32>, vector<2x8x8xf32> -> vector<12x8x8xf32>
    %355 = vector.extract_strided_slice %328 {offsets = [0, 96], sizes = [16, 8], strides = [1, 1]} : vector<16x144xf32> to vector<16x8xf32>
    %356 = vector.shape_cast %355 : vector<16x8xf32> to vector<2x8x8xf32>
    %357 = vector.extract_strided_slice %328 {offsets = [0, 104], sizes = [16, 8], strides = [1, 1]} : vector<16x144xf32> to vector<16x8xf32>
    %358 = vector.shape_cast %357 : vector<16x8xf32> to vector<2x8x8xf32>
    %359 = vector.extract_strided_slice %328 {offsets = [0, 112], sizes = [16, 8], strides = [1, 1]} : vector<16x144xf32> to vector<16x8xf32>
    %360 = vector.shape_cast %359 : vector<16x8xf32> to vector<2x8x8xf32>
    %361 = vector.extract_strided_slice %328 {offsets = [0, 120], sizes = [16, 8], strides = [1, 1]} : vector<16x144xf32> to vector<16x8xf32>
    %362 = vector.shape_cast %361 : vector<16x8xf32> to vector<2x8x8xf32>
    %363 = vector.extract_strided_slice %328 {offsets = [0, 128], sizes = [16, 8], strides = [1, 1]} : vector<16x144xf32> to vector<16x8xf32>
    %364 = vector.shape_cast %363 : vector<16x8xf32> to vector<2x8x8xf32>
    %365 = vector.extract_strided_slice %328 {offsets = [0, 136], sizes = [16, 8], strides = [1, 1]} : vector<16x144xf32> to vector<16x8xf32>
    %366 = vector.shape_cast %365 : vector<16x8xf32> to vector<2x8x8xf32>
    %367 = tpu.concatenate %356, %358, %360, %362, %364, %366 in 0 : vector<2x8x8xf32>, vector<2x8x8xf32>, vector<2x8x8xf32>, vector<2x8x8xf32>, vector<2x8x8xf32>, vector<2x8x8xf32> -> vector<12x8x8xf32>
    "tpu.trace_start"() <{level = 10 : i32, message = "znd,zmd->znm"}> : () -> ()
    %cst_133 = arith.constant dense<0.000000e+00> : vector<12x8x8xf32>
    %368 = tpu.matmul %341, %354, %cst_133 {dimension_numbers = #tpu.dot_dimension_numbers<[2], [2], [1], [1], [0, 0, 0, 1, 1, 1], [0], [0]>} : vector<12x8x8xf32>, vector<12x8x8xf32>, vector<12x8x8xf32> -> vector<12x8x8xf32>
    "tpu.trace_stop"() : () -> ()
    %cst_134 = arith.constant 0.353553385 : f32
    %369 = vector.broadcast %cst_134 : f32 to vector<12x8x8xf32>
    %370 = arith.mulf %368, %369 : vector<12x8x8xf32>
    %cst_135 = arith.constant dense<0xFF800000> : vector<12x8xf32>
    %371 = vector.multi_reduction <maximumf>, %370, %cst_135 [2] : vector<12x8x8xf32> to vector<12x8xf32>
    %cst_136 = arith.constant 0xFF800000 : f32
    %372 = vector.broadcast %cst_136 : f32 to vector<12x8xf32>
    %373 = arith.maximumf %372, %371 : vector<12x8xf32>
    %374 = vector.shape_cast %373 : vector<12x8xf32> to vector<12x8x1xf32>
    %375 = vector.broadcast %374 : vector<12x8x1xf32> to vector<12x8x8xf32>
    %376 = arith.subf %370, %375 : vector<12x8x8xf32>
    %377 = math.exp %376 : vector<12x8x8xf32>
    %cst_137 = arith.constant dense<0.000000e+00> : vector<12x8xf32>
    %378 = vector.multi_reduction <add>, %377, %cst_137 [2] : vector<12x8x8xf32> to vector<12x8xf32>
    %379 = vector.shape_cast %378 : vector<12x8xf32> to vector<12x8x1xf32>
    %380 = vector.broadcast %379 : vector<12x8x1xf32> to vector<12x8x8xf32>
    %381 = arith.divf %377, %380 : vector<12x8x8xf32>
    "tpu.trace_start"() <{level = 10 : i32, message = "znm,zmd->znd"}> : () -> ()
    %cst_138 = arith.constant dense<0.000000e+00> : vector<12x8x8xf32>
    %382 = tpu.matmul %381, %367, %cst_138 {dimension_numbers = #tpu.dot_dimension_numbers<[2], [1], [1], [2], [0, 0, 0, 1, 1, 2], [0], [0]>} : vector<12x8x8xf32>, vector<12x8x8xf32>, vector<12x8x8xf32> -> vector<12x8x8xf32>
    "tpu.trace_stop"() : () -> ()
    %383 = vector.extract_strided_slice %382 {offsets = [0, 0, 0], sizes = [2, 8, 8], strides = [1, 1, 1]} : vector<12x8x8xf32> to vector<2x8x8xf32>
    %384 = vector.extract_strided_slice %382 {offsets = [2, 0, 0], sizes = [2, 8, 8], strides = [1, 1, 1]} : vector<12x8x8xf32> to vector<2x8x8xf32>
    %385 = vector.extract_strided_slice %382 {offsets = [4, 0, 0], sizes = [2, 8, 8], strides = [1, 1, 1]} : vector<12x8x8xf32> to vector<2x8x8xf32>
    %386 = vector.extract_strided_slice %382 {offsets = [6, 0, 0], sizes = [2, 8, 8], strides = [1, 1, 1]} : vector<12x8x8xf32> to vector<2x8x8xf32>
    %387 = vector.extract_strided_slice %382 {offsets = [8, 0, 0], sizes = [2, 8, 8], strides = [1, 1, 1]} : vector<12x8x8xf32> to vector<2x8x8xf32>
    %388 = vector.extract_strided_slice %382 {offsets = [10, 0, 0], sizes = [2, 8, 8], strides = [1, 1, 1]} : vector<12x8x8xf32> to vector<2x8x8xf32>
    %389 = tpu.concatenate %383, %384, %385, %386, %387, %388 in 2 : vector<2x8x8xf32>, vector<2x8x8xf32>, vector<2x8x8xf32>, vector<2x8x8xf32>, vector<2x8x8xf32>, vector<2x8x8xf32> -> vector<2x8x48xf32>
    %390 = vector.shape_cast %389 : vector<2x8x48xf32> to vector<16x48xf32>
    %c2_139 = arith.constant 2 : index
    %c0_140 = arith.constant 0 : index
    %c0_141 = arith.constant 0 : index
    %391 = vector.load %arg8[%c2_139, %c0_140, %c0_141] : memref<3x48x48xf32, #tpu.memory_space<vmem>>, vector<1x48x48xf32>
    %392 = vector.shape_cast %391 : vector<1x48x48xf32> to vector<48x48xf32>
    %cst_142 = arith.constant dense<0.000000e+00> : vector<16x48xf32>
    %393 = tpu.matmul %390, %392, %cst_142 {dimension_numbers = #tpu.dot_dimension_numbers<[1], [0], [0], [1], [0, 0, 1, 1], [], []>} : vector<16x48xf32>, vector<48x48xf32>, vector<16x48xf32> -> vector<16x48xf32>
    %c2_143 = arith.constant 2 : index
    %c0_144 = arith.constant 0 : index
    %c0_145 = arith.constant 0 : index
    %394 = vector.load %arg9[%c2_143, %c0_144, %c0_145] : memref<3x1x48xf32, #tpu.memory_space<vmem>>, vector<1x1x48xf32>
    %395 = vector.shape_cast %394 : vector<1x1x48xf32> to vector<1x48xf32>
    %396 = vector.broadcast %395 : vector<1x48xf32> to vector<16x48xf32>
    %397 = arith.addf %393, %396 : vector<16x48xf32>
    %398 = arith.addf %321, %397 : vector<16x48xf32>
    %c2_146 = arith.constant 2 : index
    %c0_147 = arith.constant 0 : index
    %c0_148 = arith.constant 0 : index
    %399 = vector.load %arg10[%c2_146, %c0_147, %c0_148] : memref<3x1x48xf32, #tpu.memory_space<vmem>>, vector<1x1x48xf32>
    %400 = vector.shape_cast %399 : vector<1x1x48xf32> to vector<1x48xf32>
    %c2_149 = arith.constant 2 : index
    %c0_150 = arith.constant 0 : index
    %c0_151 = arith.constant 0 : index
    %401 = vector.load %arg11[%c2_149, %c0_150, %c0_151] : memref<3x1x48xf32, #tpu.memory_space<vmem>>, vector<1x1x48xf32>
    %402 = vector.shape_cast %401 : vector<1x1x48xf32> to vector<1x48xf32>
    %cst_152 = arith.constant dense<0.000000e+00> : vector<16xf32>
    %403 = vector.multi_reduction <add>, %398, %cst_152 [1] : vector<16x48xf32> to vector<16xf32>
    %404 = vector.shape_cast %403 : vector<16xf32> to vector<16x1xf32>
    %cst_153 = arith.constant 4.800000e+01 : f32
    %405 = vector.broadcast %cst_153 : f32 to vector<16x1xf32>
    %406 = arith.divf %404, %405 : vector<16x1xf32>
    %407 = vector.broadcast %406 : vector<16x1xf32> to vector<16x48xf32>
    %408 = arith.subf %398, %407 : vector<16x48xf32>
    %409 = arith.mulf %408, %408 : vector<16x48xf32>
    %cst_154 = arith.constant dense<0.000000e+00> : vector<16xf32>
    %410 = vector.multi_reduction <add>, %409, %cst_154 [1] : vector<16x48xf32> to vector<16xf32>
    %411 = vector.shape_cast %410 : vector<16xf32> to vector<16x1xf32>
    %cst_155 = arith.constant 4.800000e+01 : f32
    %412 = vector.broadcast %cst_155 : f32 to vector<16x1xf32>
    %413 = arith.divf %411, %412 : vector<16x1xf32>
    %414 = vector.broadcast %406 : vector<16x1xf32> to vector<16x48xf32>
    %415 = arith.subf %398, %414 : vector<16x48xf32>
    %cst_156 = arith.constant 9.99999974E-6 : f32
    %416 = vector.broadcast %cst_156 : f32 to vector<16x1xf32>
    %417 = arith.addf %413, %416 : vector<16x1xf32>
    %418 = math.rsqrt %417 : vector<16x1xf32>
    %419 = vector.broadcast %418 : vector<16x1xf32> to vector<16x48xf32>
    %420 = arith.mulf %415, %419 : vector<16x48xf32>
    %421 = vector.broadcast %400 : vector<1x48xf32> to vector<16x48xf32>
    %422 = arith.mulf %420, %421 : vector<16x48xf32>
    %423 = vector.broadcast %402 : vector<1x48xf32> to vector<16x48xf32>
    %424 = arith.addf %422, %423 : vector<16x48xf32>
    %c2_157 = arith.constant 2 : index
    %c0_158 = arith.constant 0 : index
    %c0_159 = arith.constant 0 : index
    %425 = vector.load %arg12[%c2_157, %c0_158, %c0_159] : memref<3x48x48xf32, #tpu.memory_space<vmem>>, vector<1x48x48xf32>
    %426 = vector.shape_cast %425 : vector<1x48x48xf32> to vector<48x48xf32>
    %cst_160 = arith.constant dense<0.000000e+00> : vector<16x48xf32>
    %427 = tpu.matmul %424, %426, %cst_160 {dimension_numbers = #tpu.dot_dimension_numbers<[1], [0], [0], [1], [0, 0, 1, 1], [], []>} : vector<16x48xf32>, vector<48x48xf32>, vector<16x48xf32> -> vector<16x48xf32>
    %c2_161 = arith.constant 2 : index
    %c0_162 = arith.constant 0 : index
    %c0_163 = arith.constant 0 : index
    %428 = vector.load %arg13[%c2_161, %c0_162, %c0_163] : memref<3x1x48xf32, #tpu.memory_space<vmem>>, vector<1x1x48xf32>
    %429 = vector.shape_cast %428 : vector<1x1x48xf32> to vector<1x48xf32>
    %430 = vector.broadcast %429 : vector<1x48xf32> to vector<16x48xf32>
    %431 = arith.addf %427, %430 : vector<16x48xf32>
    %cst_164 = arith.constant 0.000000e+00 : f32
    %432 = vector.broadcast %cst_164 : f32 to vector<16x48xf32>
    %433 = arith.maximumf %431, %432 : vector<16x48xf32>
    %c2_165 = arith.constant 2 : index
    %c0_166 = arith.constant 0 : index
    %c0_167 = arith.constant 0 : index
    %434 = vector.load %arg14[%c2_165, %c0_166, %c0_167] : memref<3x48x48xf32, #tpu.memory_space<vmem>>, vector<1x48x48xf32>
    %435 = vector.shape_cast %434 : vector<1x48x48xf32> to vector<48x48xf32>
    %cst_168 = arith.constant dense<0.000000e+00> : vector<16x48xf32>
    %436 = tpu.matmul %433, %435, %cst_168 {dimension_numbers = #tpu.dot_dimension_numbers<[1], [0], [0], [1], [0, 0, 1, 1], [], []>} : vector<16x48xf32>, vector<48x48xf32>, vector<16x48xf32> -> vector<16x48xf32>
    %c2_169 = arith.constant 2 : index
    %c0_170 = arith.constant 0 : index
    %c0_171 = arith.constant 0 : index
    %437 = vector.load %arg15[%c2_169, %c0_170, %c0_171] : memref<3x1x48xf32, #tpu.memory_space<vmem>>, vector<1x1x48xf32>
    %438 = vector.shape_cast %437 : vector<1x1x48xf32> to vector<1x48xf32>
    %439 = vector.broadcast %438 : vector<1x48xf32> to vector<16x48xf32>
    %440 = arith.addf %436, %439 : vector<16x48xf32>
    %441 = arith.addf %424, %440 : vector<16x48xf32>
    %c2_172 = arith.constant 2 : index
    %c0_173 = arith.constant 0 : index
    %c0_174 = arith.constant 0 : index
    %442 = vector.load %arg16[%c2_172, %c0_173, %c0_174] : memref<3x1x48xf32, #tpu.memory_space<vmem>>, vector<1x1x48xf32>
    %443 = vector.shape_cast %442 : vector<1x1x48xf32> to vector<1x48xf32>
    %c2_175 = arith.constant 2 : index
    %c0_176 = arith.constant 0 : index
    %c0_177 = arith.constant 0 : index
    %444 = vector.load %arg17[%c2_175, %c0_176, %c0_177] : memref<3x1x48xf32, #tpu.memory_space<vmem>>, vector<1x1x48xf32>
    %445 = vector.shape_cast %444 : vector<1x1x48xf32> to vector<1x48xf32>
    %cst_178 = arith.constant dense<0.000000e+00> : vector<16xf32>
    %446 = vector.multi_reduction <add>, %441, %cst_178 [1] : vector<16x48xf32> to vector<16xf32>
    %447 = vector.shape_cast %446 : vector<16xf32> to vector<16x1xf32>
    %cst_179 = arith.constant 4.800000e+01 : f32
    %448 = vector.broadcast %cst_179 : f32 to vector<16x1xf32>
    %449 = arith.divf %447, %448 : vector<16x1xf32>
    %450 = vector.broadcast %449 : vector<16x1xf32> to vector<16x48xf32>
    %451 = arith.subf %441, %450 : vector<16x48xf32>
    %452 = arith.mulf %451, %451 : vector<16x48xf32>
    %cst_180 = arith.constant dense<0.000000e+00> : vector<16xf32>
    %453 = vector.multi_reduction <add>, %452, %cst_180 [1] : vector<16x48xf32> to vector<16xf32>
    %454 = vector.shape_cast %453 : vector<16xf32> to vector<16x1xf32>
    %cst_181 = arith.constant 4.800000e+01 : f32
    %455 = vector.broadcast %cst_181 : f32 to vector<16x1xf32>
    %456 = arith.divf %454, %455 : vector<16x1xf32>
    %457 = vector.broadcast %449 : vector<16x1xf32> to vector<16x48xf32>
    %458 = arith.subf %441, %457 : vector<16x48xf32>
    %cst_182 = arith.constant 9.99999974E-6 : f32
    %459 = vector.broadcast %cst_182 : f32 to vector<16x1xf32>
    %460 = arith.addf %456, %459 : vector<16x1xf32>
    %461 = math.rsqrt %460 : vector<16x1xf32>
    %462 = vector.broadcast %461 : vector<16x1xf32> to vector<16x48xf32>
    %463 = arith.mulf %458, %462 : vector<16x48xf32>
    %464 = vector.broadcast %443 : vector<1x48xf32> to vector<16x48xf32>
    %465 = arith.mulf %463, %464 : vector<16x48xf32>
    %466 = vector.broadcast %445 : vector<1x48xf32> to vector<16x48xf32>
    %467 = arith.addf %465, %466 : vector<16x48xf32>
    %c0_183 = arith.constant 0 : index
    %c0_184 = arith.constant 0 : index
    %468 = vector.load %arg1[%c0_183, %c0_184] : memref<2x24xf32, #tpu.memory_space<vmem>>, vector<2x24xf32>
    %c0_185 = arith.constant 0 : index
    %c0_186 = arith.constant 0 : index
    %469 = vector.load %arg18[%c0_185, %c0_186] : memref<24x192xf32, #tpu.memory_space<vmem>>, vector<24x192xf32>
    %cst_187 = arith.constant dense<0.000000e+00> : vector<2x192xf32>
    %470 = tpu.matmul %468, %469, %cst_187 {dimension_numbers = #tpu.dot_dimension_numbers<[1], [0], [0], [1], [0, 0, 1, 1], [], []>} : vector<2x24xf32>, vector<24x192xf32>, vector<2x192xf32> -> vector<2x192xf32>
    %c0_188 = arith.constant 0 : index
    %c0_189 = arith.constant 0 : index
    %471 = vector.load %arg19[%c0_188, %c0_189] : memref<1x192xf32, #tpu.memory_space<vmem>>, vector<1x192xf32>
    %472 = vector.broadcast %471 : vector<1x192xf32> to vector<2x192xf32>
    %473 = arith.addf %470, %472 : vector<2x192xf32>
    %474 = tpu.concatenate %29, %175, %321, %467 in 0 : vector<16x48xf32>, vector<16x48xf32>, vector<16x48xf32>, vector<16x48xf32> -> vector<64x48xf32>
    %c0_190 = arith.constant 0 : index
    %c0_191 = arith.constant 0 : index
    %475 = vector.load %arg20[%c0_190, %c0_191] : memref<48x48xf32, #tpu.memory_space<vmem>>, vector<48x48xf32>
    %cst_192 = arith.constant dense<0.000000e+00> : vector<64x48xf32>
    %476 = tpu.matmul %474, %475, %cst_192 {dimension_numbers = #tpu.dot_dimension_numbers<[1], [0], [0], [1], [0, 0, 1, 1], [], []>} : vector<64x48xf32>, vector<48x48xf32>, vector<64x48xf32> -> vector<64x48xf32>
    %c0_193 = arith.constant 0 : index
    %c0_194 = arith.constant 0 : index
    %477 = vector.load %arg21[%c0_193, %c0_194] : memref<1x48xf32, #tpu.memory_space<vmem>>, vector<1x48xf32>
    %478 = vector.broadcast %477 : vector<1x48xf32> to vector<64x48xf32>
    %479 = arith.addf %476, %478 : vector<64x48xf32>
    %480 = vector.extract_strided_slice %473 {offsets = [0, 0], sizes = [2, 48], strides = [1, 1]} : vector<2x192xf32> to vector<2x48xf32>
    %481 = vector.shape_cast %480 : vector<2x48xf32> to vector<2x1x48xf32>
    %482 = vector.shape_cast %481 : vector<2x1x48xf32> to vector<2x1x48xf32>
    %483 = vector.broadcast %482 : vector<2x1x48xf32> to vector<2x8x48xf32>
    %484 = vector.shape_cast %483 : vector<2x8x48xf32> to vector<16x48xf32>
    %485 = vector.extract_strided_slice %473 {offsets = [0, 48], sizes = [2, 48], strides = [1, 1]} : vector<2x192xf32> to vector<2x48xf32>
    %486 = vector.shape_cast %485 : vector<2x48xf32> to vector<2x1x48xf32>
    %487 = vector.shape_cast %486 : vector<2x1x48xf32> to vector<2x1x48xf32>
    %488 = vector.broadcast %487 : vector<2x1x48xf32> to vector<2x8x48xf32>
    %489 = vector.shape_cast %488 : vector<2x8x48xf32> to vector<16x48xf32>
    %490 = vector.extract_strided_slice %473 {offsets = [0, 96], sizes = [2, 48], strides = [1, 1]} : vector<2x192xf32> to vector<2x48xf32>
    %491 = vector.shape_cast %490 : vector<2x48xf32> to vector<2x1x48xf32>
    %492 = vector.shape_cast %491 : vector<2x1x48xf32> to vector<2x1x48xf32>
    %493 = vector.broadcast %492 : vector<2x1x48xf32> to vector<2x8x48xf32>
    %494 = vector.shape_cast %493 : vector<2x8x48xf32> to vector<16x48xf32>
    %495 = vector.extract_strided_slice %473 {offsets = [0, 144], sizes = [2, 48], strides = [1, 1]} : vector<2x192xf32> to vector<2x48xf32>
    %496 = vector.shape_cast %495 : vector<2x48xf32> to vector<2x1x48xf32>
    %497 = vector.shape_cast %496 : vector<2x1x48xf32> to vector<2x1x48xf32>
    %498 = vector.broadcast %497 : vector<2x1x48xf32> to vector<2x8x48xf32>
    %499 = vector.shape_cast %498 : vector<2x8x48xf32> to vector<16x48xf32>
    %500 = tpu.concatenate %484, %489, %494, %499 in 0 : vector<16x48xf32>, vector<16x48xf32>, vector<16x48xf32>, vector<16x48xf32> -> vector<64x48xf32>
    %501 = arith.addf %479, %500 : vector<64x48xf32>
    %502 = math.tanh %501 : vector<64x48xf32>
    %c0_195 = arith.constant 0 : index
    %c0_196 = arith.constant 0 : index
    %503 = vector.load %arg22[%c0_195, %c0_196] : memref<1x48xf32, #tpu.memory_space<vmem>>, vector<1x48xf32>
    %504 = vector.broadcast %503 : vector<1x48xf32> to vector<64x48xf32>
    %505 = arith.mulf %502, %504 : vector<64x48xf32>
    %cst_197 = arith.constant dense<0.000000e+00> : vector<64xf32>
    %506 = vector.multi_reduction <add>, %505, %cst_197 [1] : vector<64x48xf32> to vector<64xf32>
    %507 = vector.shape_cast %506 : vector<64xf32> to vector<64x1xf32>
    %508 = vector.extract_strided_slice %507 {offsets = [0, 0], sizes = [16, 1], strides = [1, 1]} : vector<64x1xf32> to vector<16x1xf32>
    %509 = vector.extract_strided_slice %507 {offsets = [16, 0], sizes = [16, 1], strides = [1, 1]} : vector<64x1xf32> to vector<16x1xf32>
    %510 = arith.addf %508, %509 : vector<16x1xf32>
    %511 = vector.extract_strided_slice %507 {offsets = [32, 0], sizes = [16, 1], strides = [1, 1]} : vector<64x1xf32> to vector<16x1xf32>
    %512 = arith.addf %510, %511 : vector<16x1xf32>
    %513 = vector.extract_strided_slice %507 {offsets = [48, 0], sizes = [16, 1], strides = [1, 1]} : vector<64x1xf32> to vector<16x1xf32>
    %514 = arith.addf %512, %513 : vector<16x1xf32>
    %cst_198 = arith.constant 2.500000e-01 : f32
    %515 = vector.broadcast %cst_198 : f32 to vector<16x1xf32>
    %516 = arith.mulf %514, %515 : vector<16x1xf32>
    %c0_199 = arith.constant 0 : index
    %c0_200 = arith.constant 0 : index
    %517 = vector.load %arg23[%c0_199, %c0_200] : memref<1x1xf32, #tpu.memory_space<vmem>>, vector<1x1xf32>
    %518 = vector.broadcast %517 : vector<1x1xf32> to vector<16x1xf32>
    %519 = arith.addf %516, %518 : vector<16x1xf32>
    %c0_201 = arith.constant 0 : index
    %c0_202 = arith.constant 0 : index
    %520 = vector.load %arg24[%c0_201, %c0_202] : memref<16x1xf32, #tpu.memory_space<vmem>>, vector<16x1xf32>
    tpu.vector_store %arg24[%c0_201, %c0_202], %519 {strides = array<i32>} : memref<16x1xf32, #tpu.memory_space<vmem>>, vector<16x1xf32>,
    return
  }
}

</mosaic_0001>

<bundles_post_ra>
// kernel: visual_hint_predictor.1
= control target key start
LH: loop header
LB: loop body
LE: loop exit
PB: predicated region body
PF: predicated region fallthrough
CT: control target
= control target key end

     0   :  { %s7079_s0 = inlined_call_operand.hbm [shape: f32[16,32], index: 0, kind: input, shape index: {}]   ;;  %s7080_s1 = inlined_call_operand.hbm [shape: f32[2,24], index: 1, kind: input, shape index: {}]   ;;  %s7081_s2 = inlined_call_operand.hbm [shape: f32[32,48], index: 2, kind: input, shape index: {}]   ;;  %s7082_s3 = inlined_call_operand.hbm [shape: f32[1,48], index: 3, kind: input, shape index: {}]   ;;  %s7083_s4 = inlined_call_operand.hbm [shape: f32[1,48], index: 4, kind: input, shape index: {}]   ;;  %s7084_s5 = inlined_call_operand.hbm [shape: f32[1,48], index: 5, kind: input, shape index: {}]   ;;  %s7085_s6 = inlined_call_operand.hbm [shape: f32[3,48,144], index: 6, kind: input, shape index: {}]   ;;  %s7086_s7 = inlined_call_operand.vmem [shape: f32[3,1,144], index: 7, kind: input, shape index: {}]   ;;  %s7087_s8 = inlined_call_operand.hbm [shape: f32[3,48,48], index: 8, kind: input, shape index: {}]   ;;  %s7088_s9 = inlined_call_operand.vmem [shape: f32[3,1,48], index: 9, kind: input, shape index: {}]   ;;  %s7089_s10 = inlined_call_operand.vmem [shape: f32[3,1,48], index: 10, kind: input, shape index: {}]   ;;  %s7090_s11 = inlined_call_operand.hbm [shape: f32[3,1,48], index: 11, kind: input, shape index: {}]   ;;  %s7091_s12 = inlined_call_operand.hbm [shape: f32[3,48,48], index: 12, kind: input, shape index: {}]   ;;  %s7092_s13 = inlined_call_operand.hbm [shape: f32[3,1,48], index: 13, kind: input, shape index: {}]   ;;  %s7093_s14 = inlined_call_operand.hbm [shape: f32[3,48,48], index: 14, kind: input, shape index: {}]   ;;  %s7094_s15 = inlined_call_operand.hbm [shape: f32[3,1,48], index: 15, kind: input, shape index: {}]   ;;  %s7095_s16 = inlined_call_operand.vmem [shape: f32[3,1,48], index: 16, kind: input, shape index: {}]   ;;  %s7096_s17 = inlined_call_operand.hbm [shape: f32[3,1,48], index: 17, kind: input, shape index: {}]   ;;  %s7097_s18 = inlined_call_operand.hbm [shape: f32[24,192], index: 18, kind: input, shape index: {}]   ;;  %s7098_s19 = inlined_call_operand.hbm [shape: f32[1,192], index: 19, kind: input, shape index: {}]   ;;  %s7099_s20 = inlined_call_operand.hbm [shape: f32[48,48], index: 20, kind: input, shape index: {}]   ;;  %s7100_s21 = inlined_call_operand.hbm [shape: f32[1,48], index: 21, kind: input, shape index: {}]   ;;  %s7101_s22 = inlined_call_operand.vmem [shape: f32[1,48], index: 22, kind: input, shape index: {}]   ;;  %s7102_s23 = inlined_call_operand.<no memory space> [shape: f32[1,1], index: 23, kind: input, shape index: {}]   ;;  %s7103_s24 = inlined_call_operand.vmem [shape: f32[16,1], index: 24, kind: output, shape index: {}]  }
   0x1   :  { %7106 = sst [smem:[#allocation41_spill]] %s7079_s0  ;;  %v29_v0 = vstv %s7102_s23 }
   0x2   :  { %7107 = sst [smem:[#allocation42_spill]] %s7080_s1  ;;  %30 = vst [vmem:[#allocation2] sm:$0x1] %v29_v0 }
   0x3   :  { %7108 = sst [smem:[#allocation43_spill]] %s7081_s2 }
   0x4   :  { %7109 = sst [smem:[#allocation44_spill]] %s7082_s3 }
   0x5   :  { %7110 = sst [smem:[#allocation45_spill]] %s7083_s4 }
   0x6   :  { %7111 = sst [smem:[#allocation46_spill]] %s7084_s5 }
   0x7   :  { %7112 = sst [smem:[#allocation47_spill]] %s7085_s6 }
   0x8   :  { %7113 = sst [smem:[#allocation48_spill]] %s7086_s7 }
   0x9   :  { %7114 = sst [smem:[#allocation49_spill]] %s7087_s8 }
   0xa   :  { %7115 = sst [smem:[#allocation50_spill]] %s7101_s22 }
   0xb   :  { %7116 = sst [smem:[#allocation51_spill]] %s7103_s24 }
   0xc   :  { %31 = vsyncpa [#allocation4], 0 }
   0xd   :  { %32 = vsyncpa [#allocation6], 0 }
   0xe   :  { %33 = vsyncpa [#allocation9], 0 }
   0xf   :  { %34 = vsyncpa [#allocation12], 0 }
  0x10   :  { %35 = vsyncpa [#allocation15], 0 }
  0x11   :  { %36 = vsyncpa [#allocation18], 0 }
  0x12   :  { %37 = vsyncpa [#allocation21], 0 }
  0x13   :  { %38 = vsyncpa [#allocation24], 0 }
  0x14   :  { %39 = vsyncpa [#allocation27], 0  ;;  %s7117_s6 = sld [smem:[#allocation42_spill]] }
  0x1a   :  { %s59_s2 = sshll.u32 %s7117_s6, 4  ;;  %s60_s2 = int_to_ptr.hbm [resolvable:$true] %s59_s2 }
  0x1b   :  { %40 = vsyncpa [#allocation30], 0  ;;  %s5613_s29 = smov [#allocation5]   ;;  %s7118_s30 = sld [smem:[#allocation44_spill]] }
  0x1c   :  { %s61_s0 = sshll.u32 %s5613_s29, 4  ;;  %s5614_s25 = smov [#allocation8]   ;;  %s62_s0 = int_to_ptr.vmem [resolvable:$true] %s61_s0 }
  0x1d   :  { %64 = dma.hbm_to_vmem [thread:$0]  %s60_s2, 32, %s62_s0, [#allocation6]  }
  0x1e   :  { %s85_s8 = sshll.u32 %s5614_s25, 4  ;;  %s7119_s5 = sld [smem:[#allocation46_spill]]  ;;  %s86_s8 = int_to_ptr.vmem [resolvable:$true] %s85_s8 }
  0x1f   :  { %s5615_s27 = smov [#allocation11]   ;;  %s7120_s24 = sld [smem:[#allocation49_spill]] }
  0x20   :  { %s107_s28 = sshll.u32 %s5615_s27, 4  ;;  %s5616_s2 = smov [#allocation14]   ;;  %s108_s28 = int_to_ptr.vmem [resolvable:$true] %s107_s28 }
  0x21   :  { %s83_s3 = sshll.u32 %s7118_s30, 4  ;;  %s132_s0 = sshll.u32 %s5616_s2, 4  ;;  %s84_s3 = int_to_ptr.hbm [resolvable:$true] %s83_s3  ;;  %s133_s0 = int_to_ptr.vmem [resolvable:$true] %s132_s0 }
  0x22   :  { %88 = dma.hbm_to_vmem [thread:$0]  %s84_s3, 16, %s86_s8, [#allocation9]  }
  0x23   :  { %s160_s30 = sshll.u32 %s7091_s12, 4  ;;  %s5617_s25 = smov 128   ;;  %s161_s30 = int_to_ptr.hbm [resolvable:$true] %s160_s30 }
  0x24   :  { %s105_s26 = sshll.u32 %s7119_s5, 4  ;;  %s5618_s4 = smov 8   ;;  %s106_s26 = int_to_ptr.hbm [resolvable:$true] %s105_s26 }
  0x25   :  { %s130_s22 = sshll.u32 %s7120_s24, 4  ;;  %s186_s24 = sshll.u32 %s7093_s14, 4  ;;  %s131_s22 = int_to_ptr.hbm [resolvable:$true] %s130_s22  ;;  %s187_s24 = int_to_ptr.hbm [resolvable:$true] %s186_s24 }
  0x26   :  { %110 = dma.hbm_to_vmem [thread:$0]  %s106_s26, 16, %s108_s28, [#allocation12]  }
  0x27   :  { %138 = dma.hbm_to_vmem [thread:$0]  %s131_s22, 2304, %s133_s0, [#allocation15], %s5617_s25, %s5617_s25, %s5618_s4  }
  0x28   :  { %s5619_s1 = smov [#allocation17]   ;;  %s5620_s12 = smov [#allocation20]  }
  0x29   :  { %s162_s5 = sshll.u32 %s5619_s1, 4  ;;  %s188_s26 = sshll.u32 %s5620_s12, 4  ;;  %s163_s5 = int_to_ptr.vmem [resolvable:$true] %s162_s5  ;;  %s189_s26 = int_to_ptr.vmem [resolvable:$true] %s188_s26 }
  0x2a   :  { %168 = dma.hbm_to_vmem [thread:$0]  %s161_s30, 2304, %s163_s5, [#allocation18], %s5617_s25, %s5617_s25, %s5618_s4  }
  0x2b   :  { %194 = dma.hbm_to_vmem [thread:$0]  %s187_s24, 2304, %s189_s26, [#allocation21], %s5617_s25, %s5617_s25, %s5618_s4  }
  0x2c   :  { %s214_s28 = sshll.u32 %s7096_s17, 4  ;;  %s5621_s14 = smov [#allocation23]   ;;  %s215_s28 = int_to_ptr.hbm [resolvable:$true] %s214_s28 }
  0x2d   :  { %s216_s6 = sshll.u32 %s5621_s14, 4  ;;  %s241_s0 = sshll.u32 %s7098_s19, 4  ;;  %s217_s6 = int_to_ptr.vmem [resolvable:$true] %s216_s6  ;;  %s242_s0 = int_to_ptr.hbm [resolvable:$true] %s241_s0 }
  0x2e   :  { %s5622_s23 = smov 16   ;;  %s5623_s7 = smov 1  }
  0x2f   :  { %222 = dma.hbm_to_vmem [thread:$0]  %s215_s28, 48, %s217_s6, [#allocation24], %s5622_s23, %s5622_s23, %s5623_s7  }
  0x30   :  { %s5624_s30 = smov [#allocation26]   ;;  %s7121_s17 = sld [smem:[#allocation41_spill]] }
  0x31   :  { %s243_s3 = sshll.u32 %s5624_s30, 4  ;;  %s7122_s26 = sld [smem:[#allocation43_spill]]  ;;  %s244_s3 = int_to_ptr.vmem [resolvable:$true] %s243_s3 }
  0x32   :  { %246 = dma.hbm_to_vmem [thread:$0]  %s242_s0, 32, %s244_s3, [#allocation27]  }
  0x33   :  { %s5625_s22 = smov [#allocation3]   ;;  %s5626_s28 = smov [#allocation7]  }
  0x34   :  { %s47_s27 = sshll.u32 %s5625_s22, 4  ;;  %s71_s14 = sshll.u32 %s5626_s28, 4  ;;  %s48_s27 = int_to_ptr.vmem [resolvable:$true] %s47_s27  ;;  %s72_s14 = int_to_ptr.vmem [resolvable:$true] %s71_s14 }
  0x35   :  { %s7123_s2 = sld [smem:[#allocation45_spill]]  ;;  %s5629_s28 = smov 256  }
  0x36   :  { %s45_s1 = sshll.u32 %s7121_s17, 4  ;;  %s7124_s8 = sld [smem:[#allocation47_spill]]  ;;  %s46_s1 = int_to_ptr.hbm [resolvable:$true] %s45_s1 }
  0x37   :  { %s69_s19 = sshll.u32 %s7122_s26, 4  ;;  %s5627_s17 = smov [#allocation10]   ;;  %s70_s19 = int_to_ptr.hbm [resolvable:$true] %s69_s19 }
  0x38   :  { %53 = dma.hbm_to_vmem [thread:$0]  %s46_s1, 256, %s48_s27, [#allocation4], %s5617_s25, %s5617_s25, %s5618_s4  }
  0x39   :  { %77 = dma.hbm_to_vmem [thread:$0]  %s70_s19, 512, %s72_s14, [#allocation6], %s5617_s25, %s5617_s25, %s5618_s4  }
  0x3a   :  { %s96_s5 = sshll.u32 %s5627_s17, 4  ;;  %s5628_s1 = smov [#allocation13]   ;;  %s97_s5 = int_to_ptr.vmem [resolvable:$true] %s96_s5 }
  0x3b   :  { %s94_s30 = sshll.u32 %s7123_s2, 4  ;;  %s117_s12 = sshll.u32 %s5628_s1, 4  ;;  %s95_s30 = int_to_ptr.hbm [resolvable:$true] %s94_s30  ;;  %s118_s12 = int_to_ptr.vmem [resolvable:$true] %s117_s12 }
  0x3c   :  { %s115_s24 = sshll.u32 %s7124_s8, 4  ;;  %s147_s27 = sshll.u32 %s7090_s11, 4  ;;  %s116_s24 = int_to_ptr.hbm [resolvable:$true] %s115_s24  ;;  %s148_s27 = int_to_ptr.hbm [resolvable:$true] %s147_s27 }
  0x3d   :  { %99 = dma.hbm_to_vmem [thread:$0]  %s95_s30, 16, %s97_s5, [#allocation9]  }
  0x3e   :  { %123 = dma.hbm_to_vmem [thread:$0]  %s116_s24, 4608, %s118_s12, [#allocation12], %s5629_s28, %s5629_s28, %s5622_s23  }
  0x3f   :  { %s5630_s19 = smov [#allocation16]   ;;  %s173_s2 = sshll.u32 %s7092_s13, 4  ;;  %s174_s2 = int_to_ptr.hbm [resolvable:$true] %s173_s2 }
  0x40   :  { %s149_s14 = sshll.u32 %s5630_s19, 4  ;;  %s199_s11 = sshll.u32 %s7094_s15, 4  ;;  %s150_s14 = int_to_ptr.vmem [resolvable:$true] %s149_s14  ;;  %s200_s11 = int_to_ptr.hbm [resolvable:$true] %s199_s11 }
  0x41   :  { %155 = dma.hbm_to_vmem [thread:$0]  %s148_s27, 48, %s150_s14, [#allocation15], %s5622_s23, %s5622_s23, %s5623_s7  }
  0x42   :  { %s5631_s3 = smov [#allocation19]   ;;  %s5632_s24 = smov [#allocation22]  }
  0x43   :  { %s175_s8 = sshll.u32 %s5631_s3, 4  ;;  %s201_s13 = sshll.u32 %s5632_s24, 4  ;;  %s176_s8 = int_to_ptr.vmem [resolvable:$true] %s175_s8  ;;  %s202_s13 = int_to_ptr.vmem [resolvable:$true] %s201_s13 }
  0x44   :  { %181 = dma.hbm_to_vmem [thread:$0]  %s174_s2, 48, %s176_s8, [#allocation18], %s5622_s23, %s5622_s23, %s5623_s7  }
  0x45   :  { %s227_s1 = sshll.u32 %s7097_s18, 4  ;;  %s251_s26 = sshll.u32 %s7099_s20, 4  ;;  %s228_s1 = int_to_ptr.hbm [resolvable:$true] %s227_s1  ;;  %s252_s26 = int_to_ptr.hbm [resolvable:$true] %s251_s26 }
  0x46   :  { %207 = dma.hbm_to_vmem [thread:$0]  %s200_s11, 48, %s202_s13, [#allocation21], %s5622_s23, %s5622_s23, %s5623_s7  }
  0x47   :  { %s5633_s22 = smov [#allocation25]   ;;  %s5634_s19 = smov [#allocation28]  }
  0x48   :  { %s229_s27 = sshll.u32 %s5633_s22, 4  ;;  %s253_s14 = sshll.u32 %s5634_s19, 4  ;;  %s230_s27 = int_to_ptr.vmem [resolvable:$true] %s229_s27  ;;  %s254_s14 = int_to_ptr.vmem [resolvable:$true] %s253_s14 }
  0x49   :  { %235 = dma.hbm_to_vmem [thread:$0]  %s228_s1, 768, %s230_s27, [#allocation24], %s5629_s28, %s5629_s28, %s5622_s23  }
  0x4a   :  { %s265_s29 = sshll.u32 %s7100_s21, 4  ;;  %s5635_s7 = smov [#allocation29]   ;;  %s266_s29 = int_to_ptr.hbm [resolvable:$true] %s265_s29 }
  0x4b   :  { %259 = dma.hbm_to_vmem [thread:$0]  %s252_s26, 768, %s254_s14, [#allocation27], %s5617_s25, %s5617_s25, %s5618_s4  }
  0x4c   :  { %s267_s20 = sshll.u32 %s5635_s7, 4  ;;  %s268_s20 = int_to_ptr.vmem [resolvable:$true] %s267_s20 }
  0x4d   :  { %270 = dma.hbm_to_vmem [thread:$0]  %s266_s29, 16, %s268_s20, [#allocation30]  }
  0x4e   :  { %5593 = dma.done.wait [#allocation4], 256  }
  0x4f   :  { %5594 = vsyncadd [#allocation4], 4294967040 }
  0x50   :  { %5595 = dma.done.wait [#allocation6], 544  }
  0x51   :  { %5596 = vsyncadd [#allocation6], 4294966752 }
  0x52   :  { %5597 = dma.done.wait [#allocation9], 32  }
  0x53   :  { %5598 = vsyncadd [#allocation9], 4294967264 }
  0x54   :  { %5599 = dma.done.wait [#allocation12], 4624  }
  0x55   :  { %5600 = vsyncadd [#allocation12], 4294962672 }
  0x56   :  { %5601 = dma.done.wait [#allocation15], 2352  }
  0x57   :  { %5602 = vsyncadd [#allocation15], 4294964944 }
  0x58   :  { %5603 = dma.done.wait [#allocation18], 2352  }
  0x59   :  { %5604 = vsyncadd [#allocation18], 4294964944 }
  0x5a   :  { %5605 = dma.done.wait [#allocation21], 2352  }
  0x5b   :  { %5606 = vsyncadd [#allocation21], 4294964944 }
  0x5c   :  { %5607 = dma.done.wait [#allocation24], 816  }
  0x5d   :  { %5608 = vsyncadd [#allocation24], 4294966480 }
  0x5e   :  { %5609 = dma.done.wait [#allocation27], 800  }
  0x5f   :  { %5610 = vsyncadd [#allocation27], 4294966496 }
  0x60   :  { %5611 = dma.done.wait [#allocation30], 16  }
  0x61   :  { %5612 = vsyncadd [#allocation30], 4294967280  ;;  %v352_v1 = vld [vmem:[#allocation7 + $0x18] sm:$0xff]  ;;  %v351_v2 = vld [vmem:[#allocation7 + $0x10] sm:$0xff]  ;;  %vm357_vm0 = vcmask 261120   ;;  %v5636_v7 = vmov 16.0  }
  0x62   :  { %376 = vmatpush.msra.mxu0 %v352_v1  ;;  %v350_v3 = vld [vmem:[#allocation7 + $0x8] sm:$0xff]  ;;  %v349_v4 = vld [vmem:[#allocation7] sm:$0xff]  ;;  %v348_v6 = vld [vmem:[#allocation3 + $0x8] sm:$0xff]  ;;  %4971 = vrcp.f32 %v5636_v7  ;;  %vm387_vm1 = vcmask 392192   ;;  %s7125_s28 = sld [smem:[#allocation48_spill]]  ;;  %s5637_s2 = smov 80  }
  0x63   :  { %v347_v5 = vld [vmem:[#allocation3] sm:$0xff]  ;;  %v4944_v9 = vld [vmem:[#allocation8] ss:$0 sm:$0xff]  ;;  %v454_v33 = vld [vmem:[#allocation13 + $0x50] sm:$0xff]  ;;  %s5638_s30 = smov 104   ;;  %s5639_s0 = smov 120  }
  0x64   :  { %377 = vmatpush.msra.mxu0 %v351_v2  ;;  %v455_v34 = vld [vmem:[#allocation13 + $0x58] sm:$0xff]  ;;  %v452_v38 = vld [vmem:[#allocation13 + $0x40] sm:$0xff]  ;;  %v453_v39 = vld [vmem:[#allocation13 + $0x48] sm:$0xff]  ;;  %s5640_s11 = smov 88   ;;  %s5641_s3 = smov 112   ;;  %vm548_vm6 = vcmask 64512  }
  0x65   :  { %501 = vmatpush.msra.mxu2 %v455_v34  ;;  %v450_v41 = vld [vmem:[#allocation13 + $0x30] sm:$0xff]  ;;  %v451_v42 = vld [vmem:[#allocation13 + $0x38] sm:$0xff]  ;;  %v448_v44 = vld [vmem:[#allocation13 + $0x20] sm:$0xff]  ;;  %s5642_s8 = smov 96   ;;  %s5643_s24 = smov 32  }
  0x66   :  { %378 = vmatpush.msra.mxu0 %v350_v3  ;;  %v449_v45 = vld [vmem:[#allocation13 + $0x28] sm:$0xff]  ;;  %v446_v47 = vld [vmem:[#allocation13 + $0x10] sm:$0xff]  ;;  %v447_v48 = vld [vmem:[#allocation13 + $0x18] sm:$0xff]  ;;  %s5644_s13 = smov 24   ;;  %s5645_s17 = smov 40  }
  0x67   :  { %502 = vmatpush.msra.mxu2 %v453_v39  ;;  %v444_v49 = vld [vmem:[#allocation13] sm:$0xff]  ;;  %v445_v50 = vld [vmem:[#allocation13 + $0x8] sm:$0xff]  ;;  %v4945_v62 = vld [vmem:[#allocation10] ss:$0 sm:$0xff] }
  0x68   :  { %379 = vmatpush.msra.mxu0 %v349_v4  ;;  %v4972_v10 = vpop.eup %4971  ;;  %v4946_v1 = vld [vmem:[#allocation11] ss:$0 sm:$0xff]  ;;  %v456_v7 = vld [vmem:[%s7125_s28] sm:$0x3] }
  0x69   :  { %4652 = vmatmul.msk.f32.vlgmr.msra.gmra.mxu0 %vm357_vm0, %v347_v5  ;;  %v398_v12 = vmul.f32 16.0, %v4972_v10  ;;  %vm402_vm2 = vweird.f32 %v4972_v10  ;;  %503 = vmatpush.msra.mxu2 %v451_v42 }
  0x6a   :  { %478 = vmatpush.msrb.mxu0 %v454_v33 }
  0x6b   :  { %v399_v17 = vsub.f32 1.0, %v398_v12  ;;  %504 = vmatpush.msra.mxu2 %v449_v45 }
  0x6c   :  { %479 = vmatpush.msrb.mxu0 %v452_v38 }
  0x6d   :  { %v400_v20 = vmul.f32 %v4972_v10, %v399_v17  ;;  %505 = vmatpush.msra.mxu2 %v447_v48 }
  0x6e   :  { %480 = vmatpush.msrb.mxu0 %v450_v41 }
  0x6f   :  { %v401_v23 = vadd.f32 %v4972_v10, %v400_v20  ;;  %506 = vmatpush.msra.mxu2 %v445_v50 }
  0x70   :  { %481 = vmatpush.msrb.mxu0 %v448_v44 }
  0x71   :  { %4653 = vmatmul.msk.f32.gmra.mxu0 %vm357_vm0, %v348_v6  ;;  %v403_v26 = vsel %vm402_vm2, %v4972_v10, %v401_v23 }
  0x72   :  { %482 = vmatpush.msrb.mxu0 %v446_v47 }
  0x74   :  { %483 = vmatpush.msrb.mxu0 %v444_v49 }
  0xe6   :  { %v381_v8 = vpop.f32.mrf.mxu0 }
  0xe7   :  { %v382_v11 = vadd.f32 %v4944_v9, %v381_v8  ;;  %v458_v8 = vperm.slane %v456_v7, 0 }
  0xe9   :  { %v388_v15 = vsel %vm387_vm1, %v382_v11, 0.0 }
  0xee   :  { %v384_v13 = vpop.f32.mrf.mxu0 }
  0xef   :  { %v385_v14 = vadd.f32 %v4944_v9, %v384_v13 }
  0xf1   :  { %v389_v16 = vsel %vm387_vm1, %v385_v14, 0.0 }
  0xf2   :  { %v390_v18 = vadd.f32 %v389_v16, %v388_v15 }
  0xf4   :  { %v391_v19 = vrot.slane %v390_v18, 4 }
  0xf6   :  { %v392_v21 = vadd.f32 %v391_v19, %v390_v18 }
  0xf8   :  { %v393_v22 = vrot.slane %v392_v21, 2 }
  0xfa   :  { %v394_v24 = vadd.f32 %v393_v22, %v392_v21 }
  0xfc   :  { %v395_v25 = vrot.slane %v394_v24, 1 }
  0xfe   :  { %v396_v27 = vadd.f32 %v395_v25, %v394_v24 }
 0x100   :  { %v404_v28 = vmul.f32 %v403_v26, %v396_v27 }
 0x102   :  { %v405_v29 = vsub.f32 %v382_v11, %v404_v28  ;;  %v406_v30 = vsub.f32 %v385_v14, %v404_v28  ;;  %v459_v14 = vperm.slane %v456_v7, 1 }
 0x104   :  { %v407_v31 = vmul.f32 %v405_v29, %v405_v29  ;;  %v408_v32 = vmul.f32 %v406_v30, %v406_v30 }
 0x106   :  { %v409_v35 = vsel %vm387_vm1, %v407_v31, 0.0  ;;  %v410_v36 = vsel %vm387_vm1, %v408_v32, 0.0 }
 0x107   :  { %v411_v37 = vadd.f32 %v410_v36, %v409_v35 }
 0x109   :  { %v412_v40 = vrot.slane %v411_v37, 4 }
 0x10b   :  { %v413_v43 = vadd.f32 %v412_v40, %v411_v37 }
 0x10d   :  { %v414_v46 = vrot.slane %v413_v43, 2 }
 0x10f   :  { %v415_v51 = vadd.f32 %v414_v46, %v413_v43 }
 0x111   :  { %v416_v52 = vrot.slane %v415_v51, 1 }
 0x113   :  { %v417_v53 = vadd.f32 %v416_v52, %v415_v51 }
 0x115   :  { %v418_v54 = vmul.f32 %v417_v53, %v403_v26 }
 0x117   :  { %v419_v55 = vadd.f32 1e-05, %v418_v54 }
 0x119   :  { %4973 = vrsqrt.f32 %v419_v55  ;;  %vm426_vm4 = vweird.f32 %v419_v55 }
 0x11f   :  { %v4974_v56 = vpop.eup %4973 }
 0x120   :  { %v421_v57 = vmul.f32 %v4974_v56, %v419_v55  ;;  %vm427_vm3 = vweird.f32 %v4974_v56 }
 0x121   :  { %vm428_vm5 = vmor %vm426_vm4, %vm427_vm3 }
 0x122   :  { %v422_v58 = vmul.f32 %v4974_v56, %v421_v57 }
 0x124   :  { %v423_v59 = vmul.f32 0.5, %v422_v58 }
 0x126   :  { %v424_v60 = vsub.f32 1.5, %v423_v59 }
 0x128   :  { %v425_v61 = vmul.f32 %v4974_v56, %v424_v60 }
 0x12a   :  { %v429_v63 = vsel %vm428_vm5, %v4974_v56, %v425_v61 }
 0x12b   :  { %v430_v0 = vmul.f32 %v429_v63, %v405_v29  ;;  %v431_v3 = vmul.f32 %v429_v63, %v406_v30 }
 0x12d   :  { %v436_v2 = vmul.f32 %v4945_v62, %v430_v0  ;;  %v437_v5 = vmul.f32 %v4945_v62, %v431_v3 }
 0x12f   :  { %v5867_v4 = vadd.f32 %v4946_v1, %v436_v2  ;;  %v5873_v6 = vadd.f32 %v4946_v1, %v437_v5 }
 0x131   :  { %4654 = vmatmul.msk.f32.vlgmr.msrb.gmra.mxu0 %vm387_vm1, %v5867_v4  ;;  %4656 = vmatmul.msk.f32.vlgmr.msra.gmra.mxu2 %vm387_vm1, %v5867_v4 }
 0x139   :  { %4655 = vmatmul.msk.f32.gmra.mxu0 %vm387_vm1, %v5873_v6  ;;  %4657 = vmatmul.msk.f32.gmra.mxu2 %vm387_vm1, %v5873_v6 }
 0x1ae   :  { %v485_v9 = vpop.f32.mrf.mxu0 }
 0x1af   :  { %v5882_v10 = vadd.f32 %v485_v9, %v458_v8 }
 0x1b1   :  { %546 = vrot.lane.b32.xlu2 %v5882_v10, %s5637_s2  ;;  %524 = vrot.lane.b32.xlu1 %v5882_v10, %s5638_s30 }
 0x1b2   :  { %516 = vrot.lane.b32.xlu0 %v5882_v10, %s5639_s0 }
 0x1b4   :  { %v508_v11 = vpop.f32.mrf.mxu2 }
 0x1b5   :  { %v509_v16 = vadd.f32 %v508_v11, %v459_v14 }
 0x1b6   :  { %v488_v12 = vpop.f32.mrf.mxu0 }
 0x1b7   :  { %v5890_v13 = vadd.f32 %v488_v12, %v458_v8 }
 0x1b9   :  { %532 = vrot.lane.b32.xlu2 %v5882_v10, %s5640_s11  ;;  %522 = vrot.lane.b32.xlu1 %v5890_v13, %s5641_s3 }
 0x1ba   :  { %520 = vrot.lane.b32.xlu0 %v5882_v10, %s5641_s3 }
 0x1bc   :  { %v511_v15 = vpop.f32.mrf.mxu2 }
 0x1bd   :  { %v512_v17 = vadd.f32 %v511_v15, %v459_v14 }
 0x1bf   :  { %v5898_v18 = vpack.i.bf16 %v512_v17, %v509_v16 }
 0x1c1   :  { %573 = vrot.lane.b32.xlu2 %v5890_v13, %s5637_s2  ;;  %530 = vrot.lane.b32.xlu1 %v5890_v13, %s5642_s8 }
 0x1c2   :  { %518 = vrot.lane.b32.xlu0 %v5890_v13, %s5639_s0 }
 0x1c9   :  { %526 = vrot.lane.b32.xlu1 %v5890_v13, %s5638_s30 }
 0x1ca   :  { %528 = vrot.lane.b32.xlu0 %v5882_v10, %s5642_s8 }
 0x1d2   :  { %534 = vrot.lane.b32.xlu0 %v5890_v13, %s5640_s11 }
 0x20b   :  { %v547_v19 = vpop.permute.xlu2 %546 }
 0x20c   :  { %4658 = vmatpush.xpose.msk.msra.mxu3 %vm548_vm6, %v547_v19 }
 0x20f   :  { %4659 = vmatmul.msk.f32.vlgmr.msra.gmra.mxu3 %vm548_vm6, %v5882_v10 }
 0x213   :  { %v533_v20 = vpop.permute.xlu2 %532 }
 0x21b   :  { %v574_v21 = vpop.permute.xlu2 %573 }
 0x21c   :  { %4660 = vmatpush.xpose.msk.msrb.mxu3 %vm548_vm6, %v574_v21 }
 0x21f   :  { %4661 = vmatmul.msk.f32.vlgmr.msrb.gmra.mxu3 %vm548_vm6, %v5890_v13 }
 0x223   :  { %v5918_v22 = vpop.permute.xlu1 %524 }
 0x224   :  { %v5920_v23 = vpop.permute.xlu0 %516  ;;  %v4859_v14 = vpack.i.bf16 %v5918_v22, %v5890_v13 }
 0x225   :  { %599 = vrot.lane.b32.xlu2 %v5920_v23, %s5637_s2  ;;  %v4854_v12 = vpack.i.bf16 %v5882_v10, %v5920_v23 }
 0x22b   :  { %v5924_v24 = vpop.permute.xlu1 %522 }
 0x22c   :  { %v5926_v25 = vpop.permute.xlu0 %520  ;;  %677 = vrot.lane.b32.xlu0 %v5924_v24, %s5637_s2 }
 0x22d   :  { %703 = vrot.lane.b32.xlu2 %v5918_v22, %s5637_s2  ;;  %651 = vrot.lane.b32.xlu1 %v5926_v25, %s5637_s2 }
 0x233   :  { %v531_v26 = vpop.permute.xlu1 %530 }
 0x234   :  { %v5934_v27 = vpop.permute.xlu0 %518  ;;  %781 = vrot.lane.b32.xlu0 %v531_v26, %s5637_s2 }
 0x235   :  { %807 = vrot.lane.b32.xlu1 %v533_v20, %s5637_s2  ;;  %625 = vrot.lane.b32.xlu2 %v5934_v27, %s5637_s2 }
 0x23b   :  { %v5940_v28 = vpop.permute.xlu1 %526 }
 0x23c   :  { %v529_v29 = vpop.permute.xlu0 %528 }
 0x23d   :  { %729 = vrot.lane.b32.xlu2 %v5940_v28, %s5637_s2  ;;  %755 = vrot.lane.b32.xlu1 %v529_v29, %s5637_s2 }
 0x244   :  { %v535_v30 = vpop.permute.xlu0 %534 }
 0x245   :  { %833 = vrot.lane.b32.xlu0 %v535_v30, %s5637_s2 }
 0x24d   :  { %4845 = vrot.lane.b32.xlu0 %v5898_v18, %s5640_s11 }
 0x27f   :  { %v600_v31 = vpop.permute.xlu2 %599 }
 0x280   :  { %4662 = vmatpush.xpose.msk.msra.mxu3 %vm548_vm6, %v600_v31 }
 0x283   :  { %4663 = vmatmul.msk.f32.vlgmr.msra.gmra.mxu3 %vm548_vm6, %v5920_v23 }
 0x287   :  { %v704_v32 = vpop.permute.xlu2 %703 }
 0x28f   :  { %v626_v33 = vpop.permute.xlu2 %625 }
 0x290   :  { %4664 = vmatpush.xpose.msk.msra.mxu0 %vm548_vm6, %v626_v33 }
 0x292   :  { %v570_v34 = vpop.f32.mrf.mxu3 }
 0x293   :  { %v859_v35 = vmul.f32 0.35355338, %v570_v34  ;;  %4665 = vmatmul.msk.f32.vlgmr.msra.gmra.mxu0 %vm548_vm6, %v5934_v27 }
 0x295   :  { %v871_v36 = vsel %vm548_vm6, %v859_v35, -inf }
 0x296   :  { %872 = vmax.xlane.f32.xlu2 %v871_v36 }
 0x297   :  { %v730_v37 = vpop.permute.xlu2 %729 }
 0x298   :  { %4672 = vmatpush.xpose.msk.msrb.mxu0 %vm548_vm6, %v730_v37 }
 0x29b   :  { %4673 = vmatmul.msk.f32.vlgmr.msrb.gmra.mxu0 %vm548_vm6, %v5940_v28 }
 0x29e   :  { %v678_v38 = vpop.permute.xlu0 %677 }
 0x29f   :  { %v652_v39 = vpop.permute.xlu1 %651  ;;  %4668 = vmatpush.xpose.msk.msrb.mxu2 %vm548_vm6, %v678_v38 }
 0x2a0   :  { %4666 = vmatpush.xpose.msk.msrb.mxu3 %vm548_vm6, %v652_v39 }
 0x2a2   :  { %v596_v40 = vpop.f32.mrf.mxu3  ;;  %4669 = vmatmul.msk.f32.vlgmr.msrb.gmra.mxu2 %vm548_vm6, %v5924_v24 }
 0x2a3   :  { %v860_v41 = vmul.f32 0.35355338, %v596_v40  ;;  %4667 = vmatmul.msk.f32.vlgmr.msrb.gmra.mxu3 %vm548_vm6, %v5926_v25 }
 0x2a4   :  { %4670 = vmatpush.xpose.msk.msra.mxu3 %vm548_vm6, %v704_v32 }
 0x2a5   :  { %v874_v42 = vsel %vm548_vm6, %v860_v41, -inf }
 0x2a6   :  { %875 = vmax.xlane.f32.xlu0 %v874_v42  ;;  %v782_v43 = vpop.permute.xlu0 %781 }
 0x2a7   :  { %v808_v44 = vpop.permute.xlu1 %807  ;;  %4676 = vmatpush.xpose.msk.msra.mxu2 %vm548_vm6, %v782_v43 }
 0x2a8   :  { %4678 = vmatpush.xpose.msk.msrb.mxu3 %vm548_vm6, %v808_v44 }
 0x2aa   :  { %4677 = vmatmul.msk.f32.vlgmr.msra.gmra.mxu2 %vm548_vm6, %v531_v26 }
 0x2ab   :  { %4671 = vmatmul.msk.f32.vlgmr.msra.gmra.mxu3 %vm548_vm6, %v5918_v22 }
 0x2af   :  { %v756_v45 = vpop.permute.xlu1 %755 }
 0x2b0   :  { %4674 = vmatpush.xpose.msk.msra.mxu1 %vm548_vm6, %v756_v45 }
 0x2b3   :  { %4675 = vmatmul.msk.f32.vlgmr.msra.gmra.mxu1 %vm548_vm6, %v529_v29  ;;  %4679 = vmatmul.msk.f32.vlgmr.msrb.gmra.mxu3 %vm548_vm6, %v533_v20 }
 0x2b7   :  { %v834_v46 = vpop.permute.xlu0 %833 }
 0x2b8   :  { %4680 = vmatpush.xpose.msk.msra.mxu0 %vm548_vm6, %v834_v46 }
 0x2bb   :  { %4681 = vmatmul.msk.f32.vlgmr.msra.gmra.mxu0 %vm548_vm6, %v535_v30 }
 0x2bf   :  { %v6007_v15 = vpop.permute.xlu0 %4845 }
 0x306   :  { %v622_v47 = vpop.f32.mrf.mxu3 }
 0x307   :  { %v861_v48 = vmul.f32 0.35355338, %v622_v47 }
 0x309   :  { %v877_v49 = vsel %vm548_vm6, %v861_v48, -inf  ;;  %v873_v50 = vpop.xlane.xlu2 %872 }
 0x30a   :  { %878 = vmax.xlane.f32.xlu1 %v877_v49  ;;  %v907_v52 = vsub.f32 %v859_v35, %v873_v50 }
 0x30c   :  { %v919_v53 = vmul.f32 1.442695, %v907_v52 }
 0x30e   :  { %4975 = vpow2.f32 %v919_v53 }
 0x310   :  { %v648_v51 = vpop.f32.mrf.mxu0 }
 0x311   :  { %v5991_v5 = vmul.f32 0.35355338, %v648_v51 }
 0x313   :  { %v880_v7 = vsel %vm548_vm6, %v5991_v5, -inf }
 0x314   :  { %v5984_v62 = vpop.eup %4975 }
 0x315   :  { %v943_v2 = vsel %vm548_vm6, %v5984_v62, 0.0 }
 0x318   :  { %v752_v59 = vpop.f32.mrf.mxu0 }
 0x319   :  { %v5982_v61 = vmul.f32 0.35355338, %v752_v59  ;;  %v876_v16 = vpop.xlane.xlu0 %875 }
 0x31a   :  { %v908_v17 = vsub.f32 %v860_v41, %v876_v16 }
 0x31b   :  { %v892_v0 = vsel %vm548_vm6, %v5982_v61, -inf }
 0x31c   :  { %v921_v20 = vmul.f32 1.442695, %v908_v17 }
 0x31e   :  { %4977 = vpow2.f32 %v921_v20 }
 0x324   :  { %v6015_v26 = vpop.eup %4977 }
 0x325   :  { %v700_v54 = vpop.f32.mrf.mxu2  ;;  %v946_v30 = vsel %vm548_vm6, %v6015_v26, 0.0 }
 0x326   :  { %v674_v55 = vpop.f32.mrf.mxu3  ;;  %v5977_v56 = vmul.f32 0.35355338, %v700_v54 }
 0x327   :  { %v863_v57 = vmul.f32 0.35355338, %v674_v55 }
 0x328   :  { %v886_v58 = vsel %vm548_vm6, %v5977_v56, -inf }
 0x329   :  { %v883_v60 = vsel %vm548_vm6, %v863_v57, -inf  ;;  %887 = vmax.xlane.f32.xlu0 %v886_v58 }
 0x32a   :  { %884 = vmax.xlane.f32.xlu1 %v883_v60 }
 0x32d   :  { %v804_v19 = vpop.f32.mrf.mxu2 }
 0x32e   :  { %v726_v8 = vpop.f32.mrf.mxu3  ;;  %v6009_v21 = vmul.f32 0.35355338, %v804_v19 }
 0x32f   :  { %v5995_v9 = vmul.f32 0.35355338, %v726_v8 }
 0x330   :  { %v778_v63 = vpop.f32.mrf.mxu1  ;;  %v898_v10 = vsel %vm548_vm6, %v6009_v21, -inf }
 0x331   :  { %v867_v1 = vmul.f32 0.35355338, %v778_v63  ;;  %893 = vmax.xlane.f32.xlu0 %v892_v0  ;;  %v889_v11 = vsel %vm548_vm6, %v5995_v9, -inf }
 0x332   :  { %944 = vadd.xlane.f32.xlu1 %v943_v2 }
 0x333   :  { %v895_v3 = vsel %vm548_vm6, %v867_v1, -inf }
 0x334   :  { %896 = vmax.xlane.f32.xlu2 %v895_v3 }
 0x336   :  { %v830_v31 = vpop.f32.mrf.mxu3 }
 0x337   :  { %v6021_v33 = vmul.f32 0.35355338, %v830_v31 }
 0x338   :  { %v856_v23 = vpop.f32.mrf.mxu0 }
 0x339   :  { %v6013_v13 = vmul.f32 0.35355338, %v856_v23  ;;  %v901_v34 = vsel %vm548_vm6, %v6021_v33, -inf }
 0x33b   :  { %v904_v29 = vsel %vm548_vm6, %v6013_v13, -inf }
 0x33c   :  { %881 = vmax.xlane.f32.xlu2 %v880_v7 }
 0x344   :  { %890 = vmax.xlane.f32.xlu2 %v889_v11 }
 0x34b   :  { %4855 = vrot.lane.b32.xlu1 %v4854_v12, %s5643_s24 }
 0x353   :  { %4860 = vrot.lane.b32.xlu1 %v4859_v14, %s5643_s24 }
 0x35c   :  { %4850 = vrot.lane.b32.xlu2 %v5898_v18, %s5642_s8 }
 0x37d   :  { %899 = vmax.xlane.f32.xlu1 %v898_v10  ;;  %v879_v22 = vpop.xlane.xlu1 %878 }
 0x37e   :  { %v909_v18 = vsub.f32 %v861_v48, %v879_v22 }
 0x380   :  { %v923_v32 = vmul.f32 1.442695, %v909_v18 }
 0x382   :  { %4979 = vpow2.f32 %v923_v32 }
 0x385   :  { %905 = vmax.xlane.f32.xlu2 %v904_v29  ;;  %947 = vadd.xlane.f32.xlu1 %v946_v30  ;;  %v4847_v29 = vunpack.i.l.bf16 %v6007_v15 }
 0x388   :  { %v6025_v35 = vpop.eup %4979 }
 0x389   :  { %v949_v36 = vsel %vm548_vm6, %v6025_v35, 0.0 }
 0x38d   :  { %902 = vmax.xlane.f32.xlu1 %v901_v34  ;;  %v4869_v34 = vpack.i.bf16 %v4847_v29, %v5924_v24 }
 0x395   :  { %950 = vadd.xlane.f32.xlu1 %v949_v36 }
 0x39c   :  { %v888_v38 = vpop.xlane.xlu0 %887 }
 0x39d   :  { %v885_v37 = vpop.xlane.xlu1 %884  ;;  %v912_v41 = vsub.f32 %v5977_v56, %v888_v38 }
 0x39e   :  { %v911_v39 = vsub.f32 %v863_v57, %v885_v37 }
 0x39f   :  { %v929_v42 = vmul.f32 1.442695, %v912_v41 }
 0x3a0   :  { %v927_v40 = vmul.f32 1.442695, %v911_v39 }
 0x3a2   :  { %4981 = vpow2.f32 %v927_v40 }
 0x3a4   :  { %v894_v44 = vpop.xlane.xlu0 %893 }
 0x3a5   :  { %v945_v43 = vpop.xlane.xlu1 %944  ;;  %v914_v49 = vsub.f32 %v5982_v61, %v894_v44 }
 0x3a6   :  { %4983 = vrcp.f32 %v945_v43  ;;  %vm984_vm8 = vweird.f32 %v945_v43  ;;  %v988_v3 = vand.u32 2147483647, %v945_v43 }
 0x3a7   :  { %v897_v45 = vpop.xlane.xlu2 %896  ;;  %4985 = vpow2.f32 %v929_v42  ;;  %v933_v54 = vmul.f32 1.442695, %v914_v49 }
 0x3a8   :  { %v6030_v46 = vpop.eup %4981  ;;  %v915_v47 = vsub.f32 %v867_v1, %v897_v45  ;;  %v990_v1 = vand.u32 2147483648, %v945_v43  ;;  %vm989_vm10 = vcmp.eq.f32.partialorder %v988_v3, 8.507059e+37 }
 0x3a9   :  { %v955_v48 = vsel %vm548_vm6, %v6030_v46, 0.0 }
 0x3aa   :  { %v935_v50 = vmul.f32 1.442695, %v915_v47  ;;  %956 = vadd.xlane.f32.xlu1 %v955_v48  ;;  %v991_v12 = vor.u32 1.1754944e-38, %v990_v1 }
 0x3ac   :  { %v4984_v51 = vpop.eup %4983  ;;  %4987 = vpow2.f32 %v935_v50 }
 0x3ad   :  { %v980_v52 = vmul.f32 %v4984_v51, %v945_v43  ;;  %v6035_v53 = vpop.eup %4985  ;;  %4989 = vpow2.f32 %v933_v54  ;;  %vm985_vm7 = vweird.f32 %v4984_v51 }
 0x3ae   :  { %v958_v59 = vsel %vm548_vm6, %v6035_v53, 0.0  ;;  %vm986_vm9 = vmor %vm984_vm8, %vm985_vm7 }
 0x3af   :  { %v981_v55 = vsub.f32 1.0, %v980_v52  ;;  %v882_v56 = vpop.xlane.xlu2 %881 }
 0x3b0   :  { %v910_v57 = vsub.f32 %v5991_v5, %v882_v56 }
 0x3b1   :  { %v982_v58 = vmul.f32 %v4984_v51, %v981_v55 }
 0x3b2   :  { %v6040_v60 = vpop.eup %4987  ;;  %v925_v61 = vmul.f32 1.442695, %v910_v57  ;;  %959 = vadd.xlane.f32.xlu1 %v958_v59 }
 0x3b3   :  { %v967_v63 = vsel %vm548_vm6, %v6040_v60, 0.0  ;;  %v983_v0 = vadd.f32 %v4984_v51, %v982_v58  ;;  %v6044_v5 = vpop.eup %4989 }
 0x3b4   :  { %4991 = vpow2.f32 %v925_v61  ;;  %968 = vadd.xlane.f32.xlu0 %v967_v63  ;;  %v964_v17 = vsel %vm548_vm6, %v6044_v5, 0.0 }
 0x3b5   :  { %v987_v8 = vsel %vm986_vm9, %v4984_v51, %v983_v0 }
 0x3b6   :  { %v992_v19 = vsel %vm989_vm10, %v991_v12, %v987_v8  ;;  %v4864_v12 = vpack.i.bf16 %v5934_v27, %v5926_v25  ;;  %v4848_v27 = vunpack.i.h.bf16 %v6007_v15 }
 0x3b7   :  { %v891_v2 = vpop.xlane.xlu2 %890 }
 0x3b8   :  { %v913_v7 = vsub.f32 %v5995_v9, %v891_v2  ;;  %v993_v9 = vmul.f32 %v5984_v62, %v992_v19 }
 0x3ba   :  { %v6047_v11 = vpop.eup %4991  ;;  %v931_v14 = vmul.f32 1.442695, %v913_v7 }
 0x3bb   :  { %v952_v16 = vsel %vm548_vm6, %v6047_v11, 0.0 }
 0x3bc   :  { %4993 = vpow2.f32 %v931_v14  ;;  %953 = vadd.xlane.f32.xlu2 %v952_v16  ;;  %965 = vadd.xlane.f32.xlu0 %v964_v17 }
 0x3bd   :  { %v4856_v20 = vpop.permute.xlu1 %4855 }
 0x3be   :  { %v4857_v10 = vunpack.i.l.bf16 %v4856_v20  ;;  %v4858_v23 = vunpack.i.h.bf16 %v4856_v20 }
 0x3bf   :  { %v4851_v62 = vpop.permute.xlu2 %4850 }
 0x3c0   :  { %1180 = vmatpush.msrb.mxu1 %v4858_v23  ;;  %1232 = vmatpush.msra.mxu3 %v4857_v10  ;;  %v4853_v36 = vunpack.i.h.bf16 %v4851_v62  ;;  %v4852_v7 = vunpack.i.l.bf16 %v4851_v62 }
 0x3c1   :  { %4682 = vmatmul.msk.f32.vlgmr.msrb.gmra.mxu1 %vm548_vm6, %v993_v9 }
 0x3c2   :  { %v6055_v22 = vpop.eup %4993  ;;  %v4874_v19 = vpack.i.bf16 %v5940_v28, %v4852_v7 }
 0x3c3   :  { %v961_v18 = vsel %vm548_vm6, %v6055_v22, 0.0 }
 0x3c4   :  { %962 = vadd.xlane.f32.xlu0 %v961_v18 }
 0x3c5   :  { %v4861_v30 = vpop.permute.xlu1 %4860 }
 0x3c6   :  { %v4863_v31 = vunpack.i.h.bf16 %v4861_v30  ;;  %v4862_v32 = vunpack.i.l.bf16 %v4861_v30 }
 0x3c8   :  { %1206 = vmatpush.msrb.mxu2 %v4862_v32  ;;  %1336 = vmatpush.msrb.mxu3 %v4863_v31 }
 0x3cb   :  { %4870 = vrot.lane.b32.xlu1 %v4869_v34, %s5643_s24 }
 0x3d3   :  { %1393 = vrot.lane.b32.xlu1 %v4853_v36, %s5643_s24 }
 0x3f0   :  { %v900_v37 = vpop.xlane.xlu1 %899 }
 0x3f1   :  { %v916_v38 = vsub.f32 %v6009_v21, %v900_v37 }
 0x3f3   :  { %v937_v39 = vmul.f32 1.442695, %v916_v38 }
 0x3f5   :  { %4995 = vpow2.f32 %v937_v39 }
 0x3f8   :  { %v906_v40 = vpop.xlane.xlu2 %905  ;;  %v948_v41 = vpop.xlane.xlu1 %947 }
 0x3f9   :  { %v918_v42 = vsub.f32 %v6013_v13, %v906_v40  ;;  %4997 = vrcp.f32 %v948_v41  ;;  %v1005_v13 = vand.u32 2147483648, %v948_v41  ;;  %v1003_v55 = vand.u32 2147483647, %v948_v41 }
 0x3fa   :  { %vm999_vm12 = vweird.f32 %v948_v41 }
 0x3fb   :  { %v6065_v43 = vpop.eup %4995  ;;  %v941_v44 = vmul.f32 1.442695, %v918_v42  ;;  %v1006_v58 = vor.u32 1.1754944e-38, %v1005_v13  ;;  %vm1004_vm14 = vcmp.eq.f32.partialorder %v1003_v55, 8.507059e+37 }
 0x3fc   :  { %v970_v24 = vsel %vm548_vm6, %v6065_v43, 0.0 }
 0x3fd   :  { %4999 = vpow2.f32 %v941_v44  ;;  %971 = vadd.xlane.f32.xlu2 %v970_v24 }
 0x3ff   :  { %v4998_v45 = vpop.eup %4997 }
 0x400   :  { %v995_v47 = vmul.f32 %v4998_v45, %v948_v41  ;;  %v903_v48 = vpop.xlane.xlu1 %902  ;;  %vm1000_vm11 = vweird.f32 %v4998_v45 }
 0x401   :  { %v917_v21 = vsub.f32 %v6021_v33, %v903_v48  ;;  %vm1001_vm13 = vmor %vm999_vm12, %vm1000_vm11 }
 0x402   :  { %v996_v49 = vsub.f32 1.0, %v995_v47 }
 0x403   :  { %v6070_v50 = vpop.eup %4999  ;;  %v939_v51 = vmul.f32 1.442695, %v917_v21 }
 0x404   :  { %v997_v52 = vmul.f32 %v4998_v45, %v996_v49  ;;  %v976_v54 = vsel %vm548_vm6, %v6070_v50, 0.0 }
 0x405   :  { %5001 = vpow2.f32 %v939_v51  ;;  %977 = vadd.xlane.f32.xlu0 %v976_v54 }
 0x406   :  { %v998_v56 = vadd.f32 %v4998_v45, %v997_v52 }
 0x408   :  { %v1002_v57 = vsel %vm1001_vm13, %v4998_v45, %v998_v56  ;;  %v951_v59 = vpop.xlane.xlu1 %950 }
 0x409   :  { %5003 = vrcp.f32 %v951_v59  ;;  %v1007_v33 = vsel %vm1004_vm14, %v1006_v58, %v1002_v57  ;;  %v1020_v8 = vand.u32 2147483648, %v951_v59  ;;  %v1018_v16 = vand.u32 2147483647, %v951_v59 }
 0x40a   :  { %v1008_v63 = vmul.f32 %v6015_v26, %v1007_v33  ;;  %vm1014_vm2 = vweird.f32 %v951_v59 }
 0x40b   :  { %v6074_v61 = vpop.eup %5001  ;;  %v1021_v17 = vor.u32 1.1754944e-38, %v1020_v8  ;;  %vm1019_vm4 = vcmp.eq.f32.partialorder %v1018_v16, 8.507059e+37 }
 0x40c   :  { %v973_v0 = vsel %vm548_vm6, %v6074_v61, 0.0  ;;  %4683 = vmatmul.msk.f32.vlgmr.msrb.gmra.mxu2 %vm548_vm6, %v1008_v63 }
 0x40d   :  { %974 = vadd.xlane.f32.xlu1 %v973_v0 }
 0x40f   :  { %v5004_v1 = vpop.eup %5003 }
 0x410   :  { %v1010_v2 = vmul.f32 %v5004_v1, %v951_v59  ;;  %vm1015_vm15 = vweird.f32 %v5004_v1 }
 0x411   :  { %vm1016_vm3 = vmor %vm1014_vm2, %vm1015_vm15 }
 0x412   :  { %v1011_v3 = vsub.f32 1.0, %v1010_v2 }
 0x414   :  { %v1012_v14 = vmul.f32 %v5004_v1, %v1011_v3 }
 0x415   :  { %4865 = vrot.lane.b32.xlu2 %v4864_v12, %s5643_s24 }
 0x416   :  { %v1013_v26 = vadd.f32 %v5004_v1, %v1012_v14 }
 0x418   :  { %v1017_v20 = vsel %vm1016_vm3, %v5004_v1, %v1013_v26 }
 0x419   :  { %4875 = vrot.lane.b32.xlu0 %v4874_v19, %s5643_s24  ;;  %v1022_v10 = vsel %vm1019_vm4, %v1021_v17, %v1017_v20 }
 0x41a   :  { %v1023_v23 = vmul.f32 %v6025_v35, %v1022_v10 }
 0x41c   :  { %4684 = vmatmul.msk.f32.vlgmr.msra.gmra.mxu3 %vm548_vm6, %v1023_v23 }
 0x41d   :  { %v6087_v25 = vpop.xlane.xlu1 %956 }
 0x41e   :  { %vm1044_vm2 = vweird.f32 %v6087_v25  ;;  %v1050_v7 = vand.u32 2147483648, %v6087_v25  ;;  %v1048_v14 = vand.u32 2147483647, %v6087_v25 }
 0x420   :  { %v1051_v10 = vor.u32 1.1754944e-38, %v1050_v7 }
 0x425   :  { %v960_v9 = vpop.xlane.xlu1 %959 }
 0x426   :  { %5005 = vrcp.f32 %v960_v9  ;;  %1445 = vrot.lane.b32.xlu1 %v4848_v27, %s5643_s24  ;;  %v1065_v35 = vand.u32 2147483648, %v960_v9  ;;  %vm1059_vm7 = vweird.f32 %v960_v9  ;;  %v1063_v62 = vand.u32 2147483647, %v960_v9 }
 0x427   :  { %v6091_v18 = vpop.xlane.xlu0 %968 }
 0x428   :  { %v1066_v37 = vor.u32 1.1754944e-38, %v1065_v35  ;;  %vm1064_vm9 = vcmp.eq.f32.partialorder %v1063_v62, 8.507059e+37 }
 0x42c   :  { %v5006_v28 = vpop.eup %5005 }
 0x42d   :  { %v1055_v29 = vmul.f32 %v5006_v28, %v960_v9  ;;  %vm1060_vm5 = vweird.f32 %v5006_v28 }
 0x42e   :  { %vm1061_vm8 = vmor %vm1059_vm7, %vm1060_vm5  ;;  %vm1049_vm7 = vcmp.eq.f32.partialorder %v1048_v14, 8.507059e+37 }
 0x42f   :  { %v1056_v30 = vsub.f32 1.0, %v1055_v29  ;;  %v6093_v31 = vpop.xlane.xlu0 %965  ;;  %v954_v55 = vpop.xlane.xlu2 %953 }
 0x430   :  { %v1035_v8 = vand.u32 2147483648, %v954_v55  ;;  %vm1029_vm4 = vweird.f32 %v954_v55  ;;  %v1033_v16 = vand.u32 2147483647, %v954_v55 }
 0x431   :  { %v1057_v32 = vmul.f32 %v5006_v28, %v1056_v30 }
 0x432   :  { %v1036_v23 = vor.u32 1.1754944e-38, %v1035_v8 }
 0x433   :  { %v1058_v34 = vadd.f32 %v5006_v28, %v1057_v32 }
 0x435   :  { %v1062_v15 = vsel %vm1061_vm8, %v5006_v28, %v1058_v34  ;;  %vm1034_vm8 = vcmp.eq.f32.partialorder %v1033_v16, 8.507059e+37 }
 0x436   :  { %v1067_v38 = vsel %vm1064_vm9, %v1066_v37, %v1062_v15 }
 0x437   :  { %v963_v36 = vpop.xlane.xlu0 %962  ;;  %v1068_v24 = vmul.f32 %v6035_v53, %v1067_v38 }
 0x438   :  { %5007 = vrcp.f32 %v963_v36  ;;  %v1080_v47 = vand.u32 2147483648, %v963_v36  ;;  %v1078_v21 = vand.u32 2147483647, %v963_v36  ;;  %vm1074_vm11 = vweird.f32 %v963_v36 }
 0x439   :  { %5009 = vrcp.f32 %v6087_v25 }
 0x43a   :  { %v1081_v52 = vor.u32 1.1754944e-38, %v1080_v47  ;;  %vm1079_vm13 = vcmp.eq.f32.partialorder %v1078_v21, 8.507059e+37  ;;  %5011 = vrcp.f32 %v954_v55 }
 0x43b   :  { %5013 = vrcp.f32 %v6091_v18 }
 0x43c   :  { %5015 = vrcp.f32 %v6093_v31 }
 0x43d   :  { %v4871_v39 = vpop.permute.xlu1 %4870 }
 0x43e   :  { %v5008_v40 = vpop.eup %5007  ;;  %v4873_v41 = vunpack.i.h.bf16 %v4871_v39  ;;  %v4872_v42 = vunpack.i.l.bf16 %v4871_v39 }
 0x43f   :  { %v1070_v44 = vmul.f32 %v5008_v40, %v963_v36  ;;  %vm1075_vm10 = vweird.f32 %v5008_v40  ;;  %v5010_v56 = vpop.eup %5009 }
 0x440   :  { %1310 = vmatpush.msra.mxu2 %v4872_v42  ;;  %1440 = vmatpush.msra.mxu3 %v4873_v41  ;;  %vm1076_vm12 = vmor %vm1074_vm11, %vm1075_vm10  ;;  %v5012_v57 = vpop.eup %5011  ;;  %v1040_v58 = vmul.f32 %v5010_v56, %v6087_v25  ;;  %vm1045_vm14 = vweird.f32 %v5010_v56 }
 0x441   :  { %v1071_v45 = vsub.f32 1.0, %v1070_v44  ;;  %4687 = vmatmul.msk.f32.vlgmr.msra.gmra.mxu2 %vm548_vm6, %v1068_v24  ;;  %v1025_v59 = vmul.f32 %v5012_v57, %v954_v55  ;;  %vm1030_vm15 = vweird.f32 %v5012_v57  ;;  %vm6105_vm3 = vmor %vm1044_vm2, %vm1045_vm14  ;;  %v6110_v26 = vpop.eup %5013 }
 0x442   :  { %v1041_v33 = vsub.f32 1.0, %v1040_v58  ;;  %vm1031_vm5 = vmor %vm1029_vm4, %vm1030_vm15  ;;  %v6112_v17 = vpop.eup %5015  ;;  %v1100_v9 = vmul.f32 %v6110_v26, %v6091_v18  ;;  %vm1104_vm15 = vweird.f32 %v6091_v18 }
 0x443   :  { %v1072_v48 = vmul.f32 %v5008_v40, %v1071_v45  ;;  %v1026_v63 = vsub.f32 1.0, %v1025_v59  ;;  %v1085_v25 = vmul.f32 %v6112_v17, %v6093_v31  ;;  %vm1090_vm14 = vweird.f32 %v6112_v17 }
 0x444   :  { %v1042_v0 = vmul.f32 %v5010_v56, %v1041_v33  ;;  %v1101_v38 = vsub.f32 1.0, %v1100_v9 }
 0x445   :  { %v1073_v49 = vadd.f32 %v5008_v40, %v1072_v48  ;;  %v1394_v51 = vpop.permute.xlu1 %1393  ;;  %v1027_v1 = vmul.f32 %v5012_v57, %v1026_v63  ;;  %v1086_v39 = vsub.f32 1.0, %v1085_v25 }
 0x446   :  { %1414 = vmatpush.msrb.mxu2 %v1394_v51 }
 0x447   :  { %v1077_v13 = vsel %vm1076_vm12, %v5008_v40, %v1073_v49  ;;  %v1028_v2 = vadd.f32 %v5012_v57, %v1027_v1 }
 0x448   :  { %v1082_v54 = vsel %vm1079_vm13, %v1081_v52, %v1077_v13  ;;  %vm1105_vm13 = vweird.f32 %v6110_v26 }
 0x449   :  { %v1083_v53 = vmul.f32 %v6055_v22, %v1082_v54  ;;  %v1043_v22 = vadd.f32 %v5010_v56, %v1042_v0  ;;  %v1032_v20 = vsel %vm1031_vm5, %v5012_v57, %v1028_v2  ;;  %v1110_v54 = vand.u32 2147483648, %v6091_v18  ;;  %vm6141_vm2 = vmor %vm1104_vm15, %vm1105_vm13 }
 0x44a   :  { %v1037_v28 = vsel %vm1034_vm8, %v1036_v23, %v1032_v20  ;;  %v1093_v57 = vand.u32 2147483647, %v6093_v31 }
 0x44b   :  { %4688 = vmatmul.msk.f32.vlgmr.msrb.gmra.mxu3 %vm548_vm6, %v1083_v53  ;;  %v1047_v19 = vsel %vm6105_vm3, %v5010_v56, %v1043_v22  ;;  %v1038_v15 = vmul.f32 %v6047_v11, %v1037_v28  ;;  %v1102_v11 = vmul.f32 %v6110_v26, %v1101_v38  ;;  %v1095_v53 = vand.u32 2147483648, %v6093_v31 }
 0x44c   :  { %v1052_v29 = vsel %vm1049_vm7, %v1051_v10, %v1047_v19  ;;  %v1108_v56 = vand.u32 2147483647, %v6091_v18  ;;  %vm1089_vm3 = vweird.f32 %v6093_v31  ;;  %v1111_v63 = vor.u32 1.1754944e-38, %v1110_v54 }
 0x44d   :  { %v1053_v37 = vmul.f32 %v6030_v46, %v1052_v29  ;;  %v1087_v46 = vmul.f32 %v6112_v17, %v1086_v39  ;;  %v1103_v51 = vadd.f32 %v6110_v26, %v1102_v11  ;;  %vm1091_vm4 = vmor %vm1089_vm3, %vm1090_vm14  ;;  %v1096_v0 = vor.u32 1.1754944e-38, %v1095_v53  ;;  %v1526_v11 = vld [vmem:[#allocation14 + $0x10] sm:$0xff] }
 0x44e   :  { %vm1109_vm5 = vcmp.eq.f32.partialorder %v1108_v56, 8.507059e+37  ;;  %vm1094_vm7 = vcmp.eq.f32.partialorder %v1093_v57, 8.507059e+37  ;;  %vm1516_vm3 = vcmask 195584  }
 0x44f   :  { %v1088_v52 = vadd.f32 %v6112_v17, %v1087_v46  ;;  %v1107_v59 = vsel %vm6141_vm2, %v6110_v26, %v1103_v51  ;;  %v1525_v46 = vld [vmem:[#allocation14 + $0x8] sm:$0xff]  ;;  %vm1513_vm2 = vcmask 130048  }
 0x450   :  { %v1112_v2 = vsel %vm1109_vm5, %v1111_v63, %v1107_v59 }
 0x451   :  { %v1092_v33 = vsel %vm1091_vm4, %v6112_v17, %v1088_v52  ;;  %v1113_v17 = vmul.f32 %v6040_v60, %v1112_v2  ;;  %vm1521_vm4 = vcmask 326656  }
 0x452   :  { %v1097_v31 = vsel %vm1094_vm7, %v1096_v0, %v1092_v33 }
 0x453   :  { %v1098_v26 = vmul.f32 %v6044_v5, %v1097_v31 }
 0x470   :  { %v972_v3 = vpop.xlane.xlu2 %971 }
 0x471   :  { %5017 = vrcp.f32 %v972_v3  ;;  %v1125_v41 = vand.u32 2147483648, %v972_v3  ;;  %v1123_v42 = vand.u32 2147483647, %v972_v3  ;;  %vm1119_vm10 = vweird.f32 %v972_v3 }
 0x473   :  { %v1126_v47 = vor.u32 1.1754944e-38, %v1125_v41  ;;  %vm1124_vm12 = vcmp.eq.f32.partialorder %v1123_v42, 8.507059e+37  ;;  %v1529_v42 = vld [vmem:[#allocation14 + $0x28] sm:$0xff] }
 0x477   :  { %v5018_v27 = vpop.eup %5017 }
 0x478   :  { %v1115_v30 = vmul.f32 %v5018_v27, %v972_v3  ;;  %v4866_v32 = vpop.permute.xlu2 %4865  ;;  %v6120_v34 = vpop.xlane.xlu0 %977  ;;  %vm1120_vm9 = vweird.f32 %v5018_v27 }
 0x479   :  { %v4868_v35 = vunpack.i.h.bf16 %v4866_v32  ;;  %v4867_v62 = vunpack.i.l.bf16 %v4866_v32  ;;  %5019 = vrcp.f32 %v6120_v34  ;;  %vm1121_vm11 = vmor %vm1119_vm10, %vm1120_vm9  ;;  %v1155_v10 = vand.u32 2147483648, %v6120_v34 }
 0x47a   :  { %v1116_v36 = vsub.f32 1.0, %v1115_v30  ;;  %v1153_v60 = vand.u32 2147483647, %v6120_v34 }
 0x47b   :  { %1258 = vmatpush.msrb.mxu0 %v4868_v35  ;;  %1284 = vmatpush.msra.mxu1 %v4867_v62  ;;  %v1156_v28 = vor.u32 1.1754944e-38, %v1155_v10  ;;  %v1182_v62 = vpop.f32.mrf.mxu1 }
 0x47c   :  { %v1117_v40 = vmul.f32 %v5018_v27, %v1116_v36  ;;  %4685 = vmatmul.msk.f32.vlgmr.msrb.gmra.mxu0 %vm548_vm6, %v1038_v15  ;;  %4686 = vmatmul.msk.f32.vlgmr.msra.gmra.mxu1 %vm548_vm6, %v1053_v37  ;;  %vm1154_vm15 = vcmp.eq.f32.partialorder %v1153_v60, 8.507059e+37 }
 0x47e   :  { %v1118_v44 = vadd.f32 %v5018_v27, %v1117_v40 }
 0x47f   :  { %v6127_v24 = vpop.eup %5019 }
 0x480   :  { %v1122_v45 = vsel %vm1121_vm11, %v5018_v27, %v1118_v44  ;;  %v975_v48 = vpop.xlane.xlu1 %974  ;;  %v1145_v21 = vmul.f32 %v6127_v24, %v6120_v34  ;;  %vm1150_vm9 = vweird.f32 %v6127_v24  ;;  %v1528_v44 = vld [vmem:[#allocation14 + $0x20] sm:$0xff] }
 0x481   :  { %5021 = vrcp.f32 %v975_v48  ;;  %v1127_v49 = vsel %vm1124_vm12, %v1126_v47, %v1122_v45  ;;  %v1138_v3 = vand.u32 2147483647, %v975_v48  ;;  %v1140_v7 = vand.u32 2147483648, %v975_v48  ;;  %v1524_v45 = vld [vmem:[#allocation14] sm:$0xff] }
 0x482   :  { %v1128_v13 = vmul.f32 %v6065_v43, %v1127_v49  ;;  %v1146_v43 = vsub.f32 1.0, %v1145_v21  ;;  %vm1134_vm10 = vweird.f32 %v975_v48  ;;  %vm1149_vm12 = vweird.f32 %v6120_v34 }
 0x483   :  { %v1141_v23 = vor.u32 1.1754944e-38, %v1140_v7  ;;  %vm1139_vm13 = vcmp.eq.f32.partialorder %v1138_v3, 8.507059e+37  ;;  %vm1151_vm14 = vmor %vm1149_vm12, %vm1150_vm9 }
 0x484   :  { %4691 = vmatmul.msk.f32.vlgmr.msrb.gmra.mxu2 %vm548_vm6, %v1128_v13  ;;  %v1147_v18 = vmul.f32 %v6127_v24, %v1146_v43 }
 0x486   :  { %v1148_v19 = vadd.f32 %v6127_v24, %v1147_v18 }
 0x487   :  { %v5022_v58 = vpop.eup %5021 }
 0x488   :  { %v1130_v1 = vmul.f32 %v5022_v58, %v975_v48  ;;  %vm1135_vm8 = vweird.f32 %v5022_v58  ;;  %v1152_v9 = vsel %vm1151_vm14, %v6127_v24, %v1148_v19  ;;  %v1527_v24 = vld [vmem:[#allocation14 + $0x18] sm:$0xff] }
 0x489   :  { %vm1136_vm11 = vmor %vm1134_vm10, %vm1135_vm8  ;;  %v1157_v29 = vsel %vm1154_vm15, %v1156_v28, %v1152_v9 }
 0x48a   :  { %v1131_v22 = vsub.f32 1.0, %v1130_v1  ;;  %v1158_v32 = vmul.f32 %v6070_v50, %v1157_v29 }
 0x48b   :  { %v4876_v8 = vpop.permute.xlu0 %4875 }
 0x48c   :  { %v1132_v12 = vmul.f32 %v5022_v58, %v1131_v22  ;;  %v4878_v14 = vunpack.i.h.bf16 %v4876_v8  ;;  %v4877_v16 = vunpack.i.l.bf16 %v4876_v8  ;;  %v4947_v22 = vld [vmem:[%s7088_s9] ss:$0 sm:$0xff] }
 0x48e   :  { %v1133_v20 = vadd.f32 %v5022_v58, %v1132_v12  ;;  %1362 = vmatpush.msra.mxu0 %v4878_v14  ;;  %1388 = vmatpush.msrb.mxu1 %v4877_v16 }
 0x48f   :  { %4689 = vmatmul.msk.f32.vlgmr.msra.gmra.mxu0 %vm548_vm6, %v1098_v26  ;;  %4690 = vmatmul.msk.f32.vlgmr.msrb.gmra.mxu1 %vm548_vm6, %v1113_v17  ;;  %v5646_v26 = vmov 48.0  }
 0x490   :  { %v1137_v5 = vsel %vm1136_vm11, %v5022_v58, %v1133_v20  ;;  %1550 = vmatpush.msra.mxu1 %v1529_v42  ;;  %5023 = vrcp.f32 %v5646_v26  ;;  %v1673_v42 = vld [vmem:[#allocation20 + $0x20] sm:$0xff] }
 0x491   :  { %v1142_v27 = vsel %vm1139_vm13, %v1141_v23, %v1137_v5 }
 0x492   :  { %v1143_v25 = vmul.f32 %v6074_v61, %v1142_v27  ;;  %v1208_v61 = vpop.f32.mrf.mxu2  ;;  %1551 = vmatpush.msra.mxu1 %v1528_v44  ;;  %v1672_v44 = vld [vmem:[#allocation20 + $0x18] sm:$0xff] }
 0x494   :  { %4692 = vmatmul.msk.f32.vlgmr.msra.gmra.mxu3 %vm548_vm6, %v1143_v25  ;;  %1552 = vmatpush.msra.mxu1 %v1527_v24 }
 0x496   :  { %1553 = vmatpush.msra.mxu1 %v1526_v11  ;;  %v5024_v17 = vpop.eup %5023 }
 0x497   :  { %v1574_v19 = vmul.f32 48.0, %v5024_v17  ;;  %vm1578_vm5 = vweird.f32 %v5024_v17 }
 0x498   :  { %v1446_v30 = vpop.permute.xlu1 %1445  ;;  %1554 = vmatpush.msra.mxu1 %v1525_v46 }
 0x499   :  { %1466 = vmatpush.msrb.mxu0 %v1446_v30  ;;  %v1575_v20 = vsub.f32 1.0, %v1574_v19  ;;  %v4951_v19 = vld [vmem:[#allocation22] ss:$0 sm:$0xff] }
 0x49a   :  { %4693 = vmatmul.msk.f32.vlgmr.msrb.gmra.mxu0 %vm548_vm6, %v1158_v32  ;;  %1555 = vmatpush.msra.mxu1 %v1524_v45 }
 0x49b   :  { %v1576_v10 = vmul.f32 %v5024_v17, %v1575_v20 }
 0x49d   :  { %v1577_v23 = vadd.f32 %v5024_v17, %v1576_v10 }
 0x49f   :  { %v1234_v34 = vpop.f32.mrf.mxu3  ;;  %v6197_v60 = vsel %vm1578_vm5, %v5024_v17, %v1577_v23 }
 0x4a0   :  { %1473 = vrot.lane.b32.xlu2 %v1234_v34, %s5618_s4 }
 0x4c4   :  { %v1312_v37 = vpop.f32.mrf.mxu2 }
 0x4ce   :  { %v1338_v35 = vpop.f32.mrf.mxu3 }
 0x4cf   :  { %1489 = vrot.lane.b32.xlu0 %v1338_v35, %s5644_s13 }
 0x4f9   :  { %v1260_v36 = vpop.f32.mrf.mxu0  ;;  %v1286_v15 = vpop.f32.mrf.mxu1 }
 0x4fa   :  { %1475 = vrot.lane.b32.xlu0 %v1260_v36, %s5618_s4  ;;  %1481 = vrot.lane.b32.xlu1 %v1286_v15, %s5622_s23  ;;  %v1474_v47 = vpop.permute.xlu2 %1473  ;;  %v1631_v36 = vld [vmem:[#allocation17 + $0x18] sm:$0xff]  ;;  %v1630_v15 = vld [vmem:[#allocation17 + $0x10] sm:$0xff] }
 0x4fb   :  { %v1511_v49 = vsel %vm548_vm6, %v1182_v62, %v1474_v47  ;;  %v1633_v62 = vld [vmem:[#allocation17 + $0x28] sm:$0xff] }
 0x4fc   :  { %1654 = vmatpush.msra.mxu2 %v1633_v62 }
 0x507   :  { %v1416_v50 = vpop.f32.mrf.mxu2 }
 0x508   :  { %1499 = vrot.lane.b32.xlu0 %v1416_v50, %s5643_s24  ;;  %v1628_v50 = vld [vmem:[#allocation17] sm:$0xff] }
 0x50c   :  { %v1390_v38 = vpop.f32.mrf.mxu1  ;;  %v1364_v39 = vpop.f32.mrf.mxu0 }
 0x50d   :  { %1497 = vrot.lane.b32.xlu2 %v1390_v38, %s5643_s24 }
 0x515   :  { %1483 = vrot.lane.b32.xlu2 %v1312_v37, %s5622_s23  ;;  %v1629_v37 = vld [vmem:[#allocation17 + $0x8] sm:$0xff] }
 0x517   :  { %v1442_v40 = vpop.f32.mrf.mxu3  ;;  %v1468_v41 = vpop.f32.mrf.mxu0 }
 0x518   :  { %1505 = vrot.lane.b32.xlu1 %v1442_v40, %s5645_s17 }
 0x51d   :  { %1507 = vrot.lane.b32.xlu2 %v1468_v41, %s5645_s17  ;;  %v1674_v41 = vld [vmem:[#allocation20 + $0x28] sm:$0xff] }
 0x51e   :  { %1695 = vmatpush.msrb.mxu3 %v1674_v41  ;;  %v1773_v41 = vld [vmem:[#allocation13 + $0x90] sm:$0xff] }
 0x520   :  { %1491 = vrot.lane.b32.xlu1 %v1364_v39, %s5644_s13  ;;  %1696 = vmatpush.msrb.mxu3 %v1673_v42  ;;  %v1774_v42 = vld [vmem:[#allocation13 + $0x98] sm:$0xff] }
 0x522   :  { %1697 = vmatpush.msrb.mxu3 %v1672_v44  ;;  %v1771_v44 = vld [vmem:[#allocation13 + $0x80] sm:$0xff] }
 0x541   :  { %v1490_v51 = vpop.permute.xlu0 %1489 }
 0x567   :  { %v1498_v48 = vpop.permute.xlu2 %1497 }
 0x56c   :  { %v1482_v21 = vpop.permute.xlu1 %1481  ;;  %v1476_v56 = vpop.permute.xlu0 %1475 }
 0x56d   :  { %v1514_v52 = vsel %vm1513_vm2, %v1511_v49, %v1482_v21  ;;  %v1512_v43 = vsel %vm548_vm6, %v1208_v61, %v1476_v56  ;;  %v1632_v61 = vld [vmem:[#allocation17 + $0x20] sm:$0xff]  ;;  %v4949_v56 = vld [vmem:[#allocation16] ss:$0 sm:$0xff] }
 0x56e   :  { %v1517_v13 = vsel %vm1516_vm3, %v1514_v52, %v1490_v51  ;;  %1655 = vmatpush.msra.mxu2 %v1632_v61 }
 0x56f   :  { %v1484_v54 = vpop.permute.xlu2 %1483  ;;  %v1519_v53 = vsel %vm357_vm0, %v1517_v13, %v1498_v48  ;;  %v4948_v13 = vld [vmem:[%s7089_s10] ss:$0 sm:$0xff] }
 0x570   :  { %v1515_v58 = vsel %vm1513_vm2, %v1512_v43, %v1484_v54  ;;  %1656 = vmatpush.msra.mxu2 %v1631_v36 }
 0x572   :  { %1657 = vmatpush.msra.mxu2 %v1630_v15 }
 0x574   :  { %1658 = vmatpush.msra.mxu2 %v1629_v37 }
 0x576   :  { %1659 = vmatpush.msra.mxu2 %v1628_v50  ;;  %v1777_v50 = vld [vmem:[#allocation13 + $0xb0] sm:$0xff] }
 0x577   :  { %v1508_v0 = vpop.permute.xlu2 %1507  ;;  %1802 = vmatpush.msra.mxu0 %v1777_v50 }
 0x57a   :  { %v1500_v33 = vpop.permute.xlu0 %1499 }
 0x58a   :  { %v1506_v55 = vpop.permute.xlu1 %1505 }
 0x58b   :  { %v1522_v57 = vsel %vm1521_vm4, %v1519_v53, %v1506_v55 }
 0x58c   :  { %4694 = vmatmul.msk.f32.vlgmr.msra.gmra.mxu1 %vm387_vm1, %v1522_v57 }
 0x592   :  { %v1492_v59 = vpop.permute.xlu1 %1491 }
 0x593   :  { %v1518_v63 = vsel %vm1516_vm3, %v1515_v58, %v1492_v59 }
 0x594   :  { %v1520_v1 = vsel %vm357_vm0, %v1518_v63, %v1500_v33 }
 0x595   :  { %v1523_v18 = vsel %vm1521_vm4, %v1520_v1, %v1508_v0 }
 0x596   :  { %4695 = vmatmul.msk.f32.gmra.mxu1 %vm387_vm1, %v1523_v18 }
 0x609   :  { %v1557_v31 = vpop.f32.mrf.mxu1 }
 0x60a   :  { %v1558_v2 = vadd.f32 %v4947_v22, %v1557_v31  ;;  %v1671_v31 = vld [vmem:[#allocation20 + $0x10] sm:$0xff] }
 0x60b   :  { %1698 = vmatpush.msrb.mxu3 %v1671_v31 }
 0x60c   :  { %v1563_v3 = vadd.f32 %v1558_v2, %v5867_v4  ;;  %v1670_v2 = vld [vmem:[#allocation20 + $0x8] sm:$0xff] }
 0x60d   :  { %1699 = vmatpush.msrb.mxu3 %v1670_v2 }
 0x60e   :  { %v1567_v7 = vsel %vm387_vm1, %v1563_v3, 0.0 }
 0x60f   :  { %1568 = vadd.xlane.f32.xlu1 %v1567_v7  ;;  %v4950_v7 = vld [vmem:[#allocation19] ss:$0 sm:$0xff] }
 0x613   :  { %v1560_v8 = vpop.f32.mrf.mxu1 }
 0x614   :  { %v1561_v12 = vadd.f32 %v4947_v22, %v1560_v8 }
 0x616   :  { %v1564_v14 = vadd.f32 %v1561_v12, %v5873_v6 }
 0x618   :  { %v1570_v16 = vsel %vm387_vm1, %v1564_v14, 0.0 }
 0x619   :  { %1571 = vadd.xlane.f32.xlu0 %v1570_v16 }
 0x682   :  { %v1569_v5 = vpop.xlane.xlu1 %1568 }
 0x683   :  { %v1580_v27 = vmul.f32 %v6197_v60, %v1569_v5 }
 0x685   :  { %v1582_v9 = vsub.f32 %v1563_v3, %v1580_v27  ;;  %v1669_v3 = vld [vmem:[#allocation20] sm:$0xff] }
 0x686   :  { %1700 = vmatpush.msrb.mxu3 %v1669_v3 }
 0x687   :  { %v1584_v25 = vmul.f32 %v1582_v9, %v1582_v9 }
 0x689   :  { %v1586_v28 = vsel %vm387_vm1, %v1584_v25, 0.0 }
 0x68a   :  { %1587 = vadd.xlane.f32.xlu2 %v1586_v28 }
 0x68c   :  { %v1572_v29 = vpop.xlane.xlu0 %1571 }
 0x68d   :  { %v1581_v30 = vmul.f32 %v6197_v60, %v1572_v29 }
 0x68f   :  { %v1583_v32 = vsub.f32 %v1564_v14, %v1581_v30 }
 0x691   :  { %v1585_v34 = vmul.f32 %v1583_v32, %v1583_v32 }
 0x693   :  { %v1589_v35 = vsel %vm387_vm1, %v1585_v34, 0.0 }
 0x694   :  { %1590 = vadd.xlane.f32.xlu1 %v1589_v35 }
 0x6fd   :  { %v1588_v38 = vpop.xlane.xlu2 %1587 }
 0x6fe   :  { %v1592_v39 = vmul.f32 %v1588_v38, %v6197_v60  ;;  %v1778_v38 = vld [vmem:[#allocation13 + $0xb8] sm:$0xff] }
 0x6ff   :  { %1825 = vmatpush.msrb.mxu1 %v1778_v38 }
 0x700   :  { %v1594_v40 = vadd.f32 1e-05, %v1592_v39  ;;  %v1775_v39 = vld [vmem:[#allocation13 + $0xa0] sm:$0xff] }
 0x701   :  { %1803 = vmatpush.msra.mxu0 %v1775_v39 }
 0x702   :  { %5025 = vrsqrt.f32 %v1594_v40  ;;  %vm1602_vm8 = vweird.f32 %v1594_v40 }
 0x703   :  { %1804 = vmatpush.msra.mxu0 %v1773_v41 }
 0x705   :  { %1805 = vmatpush.msra.mxu0 %v1771_v44 }
 0x707   :  { %v1591_v24 = vpop.xlane.xlu1 %1590 }
 0x708   :  { %v5026_v11 = vpop.eup %5025  ;;  %v1593_v46 = vmul.f32 %v1591_v24, %v6197_v60  ;;  %v1772_v24 = vld [vmem:[#allocation13 + $0x88] sm:$0xff] }
 0x709   :  { %v1597_v45 = vmul.f32 %v5026_v11, %v1594_v40  ;;  %vm1603_vm7 = vweird.f32 %v5026_v11  ;;  %v1776_v40 = vld [vmem:[#allocation13 + $0xa8] sm:$0xff] }
 0x70a   :  { %v1595_v47 = vadd.f32 1e-05, %v1593_v46  ;;  %vm1604_vm9 = vmor %vm1602_vm8, %vm1603_vm7  ;;  %1826 = vmatpush.msrb.mxu1 %v1776_v40  ;;  %v1770_v46 = vld [vmem:[#allocation13 + $0x78] sm:$0xff] }
 0x70b   :  { %v1598_v48 = vmul.f32 %v5026_v11, %v1597_v45  ;;  %v1767_v45 = vld [vmem:[#allocation13 + $0x60] sm:$0xff] }
 0x70c   :  { %5027 = vrsqrt.f32 %v1595_v47  ;;  %vm1612_vm11 = vweird.f32 %v1595_v47  ;;  %1827 = vmatpush.msrb.mxu1 %v1774_v42 }
 0x70d   :  { %v1599_v21 = vmul.f32 0.5, %v1598_v48 }
 0x70e   :  { %1828 = vmatpush.msrb.mxu1 %v1772_v24 }
 0x70f   :  { %v1600_v49 = vsub.f32 1.5, %v1599_v21 }
 0x710   :  { %1829 = vmatpush.msrb.mxu1 %v1770_v46 }
 0x711   :  { %v1601_v51 = vmul.f32 %v5026_v11, %v1600_v49 }
 0x712   :  { %v5028_v52 = vpop.eup %5027 }
 0x713   :  { %v1605_v54 = vsel %vm1604_vm9, %v5026_v11, %v1601_v51  ;;  %v1607_v53 = vmul.f32 %v5028_v52, %v1595_v47  ;;  %vm1613_vm10 = vweird.f32 %v5028_v52  ;;  %v1769_v11 = vld [vmem:[#allocation13 + $0x70] sm:$0xff]  ;;  %v1768_v47 = vld [vmem:[#allocation13 + $0x68] sm:$0xff] }
 0x714   :  { %v1616_v55 = vmul.f32 %v1605_v54, %v1582_v9  ;;  %vm1614_vm12 = vmor %vm1612_vm11, %vm1613_vm10  ;;  %1806 = vmatpush.msra.mxu0 %v1769_v11  ;;  %1830 = vmatpush.msrb.mxu1 %v1768_v47 }
 0x715   :  { %v1608_v57 = vmul.f32 %v5028_v52, %v1607_v53 }
 0x716   :  { %v1621_v43 = vmul.f32 %v4948_v13, %v1616_v55  ;;  %1807 = vmatpush.msra.mxu0 %v1767_v45 }
 0x717   :  { %v1609_v58 = vmul.f32 0.5, %v1608_v57 }
 0x718   :  { %v1626_v59 = vadd.f32 %v4949_v56, %v1621_v43 }
 0x719   :  { %v1610_v33 = vsub.f32 1.5, %v1609_v58 }
 0x71a   :  { %4696 = vmatmul.msk.f32.vlgmr.msra.gmra.mxu2 %vm387_vm1, %v1626_v59 }
 0x71b   :  { %v1611_v63 = vmul.f32 %v5028_v52, %v1610_v33 }
 0x71d   :  { %v1615_v0 = vsel %vm1614_vm12, %v5028_v52, %v1611_v63 }
 0x71e   :  { %v1617_v1 = vmul.f32 %v1615_v0, %v1583_v32 }
 0x720   :  { %v1622_v18 = vmul.f32 %v4948_v13, %v1617_v1  ;;  %v4953_v1 = vld [vmem:[#allocation23] ss:$0 sm:$0xff] }
 0x722   :  { %v1627_v22 = vadd.f32 %v4949_v56, %v1622_v18 }
 0x724   :  { %4697 = vmatmul.msk.f32.gmra.mxu2 %vm387_vm1, %v1627_v22 }
 0x79d   :  { %v1661_v8 = vpop.f32.mrf.mxu2 }
 0x79e   :  { %v1662_v12 = vadd.f32 %v4950_v7, %v1661_v8 }
 0x7a0   :  { %v1667_v14 = vmax.f32 %v1662_v12, 0.0 }
 0x7a2   :  { %4698 = vmatmul.msk.f32.vlgmr.msrb.gmra.mxu3 %vm387_vm1, %v1667_v14 }
 0x7a7   :  { %v1664_v16 = vpop.f32.mrf.mxu2 }
 0x7a8   :  { %v1665_v26 = vadd.f32 %v4950_v7, %v1664_v16 }
 0x7aa   :  { %v1668_v17 = vmax.f32 %v1665_v26, 0.0  ;;  %v4700_v26 = vld [vmem:[%s7125_s28 + $0x2] sm:$0x3] }
 0x7ac   :  { %4699 = vmatmul.msk.f32.gmra.mxu3 %vm387_vm1, %v1668_v17  ;;  %v1782_v17 = vperm.slane %v4700_v26, 0 }
 0x825   :  { %v1702_v20 = vpop.f32.mrf.mxu3 }
 0x826   :  { %v1703_v10 = vadd.f32 %v4951_v19, %v1702_v20 }
 0x828   :  { %v1708_v23 = vadd.f32 %v1703_v10, %v1626_v59  ;;  %v4952_v59 = vld [vmem:[%s7095_s16] ss:$0 sm:$0xff] }
 0x82a   :  { %v1712_v5 = vsel %vm387_vm1, %v1708_v23, 0.0 }
 0x82b   :  { %1713 = vadd.xlane.f32.xlu0 %v1712_v5 }
 0x82f   :  { %v1705_v27 = vpop.f32.mrf.mxu3 }
 0x830   :  { %v1706_v9 = vadd.f32 %v4951_v19, %v1705_v27 }
 0x832   :  { %v1709_v25 = vadd.f32 %v1706_v9, %v1627_v22 }
 0x834   :  { %v1715_v28 = vsel %vm387_vm1, %v1709_v25, 0.0 }
 0x835   :  { %1716 = vadd.xlane.f32.xlu2 %v1715_v28 }
 0x89e   :  { %v1714_v29 = vpop.xlane.xlu0 %1713 }
 0x89f   :  { %v1718_v30 = vmul.f32 %v1714_v29, %v6197_v60 }
 0x8a1   :  { %v1720_v32 = vsub.f32 %v1708_v23, %v1718_v30 }
 0x8a3   :  { %v1722_v34 = vmul.f32 %v1720_v32, %v1720_v32 }
 0x8a5   :  { %v1724_v35 = vsel %vm387_vm1, %v1722_v34, 0.0 }
 0x8a6   :  { %1725 = vadd.xlane.f32.xlu1 %v1724_v35  ;;  %v1783_v35 = vperm.slane %v4700_v26, 1 }
 0x8a8   :  { %v1717_v62 = vpop.xlane.xlu2 %1716 }
 0x8a9   :  { %v1719_v61 = vmul.f32 %v1717_v62, %v6197_v60 }
 0x8ab   :  { %v6217_v36 = vsub.f32 %v1709_v25, %v1719_v61 }
 0x8ad   :  { %v1723_v15 = vmul.f32 %v6217_v36, %v6217_v36 }
 0x8af   :  { %v1727_v37 = vsel %vm387_vm1, %v1723_v15, 0.0 }
 0x8b0   :  { %1728 = vadd.xlane.f32.xlu0 %v1727_v37 }
 0x919   :  { %v1726_v48 = vpop.xlane.xlu1 %1725 }
 0x91a   :  { %v1730_v21 = vmul.f32 %v1726_v48, %v6197_v60 }
 0x91c   :  { %v1732_v49 = vadd.f32 1e-05, %v1730_v21 }
 0x91e   :  { %5029 = vrsqrt.f32 %v1732_v49  ;;  %vm1740_vm14 = vweird.f32 %v1732_v49 }
 0x923   :  { %v1729_v51 = vpop.xlane.xlu0 %1728 }
 0x924   :  { %v5030_v52 = vpop.eup %5029  ;;  %v1731_v13 = vmul.f32 %v1729_v51, %v6197_v60 }
 0x925   :  { %v1735_v54 = vmul.f32 %v5030_v52, %v1732_v49  ;;  %vm1741_vm13 = vweird.f32 %v5030_v52 }
 0x926   :  { %v1733_v53 = vadd.f32 1e-05, %v1731_v13  ;;  %vm1742_vm15 = vmor %vm1740_vm14, %vm1741_vm13 }
 0x927   :  { %v1736_v55 = vmul.f32 %v5030_v52, %v1735_v54 }
 0x928   :  { %5031 = vrsqrt.f32 %v1733_v53  ;;  %vm1750_vm7 = vweird.f32 %v1733_v53 }
 0x929   :  { %v1737_v56 = vmul.f32 0.5, %v1736_v55 }
 0x92b   :  { %v1738_v57 = vsub.f32 1.5, %v1737_v56 }
 0x92d   :  { %v1739_v43 = vmul.f32 %v5030_v52, %v1738_v57 }
 0x92e   :  { %v5032_v58 = vpop.eup %5031 }
 0x92f   :  { %v1743_v33 = vsel %vm1742_vm15, %v5030_v52, %v1739_v43  ;;  %v1745_v63 = vmul.f32 %v5032_v58, %v1733_v53  ;;  %vm1751_vm5 = vweird.f32 %v5032_v58 }
 0x930   :  { %v1754_v0 = vmul.f32 %v1743_v33, %v1720_v32  ;;  %vm1752_vm8 = vmor %vm1750_vm7, %vm1751_vm5 }
 0x931   :  { %v1746_v18 = vmul.f32 %v5032_v58, %v1745_v63 }
 0x932   :  { %v1759_v22 = vmul.f32 %v4952_v59, %v1754_v0 }
 0x933   :  { %v1747_v31 = vmul.f32 0.5, %v1746_v18 }
 0x934   :  { %v6227_v2 = vadd.f32 %v4953_v1, %v1759_v22 }
 0x935   :  { %v1748_v3 = vsub.f32 1.5, %v1747_v31 }
 0x936   :  { %4701 = vmatmul.msk.f32.vlgmr.msra.gmra.mxu0 %vm387_vm1, %v6227_v2  ;;  %4703 = vmatmul.msk.f32.vlgmr.msrb.gmra.mxu1 %vm387_vm1, %v6227_v2 }
 0x937   :  { %v1749_v7 = vmul.f32 %v5032_v58, %v1748_v3 }
 0x939   :  { %v1753_v8 = vsel %vm1752_vm8, %v5032_v58, %v1749_v7 }
 0x93a   :  { %v1755_v12 = vmul.f32 %v1753_v8, %v6217_v36 }
 0x93c   :  { %v1760_v14 = vmul.f32 %v4952_v59, %v1755_v12 }
 0x93e   :  { %v6234_v16 = vadd.f32 %v4953_v1, %v1760_v14 }
 0x940   :  { %4702 = vmatmul.msk.f32.gmra.mxu0 %vm387_vm1, %v6234_v16  ;;  %4704 = vmatmul.msk.f32.gmra.mxu1 %vm387_vm1, %v6234_v16 }
 0x9b3   :  { %v1809_v19 = vpop.f32.mrf.mxu0  ;;  %v1832_v29 = vpop.f32.mrf.mxu1 }
 0x9b4   :  { %v1810_v20 = vadd.f32 %v1809_v19, %v1782_v17  ;;  %v1833_v36 = vadd.f32 %v1832_v29, %v1783_v35 }
 0x9b6   :  { %1840 = vrot.lane.b32.xlu1 %v1810_v20, %s5639_s0  ;;  %1844 = vrot.lane.b32.xlu2 %v1810_v20, %s5641_s3 }
 0x9bd   :  { %v1812_v10 = vpop.f32.mrf.mxu0  ;;  %v1835_v34 = vpop.f32.mrf.mxu1 }
 0x9be   :  { %v6245_v23 = vadd.f32 %v1812_v10, %v1782_v17  ;;  %1848 = vrot.lane.b32.xlu2 %v1810_v20, %s5638_s30  ;;  %v1836_v61 = vadd.f32 %v1835_v34, %v1783_v35 }
 0x9c0   :  { %1850 = vrot.lane.b32.xlu1 %v6245_v23, %s5638_s30  ;;  %1842 = vrot.lane.b32.xlu0 %v6245_v23, %s5639_s0  ;;  %v4879_v15 = vpack.i.bf16 %v1836_v61, %v1833_v36 }
 0x9c6   :  { %1858 = vrot.lane.b32.xlu2 %v6245_v23, %s5640_s11 }
 0x9c8   :  { %1846 = vrot.lane.b32.xlu1 %v6245_v23, %s5641_s3  ;;  %1852 = vrot.lane.b32.xlu0 %v1810_v20, %s5642_s8 }
 0x9ce   :  { %1896 = vrot.lane.b32.xlu2 %v6245_v23, %s5637_s2 }
 0x9d0   :  { %1854 = vrot.lane.b32.xlu1 %v6245_v23, %s5642_s8  ;;  %1856 = vrot.lane.b32.xlu0 %v1810_v20, %s5640_s11 }
 0x9d8   :  { %1870 = vrot.lane.b32.xlu0 %v1810_v20, %s5637_s2 }
 0xa10   :  { %v6263_v5 = vpop.permute.xlu2 %1844 }
 0xa11   :  { %1974 = vrot.lane.b32.xlu0 %v6263_v5, %s5637_s2 }
 0xa18   :  { %v6267_v27 = vpop.permute.xlu2 %1848 }
 0xa20   :  { %v1859_v9 = vpop.permute.xlu2 %1858 }
 0xa28   :  { %v1841_v25 = vpop.permute.xlu1 %1840  ;;  %v1897_v28 = vpop.permute.xlu2 %1896 }
 0xa29   :  { %1922 = vrot.lane.b32.xlu2 %v1841_v25, %s5637_s2  ;;  %4707 = vmatpush.xpose.msk.msra.mxu3 %vm548_vm6, %v1897_v28  ;;  %v4889_v38 = vpack.i.bf16 %v1841_v25, %v1810_v20 }
 0xa2c   :  { %4708 = vmatmul.msk.f32.vlgmr.msra.gmra.mxu3 %vm548_vm6, %v6245_v23 }
 0xa31   :  { %2026 = vrot.lane.b32.xlu2 %v6267_v27, %s5637_s2 }
 0xa32   :  { %v6275_v30 = vpop.permute.xlu0 %1842  ;;  %v6279_v32 = vpop.permute.xlu1 %1850 }
 0xa33   :  { %1948 = vrot.lane.b32.xlu1 %v6275_v30, %s5637_s2 }
 0xa39   :  { %2156 = vrot.lane.b32.xlu2 %v1859_v9, %s5637_s2 }
 0xa3a   :  { %v1853_v62 = vpop.permute.xlu0 %1852  ;;  %v6285_v37 = vpop.permute.xlu1 %1846 }
 0xa3b   :  { %2052 = vrot.lane.b32.xlu1 %v6279_v32, %s5637_s2  ;;  %2078 = vrot.lane.b32.xlu0 %v1853_v62, %s5637_s2 }
 0xa41   :  { %4880 = vrot.lane.b32.xlu2 %v4879_v15, %s5642_s8 }
 0xa42   :  { %v1857_v50 = vpop.permute.xlu0 %1856  ;;  %v1855_v39 = vpop.permute.xlu1 %1854 }
 0xa43   :  { %2000 = vrot.lane.b32.xlu1 %v6285_v37, %s5637_s2  ;;  %2130 = vrot.lane.b32.xlu0 %v1857_v50, %s5637_s2 }
 0xa4a   :  { %v1871_v40 = vpop.permute.xlu0 %1870 }
 0xa4b   :  { %4890 = vrot.lane.b32.xlu1 %v4889_v38, %s5643_s24  ;;  %2104 = vrot.lane.b32.xlu0 %v1855_v39, %s5637_s2 }
 0xa4c   :  { %4705 = vmatpush.xpose.msk.msrb.mxu2 %vm548_vm6, %v1871_v40 }
 0xa4f   :  { %4706 = vmatmul.msk.f32.vlgmr.msrb.gmra.mxu2 %vm548_vm6, %v1810_v20 }
 0xa53   :  { %4885 = vrot.lane.b32.xlu0 %v4879_v15, %s5640_s11 }
 0xa83   :  { %v1923_v41 = vpop.permute.xlu2 %1922  ;;  %v1975_v42 = vpop.permute.xlu0 %1974 }
 0xa84   :  { %4709 = vmatpush.xpose.msk.msrb.mxu0 %vm548_vm6, %v1923_v41  ;;  %4713 = vmatpush.xpose.msk.msrb.mxu3 %vm548_vm6, %v1975_v42 }
 0xa87   :  { %4710 = vmatmul.msk.f32.vlgmr.msrb.gmra.mxu0 %vm548_vm6, %v1841_v25  ;;  %4714 = vmatmul.msk.f32.vlgmr.msrb.gmra.mxu3 %vm548_vm6, %v6263_v5 }
 0xa8b   :  { %v2027_v44 = vpop.permute.xlu2 %2026 }
 0xa8c   :  { %4717 = vmatpush.xpose.msk.msra.mxu1 %vm548_vm6, %v2027_v44 }
 0xa8f   :  { %4718 = vmatmul.msk.f32.vlgmr.msra.gmra.mxu1 %vm548_vm6, %v6267_v27 }
 0xa93   :  { %v2157_v45 = vpop.permute.xlu2 %2156 }
 0xa9b   :  { %v6345_v28 = vpop.permute.xlu2 %4880 }
 0xa9c   :  { %v4882_v44 = vunpack.i.l.bf16 %v6345_v28 }
 0xaa5   :  { %v1949_v24 = vpop.permute.xlu1 %1948 }
 0xaa6   :  { %4711 = vmatpush.xpose.msk.msra.mxu2 %vm548_vm6, %v1949_v24 }
 0xaa9   :  { %4712 = vmatmul.msk.f32.vlgmr.msra.gmra.mxu2 %vm548_vm6, %v6275_v30 }
 0xaad   :  { %v2053_v11 = vpop.permute.xlu1 %2052  ;;  %v2079_v46 = vpop.permute.xlu0 %2078 }
 0xaae   :  { %4719 = vmatpush.xpose.msk.msrb.mxu2 %vm548_vm6, %v2053_v11  ;;  %4721 = vmatpush.xpose.msk.msra.mxu3 %vm548_vm6, %v2079_v46  ;;  %v4899_v11 = vpack.i.bf16 %v4882_v44, %v6275_v30 }
 0xaaf   :  { %v1919_v55 = vpop.f32.mrf.mxu3 }
 0xab0   :  { %v2183_v56 = vmul.f32 0.35355338, %v1919_v55 }
 0xab1   :  { %4720 = vmatmul.msk.f32.vlgmr.msrb.gmra.mxu2 %vm548_vm6, %v6279_v32  ;;  %4722 = vmatmul.msk.f32.vlgmr.msra.gmra.mxu3 %vm548_vm6, %v1853_v62 }
 0xab2   :  { %4727 = vmatpush.xpose.msk.msra.mxu2 %vm548_vm6, %v2157_v45  ;;  %v2197_v57 = vsel %vm548_vm6, %v2183_v56, -inf }
 0xab5   :  { %v2001_v47 = vpop.permute.xlu1 %2000  ;;  %v2131_v48 = vpop.permute.xlu0 %2130 }
 0xab6   :  { %4715 = vmatpush.xpose.msk.msra.mxu0 %vm548_vm6, %v2001_v47  ;;  %4725 = vmatpush.xpose.msk.msrb.mxu1 %vm548_vm6, %v2131_v48 }
 0xab9   :  { %4716 = vmatmul.msk.f32.vlgmr.msra.gmra.mxu0 %vm548_vm6, %v6285_v37  ;;  %4726 = vmatmul.msk.f32.vlgmr.msrb.gmra.mxu1 %vm548_vm6, %v1857_v50 }
 0xaba   :  { %4728 = vmatmul.msk.f32.vlgmr.msra.gmra.mxu2 %vm548_vm6, %v1859_v9 }
 0xabd   :  { %v4891_v21 = vpop.permute.xlu1 %4890  ;;  %v2105_v49 = vpop.permute.xlu0 %2104 }
 0xabe   :  { %v4893_v51 = vunpack.i.h.bf16 %v4891_v21  ;;  %v4892_v52 = vunpack.i.l.bf16 %v4891_v21  ;;  %4723 = vmatpush.xpose.msk.msrb.mxu0 %vm548_vm6, %v2105_v49 }
 0xac0   :  { %2503 = vmatpush.msrb.mxu3 %v4892_v52  ;;  %2555 = vmatpush.msra.mxu1 %v4893_v51 }
 0xac1   :  { %4724 = vmatmul.msk.f32.vlgmr.msrb.gmra.mxu0 %vm548_vm6, %v1855_v39 }
 0xac5   :  { %v6370_v21 = vpop.permute.xlu0 %4885 }
 0xad2   :  { %v1893_v13 = vpop.f32.mrf.mxu2 }
 0xad3   :  { %v2182_v54 = vmul.f32 0.35355338, %v1893_v13 }
 0xad5   :  { %v2194_v53 = vsel %vm548_vm6, %v2182_v54, -inf }
 0xad6   :  { %2195 = vmax.xlane.f32.xlu2 %v2194_v53 }
 0xade   :  { %2198 = vmax.xlane.f32.xlu2 %v2197_v57 }
 0xb04   :  { %v1945_v43 = vpop.f32.mrf.mxu0 }
 0xb05   :  { %v2184_v58 = vmul.f32 0.35355338, %v1945_v43 }
 0xb07   :  { %v2200_v59 = vsel %vm548_vm6, %v2184_v58, -inf }
 0xb08   :  { %2201 = vmax.xlane.f32.xlu1 %v2200_v59 }
 0xb0a   :  { %v1997_v33 = vpop.f32.mrf.mxu3 }
 0xb0b   :  { %v2186_v63 = vmul.f32 0.35355338, %v1997_v33 }
 0xb0c   :  { %v2049_v0 = vpop.f32.mrf.mxu1 }
 0xb0d   :  { %v6324_v1 = vmul.f32 0.35355338, %v2049_v0  ;;  %v2206_v18 = vsel %vm548_vm6, %v2186_v63, -inf }
 0xb0e   :  { %2207 = vmax.xlane.f32.xlu0 %v2206_v18 }
 0xb0f   :  { %v2212_v22 = vsel %vm548_vm6, %v6324_v1, -inf }
 0xb10   :  { %2213 = vmax.xlane.f32.xlu2 %v2212_v22 }
 0xb2c   :  { %v1971_v17 = vpop.f32.mrf.mxu2 }
 0xb2d   :  { %v6341_v10 = vmul.f32 0.35355338, %v1971_v17 }
 0xb2f   :  { %v2203_v29 = vsel %vm548_vm6, %v6341_v10, -inf }
 0xb34   :  { %v2101_v31 = vpop.f32.mrf.mxu3  ;;  %v2075_v35 = vpop.f32.mrf.mxu2 }
 0xb35   :  { %v6329_v3 = vmul.f32 0.35355338, %v2101_v31  ;;  %v6351_v62 = vmul.f32 0.35355338, %v2075_v35 }
 0xb36   :  { %v2023_v7 = vpop.f32.mrf.mxu0  ;;  %v2153_v8 = vpop.f32.mrf.mxu1 }
 0xb37   :  { %v6331_v12 = vmul.f32 0.35355338, %v2023_v7  ;;  %v6333_v14 = vmul.f32 0.35355338, %v2153_v8  ;;  %v2218_v26 = vsel %vm548_vm6, %v6329_v3, -inf  ;;  %v2215_v36 = vsel %vm548_vm6, %v6351_v62, -inf }
 0xb38   :  { %2219 = vmax.xlane.f32.xlu0 %v2218_v26 }
 0xb39   :  { %v2209_v19 = vsel %vm548_vm6, %v6331_v12, -inf  ;;  %v2224_v20 = vsel %vm548_vm6, %v6333_v14, -inf }
 0xb3a   :  { %2210 = vmax.xlane.f32.xlu2 %v2209_v19  ;;  %2225 = vmax.xlane.f32.xlu1 %v2224_v20 }
 0xb3d   :  { %v2179_v45 = vpop.f32.mrf.mxu2 }
 0xb3e   :  { %v2127_v9 = vpop.f32.mrf.mxu0  ;;  %v6366_v47 = vmul.f32 0.35355338, %v2179_v45 }
 0xb3f   :  { %v6343_v25 = vmul.f32 0.35355338, %v2127_v9 }
 0xb40   :  { %v2227_v48 = vsel %vm548_vm6, %v6366_v47, -inf }
 0xb41   :  { %v2221_v34 = vsel %vm548_vm6, %v6343_v25, -inf }
 0xb42   :  { %2204 = vmax.xlane.f32.xlu1 %v2203_v29  ;;  %2222 = vmax.xlane.f32.xlu0 %v2221_v34 }
 0xb49   :  { %v2196_v61 = vpop.xlane.xlu2 %2195 }
 0xb4a   :  { %v2230_v15 = vsub.f32 %v2182_v54, %v2196_v61  ;;  %2216 = vmax.xlane.f32.xlu0 %v2215_v36 }
 0xb4c   :  { %v2242_v50 = vmul.f32 1.442695, %v2230_v15 }
 0xb4e   :  { %5033 = vpow2.f32 %v2242_v50 }
 0xb51   :  { %v2199_v38 = vpop.xlane.xlu2 %2198 }
 0xb52   :  { %v2231_v39 = vsub.f32 %v2183_v56, %v2199_v38  ;;  %v4887_v38 = vunpack.i.l.bf16 %v6370_v21 }
 0xb54   :  { %v6355_v40 = vpop.eup %5033  ;;  %v2244_v41 = vmul.f32 1.442695, %v2231_v39  ;;  %v4904_v39 = vpack.i.bf16 %v4887_v38, %v6245_v23  ;;  %v4888_v23 = vunpack.i.h.bf16 %v6370_v21 }
 0xb55   :  { %v2266_v42 = vsel %vm548_vm6, %v6355_v40, 0.0 }
 0xb56   :  { %5035 = vpow2.f32 %v2244_v41  ;;  %2267 = vadd.xlane.f32.xlu1 %v2266_v42 }
 0xb5c   :  { %v6360_v24 = vpop.eup %5035 }
 0xb5d   :  { %v2269_v46 = vsel %vm548_vm6, %v6360_v24, 0.0 }
 0xb5e   :  { %2270 = vadd.xlane.f32.xlu1 %v2269_v46  ;;  %4900 = vrot.lane.b32.xlu0 %v4899_v11, %s5643_s24  ;;  %v4894_v46 = vpack.i.bf16 %v6267_v27, %v6263_v5 }
 0xb66   :  { %2228 = vmax.xlane.f32.xlu1 %v2227_v48 }
 0xb7b   :  { %v2202_v49 = vpop.xlane.xlu1 %2201 }
 0xb7c   :  { %v2232_v51 = vsub.f32 %v2184_v58, %v2202_v49 }
 0xb7e   :  { %v2246_v52 = vmul.f32 1.442695, %v2232_v51 }
 0xb80   :  { %5037 = vpow2.f32 %v2246_v52 }
 0xb81   :  { %v2208_v30 = vpop.xlane.xlu0 %2207 }
 0xb82   :  { %v2234_v13 = vsub.f32 %v2186_v63, %v2208_v30 }
 0xb83   :  { %v2214_v54 = vpop.xlane.xlu2 %2213 }
 0xb84   :  { %v2250_v53 = vmul.f32 1.442695, %v2234_v13  ;;  %v2236_v55 = vsub.f32 %v6324_v1, %v2214_v54 }
 0xb86   :  { %v6373_v56 = vpop.eup %5037  ;;  %5039 = vpow2.f32 %v2250_v53  ;;  %v2254_v57 = vmul.f32 1.442695, %v2236_v55 }
 0xb87   :  { %v2272_v43 = vsel %vm548_vm6, %v6373_v56, 0.0 }
 0xb88   :  { %5041 = vpow2.f32 %v2254_v57  ;;  %2273 = vadd.xlane.f32.xlu1 %v2272_v43 }
 0xb8c   :  { %v6377_v59 = vpop.eup %5039 }
 0xb8d   :  { %v2278_v63 = vsel %vm548_vm6, %v6377_v59, 0.0 }
 0xb8e   :  { %v6379_v58 = vpop.eup %5041 }
 0xb8f   :  { %v2284_v33 = vsel %vm548_vm6, %v6379_v58, 0.0 }
 0xb90   :  { %2285 = vadd.xlane.f32.xlu2 %v2284_v33  ;;  %2279 = vadd.xlane.f32.xlu1 %v2278_v63 }
 0xbab   :  { %v2220_v0 = vpop.xlane.xlu0 %2219 }
 0xbac   :  { %v2238_v1 = vsub.f32 %v6329_v3, %v2220_v0 }
 0xbad   :  { %v2211_v18 = vpop.xlane.xlu2 %2210  ;;  %v2226_v22 = vpop.xlane.xlu1 %2225 }
 0xbae   :  { %v2258_v31 = vmul.f32 1.442695, %v2238_v1  ;;  %v2235_v7 = vsub.f32 %v6331_v12, %v2211_v18  ;;  %v2240_v8 = vsub.f32 %v6333_v14, %v2226_v22 }
 0xbb0   :  { %5043 = vpow2.f32 %v2258_v31  ;;  %v2252_v26 = vmul.f32 1.442695, %v2235_v7  ;;  %v2262_v17 = vmul.f32 1.442695, %v2240_v8 }
 0xbb2   :  { %5045 = vpow2.f32 %v2252_v26 }
 0xbb3   :  { %5047 = vpow2.f32 %v2262_v17 }
 0xbb5   :  { %v2205_v19 = vpop.xlane.xlu1 %2204  ;;  %v2223_v61 = vpop.xlane.xlu0 %2222 }
 0xbb6   :  { %v6388_v20 = vpop.eup %5043  ;;  %v2233_v9 = vsub.f32 %v6341_v10, %v2205_v19 }
 0xbb7   :  { %v2290_v3 = vsel %vm548_vm6, %v6388_v20, 0.0 }
 0xbb8   :  { %v6393_v29 = vpop.eup %5045  ;;  %v2248_v34 = vmul.f32 1.442695, %v2233_v9  ;;  %2291 = vadd.xlane.f32.xlu1 %v2290_v3 }
 0xbb9   :  { %v6395_v12 = vpop.eup %5047  ;;  %v2281_v14 = vsel %vm548_vm6, %v6393_v29, 0.0 }
 0xbba   :  { %5049 = vpow2.f32 %v2248_v34  ;;  %v2296_v35 = vsel %vm548_vm6, %v6395_v12, 0.0  ;;  %2282 = vadd.xlane.f32.xlu0 %v2281_v14 }
 0xbbb   :  { %2297 = vadd.xlane.f32.xlu2 %v2296_v35 }
 0xbbd   :  { %v2217_v15 = vpop.xlane.xlu0 %2216 }
 0xbbe   :  { %v2237_v55 = vsub.f32 %v6351_v62, %v2217_v15 }
 0xbc0   :  { %v6401_v10 = vpop.eup %5049  ;;  %v2256_v43 = vmul.f32 1.442695, %v2237_v55 }
 0xbc1   :  { %v2275_v36 = vsel %vm548_vm6, %v6401_v10, 0.0 }
 0xbc2   :  { %2276 = vadd.xlane.f32.xlu0 %v2275_v36  ;;  %v4883_v36 = vunpack.i.h.bf16 %v6345_v28 }
 0xbc9   :  { %v2268_v50 = vpop.xlane.xlu1 %2267 }
 0xbca   :  { %5051 = vrcp.f32 %v2268_v50  ;;  %v2313_v48 = vand.u32 2147483648, %v2268_v50  ;;  %v2311_v51 = vand.u32 2147483647, %v2268_v50  ;;  %vm2307_vm10 = vweird.f32 %v2268_v50 }
 0xbcc   :  { %v2314_v30 = vor.u32 1.1754944e-38, %v2313_v48  ;;  %vm2312_vm12 = vcmp.eq.f32.partialorder %v2311_v51, 8.507059e+37 }
 0xbd0   :  { %v5052_v41 = vpop.eup %5051  ;;  %v6407_v42 = vpop.permute.xlu0 %4900 }
 0xbd1   :  { %v2303_v44 = vmul.f32 %v5052_v41, %v2268_v50  ;;  %v4902_v11 = vunpack.i.l.bf16 %v6407_v42  ;;  %4905 = vrot.lane.b32.xlu1 %v4904_v39, %s5643_s24  ;;  %vm2308_vm9 = vweird.f32 %v5052_v41  ;;  %v6422_v54 = vpop.xlane.xlu1 %2270 }
 0xbd2   :  { %vm2309_vm11 = vmor %vm2307_vm10, %vm2308_vm9 }
 0xbd3   :  { %v2304_v45 = vsub.f32 1.0, %v2303_v44  ;;  %4895 = vrot.lane.b32.xlu2 %v4894_v46, %s5643_s24  ;;  %2581 = vmatpush.msrb.mxu2 %v4902_v11 }
 0xbd5   :  { %v2305_v49 = vmul.f32 %v5052_v41, %v2304_v45 }
 0xbd6   :  { %2664 = vrot.lane.b32.xlu0 %v6279_v32, %s5643_s24  ;;  %v2239_v32 = vsub.f32 %v6343_v25, %v2223_v61 }
 0xbd7   :  { %v2306_v52 = vadd.f32 %v5052_v41, %v2305_v49 }
 0xbd8   :  { %v2260_v21 = vmul.f32 1.442695, %v2239_v32 }
 0xbd9   :  { %v2310_v13 = vsel %vm2309_vm11, %v5052_v41, %v2306_v52  ;;  %2768 = vrot.lane.b32.xlu1 %v4888_v23, %s5643_s24  ;;  %v2229_v53 = vpop.xlane.xlu1 %2228 }
 0xbda   :  { %v2315_v5 = vsel %vm2312_vm12, %v2314_v30, %v2310_v13  ;;  %5053 = vpow2.f32 %v2260_v21 }
 0xbdb   :  { %v2316_v27 = vmul.f32 %v6355_v40, %v2315_v5 }
 0xbdd   :  { %4729 = vmatmul.msk.f32.vlgmr.msrb.gmra.mxu3 %vm548_vm6, %v2316_v27 }
 0xbde   :  { %2612 = vrot.lane.b32.xlu0 %v6285_v37, %s5643_s24  ;;  %v2241_v37 = vsub.f32 %v6366_v47, %v2229_v53 }
 0xbe0   :  { %v6426_v57 = vpop.eup %5053  ;;  %v2264_v0 = vmul.f32 1.442695, %v2241_v37 }
 0xbe1   :  { %v2293_v40 = vsel %vm548_vm6, %v6426_v57, 0.0 }
 0xbfb   :  { %v2274_v33 = vpop.xlane.xlu1 %2273 }
 0xbfc   :  { %5055 = vrcp.f32 %v2274_v33  ;;  %2294 = vadd.xlane.f32.xlu2 %v2293_v40  ;;  %v2343_v62 = vand.u32 2147483648, %v2274_v33  ;;  %v2341_v31 = vand.u32 2147483647, %v2274_v33  ;;  %vm2337_vm14 = vweird.f32 %v2274_v33 }
 0xbfd   :  { %5057 = vpow2.f32 %v2256_v43 }
 0xbfe   :  { %5059 = vpow2.f32 %v2264_v0  ;;  %v2344_v26 = vor.u32 1.1754944e-38, %v2343_v62  ;;  %vm2342_vm5 = vcmp.eq.f32.partialorder %v2341_v31, 8.507059e+37 }
 0xc02   :  { %v5056_v63 = vpop.eup %5055 }
 0xc03   :  { %v2333_v25 = vmul.f32 %v5056_v63, %v2274_v33  ;;  %v6431_v1 = vpop.eup %5057  ;;  %vm2338_vm13 = vweird.f32 %v5056_v63  ;;  %v2286_v34 = vpop.xlane.xlu2 %2285 }
 0xc04   :  { %v2287_v7 = vsel %vm548_vm6, %v6431_v1, 0.0  ;;  %vm2339_vm15 = vmor %vm2337_vm14, %vm2338_vm13  ;;  %v6435_v17 = vpop.eup %5059  ;;  %v2280_v14 = vpop.xlane.xlu1 %2279  ;;  %5061 = vrcp.f32 %v2286_v34  ;;  %vm2397_vm9 = vweird.f32 %v2286_v34  ;;  %v2403_v51 = vand.u32 2147483648, %v2286_v34 }
 0xc05   :  { %v2334_v18 = vsub.f32 1.0, %v2333_v25  ;;  %v2299_v3 = vsel %vm548_vm6, %v6435_v17, 0.0  ;;  %5063 = vrcp.f32 %v2280_v14  ;;  %v2373_v23 = vand.u32 2147483648, %v2280_v14 }
 0xc06   :  { %5065 = vrcp.f32 %v6422_v54  ;;  %v2401_v30 = vand.u32 2147483647, %v2286_v34  ;;  %vm2367_vm11 = vweird.f32 %v2280_v14  ;;  %v2371_v13 = vand.u32 2147483647, %v2280_v14 }
 0xc07   :  { %v2335_v22 = vmul.f32 %v5056_v63, %v2334_v18  ;;  %v2404_v53 = vor.u32 1.1754944e-38, %v2403_v51  ;;  %v2374_v55 = vor.u32 1.1754944e-38, %v2373_v23 }
 0xc08   :  { %2288 = vadd.xlane.f32.xlu0 %v2287_v7  ;;  %vm2402_vm13 = vcmp.eq.f32.partialorder %v2401_v30, 8.507059e+37  ;;  %vm2372_vm14 = vcmp.eq.f32.partialorder %v2371_v13, 8.507059e+37 }
 0xc09   :  { %v2336_v8 = vadd.f32 %v5056_v63, %v2335_v22 }
 0xc0a   :  { %v5062_v35 = vpop.eup %5061 }
 0xc0b   :  { %v2340_v47 = vsel %vm2339_vm15, %v5056_v63, %v2336_v8  ;;  %v5064_v61 = vpop.eup %5063  ;;  %v2393_v15 = vmul.f32 %v5062_v35, %v2286_v34  ;;  %vm2398_vm7 = vweird.f32 %v5062_v35  ;;  %v4903_v34 = vunpack.i.h.bf16 %v6407_v42 }
 0xc0c   :  { %v2345_v19 = vsel %vm2342_vm5, %v2344_v26, %v2340_v47  ;;  %v2363_v50 = vmul.f32 %v5064_v61, %v2280_v14  ;;  %v6444_v44 = vpop.eup %5065  ;;  %vm2368_vm8 = vweird.f32 %v5064_v61  ;;  %vm6456_vm10 = vmor %vm2397_vm9, %vm2398_vm7  ;;  %vm2322_vm5 = vweird.f32 %v6422_v54 }
 0xc0d   :  { %v2346_v9 = vmul.f32 %v6373_v56, %v2345_v19  ;;  %v2394_v56 = vsub.f32 1.0, %v2393_v15  ;;  %v2318_v28 = vmul.f32 %v6444_v44, %v6422_v54  ;;  %vm2369_vm12 = vmor %vm2367_vm11, %vm2368_vm8  ;;  %vm2323_vm8 = vweird.f32 %v6444_v44 }
 0xc0e   :  { %v2364_v38 = vsub.f32 1.0, %v2363_v50 }
 0xc0f   :  { %4731 = vmatmul.msk.f32.vlgmr.msra.gmra.mxu1 %vm548_vm6, %v2346_v9  ;;  %v2395_v39 = vmul.f32 %v5062_v35, %v2394_v56  ;;  %v2319_v27 = vsub.f32 1.0, %v2318_v28  ;;  %v2328_v56 = vand.u32 2147483648, %v6422_v54 }
 0xc10   :  { %2300 = vadd.xlane.f32.xlu0 %v2299_v3  ;;  %v2365_v41 = vmul.f32 %v5064_v61, %v2364_v38 }
 0xc11   :  { %v2396_v45 = vadd.f32 %v5062_v35, %v2395_v39  ;;  %v2320_v25 = vmul.f32 %v6444_v44, %v2319_v27  ;;  %v2329_v30 = vor.u32 1.1754944e-38, %v2328_v56 }
 0xc12   :  { %v2366_v48 = vadd.f32 %v5064_v61, %v2365_v41 }
 0xc13   :  { %v2400_v32 = vsel %vm6456_vm10, %v5062_v35, %v2396_v45  ;;  %v2326_v35 = vand.u32 2147483647, %v6422_v54  ;;  %v2321_v42 = vadd.f32 %v6444_v44, %v2320_v25 }
 0xc14   :  { %v2370_v21 = vsel %vm2369_vm12, %v5064_v61, %v2366_v48  ;;  %v2405_v40 = vsel %vm2402_vm13, %v2404_v53, %v2400_v32  ;;  %vm6504_vm12 = vmor %vm2322_vm5, %vm2323_vm8 }
 0xc15   :  { %v2375_v37 = vsel %vm2372_vm14, %v2374_v55, %v2370_v21  ;;  %v2406_v3 = vmul.f32 %v6379_v58, %v2405_v40  ;;  %v2325_v54 = vsel %vm6504_vm12, %v6444_v44, %v2321_v42 }
 0xc16   :  { %v2376_v9 = vmul.f32 %v6377_v59, %v2375_v37 }
 0xc24   :  { %2716 = vrot.lane.b32.xlu0 %v4883_v36, %s5643_s24 }
 0xc2b   :  { %v6446_v11 = vpop.xlane.xlu1 %2291 }
 0xc2c   :  { %5067 = vrcp.f32 %v6446_v11  ;;  %v2433_v18 = vand.u32 2147483648, %v6446_v11  ;;  %v2431_v47 = vand.u32 2147483647, %v6446_v11  ;;  %vm2427_vm7 = vweird.f32 %v6446_v11 }
 0xc2d   :  { %v6449_v46 = vpop.xlane.xlu0 %2282 }
 0xc2e   :  { %v6453_v49 = vpop.xlane.xlu2 %2297  ;;  %v2434_v15 = vor.u32 1.1754944e-38, %v2433_v18  ;;  %vm2432_vm11 = vcmp.eq.f32.partialorder %v2431_v47, 8.507059e+37  ;;  %vm2382_vm12 = vweird.f32 %v6449_v46 }
 0xc2f   :  { %5069 = vrcp.f32 %v6453_v49  ;;  %v2463_v39 = vand.u32 2147483648, %v6453_v49  ;;  %vm2457_vm13 = vweird.f32 %v6453_v49  ;;  %v2461_v28 = vand.u32 2147483647, %v6453_v49 }
 0xc30   :  { %5071 = vrcp.f32 %v6449_v46 }
 0xc31   :  { %v2464_v13 = vor.u32 1.1754944e-38, %v2463_v39  ;;  %vm2462_vm5 = vcmp.eq.f32.partialorder %v2461_v28, 8.507059e+37 }
 0xc32   :  { %v5068_v5 = vpop.eup %5067 }
 0xc33   :  { %v2423_v43 = vmul.f32 %v5068_v5, %v6446_v11  ;;  %vm2428_vm15 = vweird.f32 %v5068_v5 }
 0xc34   :  { %vm6484_vm9 = vmor %vm2427_vm7, %vm2428_vm15  ;;  %vm2327_vm15 = vcmp.eq.f32.partialorder %v2326_v35, 8.507059e+37 }
 0xc35   :  { %v6464_v33 = vpop.eup %5069  ;;  %v2424_v63 = vsub.f32 1.0, %v2423_v43  ;;  %v6466_v0 = vpop.xlane.xlu0 %2276  ;;  %v2330_v21 = vsel %vm2327_vm15, %v2329_v30, %v2325_v54 }
 0xc36   :  { %v2453_v62 = vmul.f32 %v6464_v33, %v6453_v49  ;;  %v4896_v22 = vpop.permute.xlu2 %4895  ;;  %5073 = vrcp.f32 %v6466_v0  ;;  %v6473_v31 = vpop.eup %5071  ;;  %vm2458_vm10 = vweird.f32 %v6464_v33  ;;  %v2358_v49 = vand.u32 2147483648, %v6466_v0 }
 0xc37   :  { %v2425_v7 = vmul.f32 %v5068_v5, %v2424_v63  ;;  %v4898_v8 = vunpack.i.h.bf16 %v4896_v22  ;;  %v4897_v26 = vunpack.i.l.bf16 %v4896_v22  ;;  %v2378_v58 = vmul.f32 %v6473_v31, %v6449_v46  ;;  %vm6511_vm14 = vmor %vm2457_vm13, %vm2458_vm10 }
 0xc38   :  { %v2454_v19 = vsub.f32 1.0, %v2453_v62  ;;  %v2356_v32 = vand.u32 2147483647, %v6466_v0  ;;  %vm2352_vm8 = vweird.f32 %v6466_v0  ;;  %v2331_v63 = vmul.f32 %v6360_v24, %v2330_v21 }
 0xc39   :  { %v2426_v14 = vadd.f32 %v5068_v5, %v2425_v7  ;;  %2607 = vmatpush.msra.mxu3 %v4897_v26  ;;  %2659 = vmatpush.msrb.mxu1 %v4898_v8  ;;  %v2379_v51 = vsub.f32 1.0, %v2378_v58  ;;  %v2386_v24 = vand.u32 2147483647, %v6449_v46 }
 0xc3a   :  { %v2455_v59 = vmul.f32 %v6464_v33, %v2454_v19  ;;  %4733 = vmatmul.msk.f32.vlgmr.msra.gmra.mxu3 %vm548_vm6, %v2376_v9  ;;  %4735 = vmatmul.msk.f32.vlgmr.msrb.gmra.mxu1 %vm548_vm6, %v2406_v3  ;;  %vm2357_vm10 = vcmp.eq.f32.partialorder %v2356_v32, 8.507059e+37 }
 0xc3b   :  { %v2430_v36 = vsel %vm6484_vm9, %v5068_v5, %v2426_v14  ;;  %2711 = vmatpush.msrb.mxu3 %v4903_v34  ;;  %v2380_v44 = vmul.f32 %v6473_v31, %v2379_v51 }
 0xc3c   :  { %v5074_v50 = vpop.eup %5073  ;;  %v2456_v38 = vadd.f32 %v6464_v33, %v2455_v59  ;;  %v2435_v11 = vsel %vm2432_vm11, %v2434_v15, %v2430_v36  ;;  %vm2383_vm11 = vweird.f32 %v6473_v31 }
 0xc3d   :  { %v2348_v45 = vmul.f32 %v5074_v50, %v6466_v0  ;;  %v2436_v5 = vmul.f32 %v6388_v20, %v2435_v11  ;;  %vm2353_vm7 = vweird.f32 %v5074_v50  ;;  %v2381_v18 = vadd.f32 %v6473_v31, %v2380_v44  ;;  %vm2384_vm13 = vmor %vm2382_vm12, %vm2383_vm11 }
 0xc3e   :  { %v2460_v23 = vsel %vm6511_vm14, %v6464_v33, %v2456_v38  ;;  %vm2354_vm9 = vmor %vm2352_vm8, %vm2353_vm7  ;;  %v2359_v33 = vor.u32 1.1754944e-38, %v2358_v49  ;;  %v2388_v0 = vand.u32 2147483648, %v6449_v46  ;;  %vm2387_vm14 = vcmp.eq.f32.partialorder %v2386_v24, 8.507059e+37 }
 0xc3f   :  { %v2349_v52 = vsub.f32 1.0, %v2348_v45  ;;  %v2465_v53 = vsel %vm2462_vm5, %v2464_v13, %v2460_v23  ;;  %v2385_v7 = vsel %vm2384_vm13, %v6473_v31, %v2381_v18  ;;  %v2849_v18 = vld [vmem:[#allocation14 + $0x50] sm:$0xff] }
 0xc40   :  { %v2466_v25 = vmul.f32 %v6395_v12, %v2465_v53  ;;  %v2389_v8 = vor.u32 1.1754944e-38, %v2388_v0  ;;  %v2848_v0 = vld [vmem:[#allocation14 + $0x48] sm:$0xff] }
 0xc41   :  { %v2350_v27 = vmul.f32 %v5074_v50, %v2349_v52 }
 0xc42   :  { %4737 = vmatmul.msk.f32.vlgmr.msrb.gmra.mxu3 %vm548_vm6, %v2436_v5  ;;  %v2390_v47 = vsel %vm2387_vm14, %v2389_v8, %v2385_v7  ;;  %v2845_v8 = vld [vmem:[#allocation14 + $0x30] sm:$0xff] }
 0xc43   :  { %v2351_v55 = vadd.f32 %v5074_v50, %v2350_v27  ;;  %v4906_v43 = vpop.permute.xlu1 %4905  ;;  %v2391_v9 = vmul.f32 %v6393_v29, %v2390_v47 }
 0xc44   :  { %v4908_v40 = vunpack.i.h.bf16 %v4906_v43  ;;  %v4907_v37 = vunpack.i.l.bf16 %v4906_v43 }
 0xc45   :  { %v2355_v20 = vsel %vm2354_vm9, %v5074_v50, %v2351_v55 }
 0xc46   :  { %v2360_v62 = vsel %vm2357_vm10, %v2359_v33, %v2355_v20  ;;  %2529 = vmatpush.msra.mxu0 %v4907_v37  ;;  %2763 = vmatpush.msra.mxu1 %v4908_v40 }
 0xc47   :  { %4730 = vmatmul.msk.f32.vlgmr.msra.gmra.mxu0 %vm548_vm6, %v2331_v63  ;;  %4739 = vmatmul.msk.f32.vlgmr.msra.gmra.mxu1 %vm548_vm6, %v2466_v25  ;;  %v2361_v22 = vmul.f32 %v6401_v10, %v2360_v62  ;;  %v2850_v25 = vld [vmem:[#allocation14 + $0x58] sm:$0xff] }
 0xc48   :  { %v2665_v12 = vpop.permute.xlu0 %2664  ;;  %2872 = vmatpush.msra.mxu3 %v2850_v25 }
 0xc49   :  { %4732 = vmatmul.msk.f32.vlgmr.msrb.gmra.mxu2 %vm548_vm6, %v2361_v22  ;;  %v2847_v22 = vld [vmem:[#allocation14 + $0x40] sm:$0xff] }
 0xc4a   :  { %2685 = vmatpush.msra.mxu2 %v2665_v12  ;;  %2873 = vmatpush.msra.mxu3 %v2849_v18  ;;  %v2846_v12 = vld [vmem:[#allocation14 + $0x38] sm:$0xff] }
 0xc4b   :  { %v2769_v26 = vpop.permute.xlu1 %2768 }
 0xc4c   :  { %2789 = vmatpush.msrb.mxu2 %v2769_v26  ;;  %2874 = vmatpush.msra.mxu3 %v2848_v0 }
 0xc4e   :  { %2875 = vmatpush.msra.mxu3 %v2847_v22  ;;  %v4955_v22 = vld [vmem:[%s7089_s10 + $0x1] ss:$0 sm:$0xff] }
 0xc50   :  { %v2613_v19 = vpop.permute.xlu0 %2612  ;;  %2876 = vmatpush.msra.mxu3 %v2846_v12 }
 0xc51   :  { %2633 = vmatpush.msrb.mxu0 %v2613_v19 }
 0xc52   :  { %4734 = vmatmul.msk.f32.vlgmr.msrb.gmra.mxu0 %vm548_vm6, %v2391_v9  ;;  %2877 = vmatpush.msra.mxu3 %v2845_v8 }
 0xc60   :  { %v2505_v43 = vpop.f32.mrf.mxu3 }
 0xc6f   :  { %v2295_v10 = vpop.xlane.xlu2 %2294 }
 0xc70   :  { %5075 = vrcp.f32 %v2295_v10  ;;  %v2448_v45 = vand.u32 2147483648, %v2295_v10  ;;  %vm2442_vm10 = vweird.f32 %v2295_v10  ;;  %v2446_v54 = vand.u32 2147483647, %v2295_v10 }
 0xc72   :  { %v2449_v49 = vor.u32 1.1754944e-38, %v2448_v45  ;;  %vm2447_vm14 = vcmp.eq.f32.partialorder %v2446_v54, 8.507059e+37 }
 0xc76   :  { %v5076_v3 = vpop.eup %5075 }
 0xc77   :  { %v2438_v34 = vmul.f32 %v5076_v3, %v2295_v10  ;;  %vm2443_vm9 = vweird.f32 %v5076_v3 }
 0xc78   :  { %vm2444_vm11 = vmor %vm2442_vm10, %vm2443_vm9 }
 0xc79   :  { %v2439_v61 = vsub.f32 1.0, %v2438_v34 }
 0xc7b   :  { %v2289_v46 = vpop.xlane.xlu0 %2288  ;;  %v2440_v29 = vmul.f32 %v5076_v3, %v2439_v61 }
 0xc7c   :  { %5077 = vrcp.f32 %v2289_v46  ;;  %v2418_v58 = vand.u32 2147483648, %v2289_v46  ;;  %v2416_v36 = vand.u32 2147483647, %v2289_v46  ;;  %vm2412_vm5 = vweird.f32 %v2289_v46 }
 0xc7d   :  { %v2441_v41 = vadd.f32 %v5076_v3, %v2440_v29 }
 0xc7e   :  { %v2419_v56 = vor.u32 1.1754944e-38, %v2418_v58  ;;  %vm2417_vm8 = vcmp.eq.f32.partialorder %v2416_v36, 8.507059e+37 }
 0xc7f   :  { %v2445_v13 = vsel %vm2444_vm11, %v5076_v3, %v2441_v41 }
 0xc80   :  { %v2450_v32 = vsel %vm2447_vm14, %v2449_v49, %v2445_v13 }
 0xc81   :  { %v2451_v55 = vmul.f32 %v6426_v57, %v2450_v32 }
 0xc82   :  { %v5078_v14 = vpop.eup %5077 }
 0xc83   :  { %v2408_v31 = vmul.f32 %v5078_v14, %v2289_v46  ;;  %v2301_v35 = vpop.xlane.xlu0 %2300  ;;  %vm2413_vm15 = vweird.f32 %v5078_v14 }
 0xc84   :  { %5079 = vrcp.f32 %v2301_v35  ;;  %vm2414_vm7 = vmor %vm2412_vm5, %vm2413_vm15  ;;  %v2478_v23 = vand.u32 2147483648, %v2301_v35  ;;  %v2476_v30 = vand.u32 2147483647, %v2301_v35  ;;  %vm2472_vm13 = vweird.f32 %v2301_v35 }
 0xc85   :  { %v2409_v59 = vsub.f32 1.0, %v2408_v31 }
 0xc86   :  { %v2479_v27 = vor.u32 1.1754944e-38, %v2478_v23  ;;  %vm2477_vm5 = vcmp.eq.f32.partialorder %v2476_v30, 8.507059e+37 }
 0xc87   :  { %v2410_v42 = vmul.f32 %v5078_v14, %v2409_v59 }
 0xc89   :  { %v2411_v15 = vadd.f32 %v5078_v14, %v2410_v42 }
 0xc8a   :  { %v5080_v50 = vpop.eup %5079 }
 0xc8b   :  { %v2415_v38 = vsel %vm2414_vm7, %v5078_v14, %v2411_v15  ;;  %v2468_v39 = vmul.f32 %v5080_v50, %v2301_v35  ;;  %vm2473_vm12 = vweird.f32 %v5080_v50 }
 0xc8c   :  { %v2420_v11 = vsel %vm2417_vm8, %v2419_v56, %v2415_v38  ;;  %v2557_v28 = vpop.f32.mrf.mxu1  ;;  %vm2474_vm15 = vmor %vm2472_vm13, %vm2473_vm12  ;;  %v4954_v38 = vld [vmem:[%s7088_s9 + $0x1] ss:$0 sm:$0xff] }
 0xc8d   :  { %v2469_v48 = vsub.f32 1.0, %v2468_v39  ;;  %2796 = vrot.lane.b32.xlu1 %v2557_v28, %s5618_s4  ;;  %v2421_v51 = vmul.f32 %v6431_v1, %v2420_v11 }
 0xc8f   :  { %v2470_v52 = vmul.f32 %v5080_v50, %v2469_v48  ;;  %4736 = vmatmul.msk.f32.vlgmr.msra.gmra.mxu2 %vm548_vm6, %v2421_v51 }
 0xc91   :  { %v2471_v5 = vadd.f32 %v5080_v50, %v2470_v52 }
 0xc93   :  { %v2475_v21 = vsel %vm2474_vm15, %v5080_v50, %v2471_v5 }
 0xc94   :  { %v2480_v1 = vsel %vm2477_vm5, %v2479_v27, %v2475_v21 }
 0xc95   :  { %v2481_v53 = vmul.f32 %v6435_v17, %v2480_v1 }
 0xc96   :  { %v2717_v44 = vpop.permute.xlu0 %2716 }
 0xc97   :  { %2737 = vmatpush.msra.mxu0 %v2717_v44  ;;  %4740 = vmatmul.msk.f32.vlgmr.msrb.gmra.mxu2 %vm548_vm6, %v2481_v53  ;;  %v2951_v53 = vld [vmem:[#allocation17 + $0x58] sm:$0xff]  ;;  %v2950_v44 = vld [vmem:[#allocation17 + $0x50] sm:$0xff] }
 0xc98   :  { %4738 = vmatmul.msk.f32.vlgmr.msra.gmra.mxu0 %vm548_vm6, %v2451_v55  ;;  %v2949_v55 = vld [vmem:[#allocation17 + $0x48] sm:$0xff] }
 0xc99   :  { %2973 = vmatpush.msrb.mxu0 %v2951_v53 }
 0xc9b   :  { %2974 = vmatpush.msrb.mxu0 %v2950_v44 }
 0xc9d   :  { %2975 = vmatpush.msrb.mxu0 %v2949_v55 }
 0xcb7   :  { %v2661_v33 = vpop.f32.mrf.mxu1 }
 0xcb8   :  { %2812 = vrot.lane.b32.xlu2 %v2661_v33, %s5644_s13  ;;  %v2947_v33 = vld [vmem:[#allocation17 + $0x38] sm:$0xff] }
 0xcbd   :  { %v2609_v40 = vpop.f32.mrf.mxu3 }
 0xcbe   :  { %2804 = vrot.lane.b32.xlu0 %v2609_v40, %s5622_s23  ;;  %v2946_v40 = vld [vmem:[#allocation17 + $0x30] sm:$0xff] }
 0xcc4   :  { %v2765_v37 = vpop.f32.mrf.mxu1  ;;  %v2531_v17 = vpop.f32.mrf.mxu0 }
 0xcc5   :  { %v2713_v20 = vpop.f32.mrf.mxu3 }
 0xcc6   :  { %2820 = vrot.lane.b32.xlu1 %v2713_v20, %s5643_s24  ;;  %2828 = vrot.lane.b32.xlu0 %v2765_v37, %s5645_s17 }
 0xccc   :  { %v2583_v57 = vpop.f32.mrf.mxu2 }
 0xcce   :  { %2798 = vrot.lane.b32.xlu1 %v2583_v57, %s5618_s4 }
 0xccf   :  { %v2635_v63 = vpop.f32.mrf.mxu0 }
 0xcd0   :  { %2806 = vrot.lane.b32.xlu0 %v2635_v63, %s5622_s23 }
 0xcff   :  { %v2797_v26 = vpop.permute.xlu1 %2796 }
 0xd00   :  { %v2834_v19 = vsel %vm548_vm6, %v2505_v43, %v2797_v26  ;;  %v2948_v43 = vld [vmem:[#allocation17 + $0x40] sm:$0xff] }
 0xd01   :  { %2976 = vmatpush.msrb.mxu0 %v2948_v43 }
 0xd03   :  { %2977 = vmatpush.msrb.mxu0 %v2947_v33 }
 0xd05   :  { %2978 = vmatpush.msrb.mxu0 %v2946_v40 }
 0xd12   :  { %v2687_v62 = vpop.f32.mrf.mxu2  ;;  %v2813_v10 = vpop.permute.xlu2 %2812 }
 0xd13   :  { %2814 = vrot.lane.b32.xlu1 %v2687_v62, %s5644_s13 }
 0xd15   :  { %v2739_v24 = vpop.f32.mrf.mxu0 }
 0xd16   :  { %2822 = vrot.lane.b32.xlu0 %v2739_v24, %s5643_s24 }
 0xd1a   :  { %v2791_v7 = vpop.f32.mrf.mxu2 }
 0xd1b   :  { %2830 = vrot.lane.b32.xlu2 %v2791_v7, %s5645_s17  ;;  %v4956_v7 = vld [vmem:[#allocation16 + $0x1] ss:$0 sm:$0xff] }
 0xd30   :  { %v2805_v47 = vpop.permute.xlu0 %2804 }
 0xd31   :  { %v2836_v9 = vsel %vm1513_vm2, %v2834_v19, %v2805_v47  ;;  %v2994_v47 = vld [vmem:[#allocation20 + $0x58] sm:$0xff]  ;;  %v2993_v19 = vld [vmem:[#allocation20 + $0x50] sm:$0xff] }
 0xd32   :  { %v2838_v46 = vsel %vm1516_vm3, %v2836_v9, %v2813_v10  ;;  %3016 = vmatpush.msra.mxu2 %v2994_v47  ;;  %v2992_v9 = vld [vmem:[#allocation20 + $0x48] sm:$0xff] }
 0xd34   :  { %3017 = vmatpush.msra.mxu2 %v2993_v19 }
 0xd36   :  { %3018 = vmatpush.msra.mxu2 %v2992_v9 }
 0xd38   :  { %v2821_v3 = vpop.permute.xlu1 %2820  ;;  %v2829_v34 = vpop.permute.xlu0 %2828 }
 0xd39   :  { %v2840_v14 = vsel %vm357_vm0, %v2838_v46, %v2821_v3 }
 0xd3a   :  { %v2842_v31 = vsel %vm1521_vm4, %v2840_v14, %v2829_v34 }
 0xd3b   :  { %4742 = vmatmul.msk.f32.vlgmr.msra.gmra.mxu3 %vm387_vm1, %v2842_v31 }
 0xd40   :  { %v2799_v35 = vpop.permute.xlu1 %2798 }
 0xd41   :  { %v2835_v58 = vsel %vm548_vm6, %v2531_v17, %v2799_v35 }
 0xd42   :  { %v2807_v61 = vpop.permute.xlu0 %2806 }
 0xd43   :  { %v2837_v42 = vsel %vm1513_vm2, %v2835_v58, %v2807_v61 }
 0xd75   :  { %v2831_v15 = vpop.permute.xlu2 %2830 }
 0xd85   :  { %v2815_v59 = vpop.permute.xlu1 %2814 }
 0xd86   :  { %v2839_v36 = vsel %vm1516_vm3, %v2837_v42, %v2815_v59 }
 0xd88   :  { %v2823_v29 = vpop.permute.xlu0 %2822 }
 0xd89   :  { %v2841_v50 = vsel %vm357_vm0, %v2839_v36, %v2823_v29 }
 0xd8a   :  { %v2843_v56 = vsel %vm1521_vm4, %v2841_v50, %v2831_v15  ;;  %v2991_v15 = vld [vmem:[#allocation20 + $0x40] sm:$0xff]  ;;  %v2990_v50 = vld [vmem:[#allocation20 + $0x38] sm:$0xff] }
 0xd8b   :  { %4743 = vmatmul.msk.f32.gmra.mxu3 %vm387_vm1, %v2843_v56  ;;  %3019 = vmatpush.msra.mxu2 %v2991_v15  ;;  %v2989_v56 = vld [vmem:[#allocation20 + $0x30] sm:$0xff] }
 0xd8d   :  { %3020 = vmatpush.msra.mxu2 %v2990_v50 }
 0xd8f   :  { %3021 = vmatpush.msra.mxu2 %v2989_v56 }
 0xdbe   :  { %v2879_v39 = vpop.f32.mrf.mxu3 }
 0xdbf   :  { %v2880_v41 = vadd.f32 %v4954_v38, %v2879_v39 }
 0xdc1   :  { %v2885_v11 = vadd.f32 %v2880_v41, %v6227_v2 }
 0xdc3   :  { %v2891_v28 = vsel %vm387_vm1, %v2885_v11, 0.0 }
 0xdc4   :  { %2892 = vadd.xlane.f32.xlu1 %v2891_v28 }
 0xe0e   :  { %v2882_v45 = vpop.f32.mrf.mxu3 }
 0xe0f   :  { %v2883_v48 = vadd.f32 %v4954_v38, %v2882_v45  ;;  %v4957_v38 = vld [vmem:[#allocation19 + $0x1] ss:$0 sm:$0xff] }
 0xe11   :  { %v2886_v51 = vadd.f32 %v2883_v48, %v6234_v16 }
 0xe13   :  { %v2894_v54 = vsel %vm387_vm1, %v2886_v51, 0.0 }
 0xe14   :  { %2895 = vadd.xlane.f32.xlu0 %v2894_v54 }
 0xe37   :  { %v2893_v23 = vpop.xlane.xlu1 %2892 }
 0xe38   :  { %v2897_v52 = vmul.f32 %v2893_v23, %v6197_v60 }
 0xe3a   :  { %v2899_v30 = vsub.f32 %v2885_v11, %v2897_v52 }
 0xe3c   :  { %v2901_v13 = vmul.f32 %v2899_v30, %v2899_v30 }
 0xe3e   :  { %v2903_v49 = vsel %vm387_vm1, %v2901_v13, 0.0 }
 0xe3f   :  { %2904 = vadd.xlane.f32.xlu2 %v2903_v49 }
 0xe87   :  { %v2896_v5 = vpop.xlane.xlu0 %2895 }
 0xe88   :  { %v2898_v27 = vmul.f32 %v2896_v5, %v6197_v60 }
 0xe8a   :  { %v2900_v32 = vsub.f32 %v2886_v51, %v2898_v27  ;;  %v4958_v51 = vld [vmem:[#allocation22 + $0x1] ss:$0 sm:$0xff] }
 0xe8c   :  { %v2902_v21 = vmul.f32 %v2900_v32, %v2900_v32 }
 0xe8e   :  { %v2906_v1 = vsel %vm387_vm1, %v2902_v21, 0.0 }
 0xe8f   :  { %2907 = vadd.xlane.f32.xlu1 %v2906_v1 }
 0xeb2   :  { %v2905_v37 = vpop.xlane.xlu2 %2904 }
 0xeb3   :  { %v2909_v20 = vmul.f32 %v2905_v37, %v6197_v60 }
 0xeb5   :  { %v2911_v17 = vadd.f32 1e-05, %v2909_v20  ;;  %v3100_v20 = vld [vmem:[#allocation13 + $0x110] sm:$0xff] }
 0xeb6   :  { %3125 = vmatpush.msrb.mxu2 %v3100_v20 }
 0xeb7   :  { %5081 = vrsqrt.f32 %v2911_v17  ;;  %vm2919_vm8 = vweird.f32 %v2911_v17 }
 0xebd   :  { %v5082_v57 = vpop.eup %5081 }
 0xebe   :  { %v2914_v63 = vmul.f32 %v5082_v57, %v2911_v17  ;;  %vm2920_vm7 = vweird.f32 %v5082_v57  ;;  %v3101_v17 = vld [vmem:[#allocation13 + $0x118] sm:$0xff] }
 0xebf   :  { %vm2921_vm9 = vmor %vm2919_vm8, %vm2920_vm7  ;;  %3148 = vmatpush.msrb.mxu3 %v3101_v17 }
 0xec0   :  { %v2915_v25 = vmul.f32 %v5082_v57, %v2914_v63  ;;  %v3099_v63 = vld [vmem:[#allocation13 + $0x108] sm:$0xff] }
 0xec1   :  { %3149 = vmatpush.msrb.mxu3 %v3099_v63 }
 0xec2   :  { %v2916_v18 = vmul.f32 0.5, %v2915_v25  ;;  %v3096_v25 = vld [vmem:[#allocation13 + $0xf0] sm:$0xff] }
 0xec4   :  { %v2917_v62 = vsub.f32 1.5, %v2916_v18  ;;  %v3097_v18 = vld [vmem:[#allocation13 + $0xf8] sm:$0xff] }
 0xec5   :  { %3150 = vmatpush.msrb.mxu3 %v3097_v18 }
 0xec6   :  { %v2918_v0 = vmul.f32 %v5082_v57, %v2917_v62  ;;  %v3094_v62 = vld [vmem:[#allocation13 + $0xe0] sm:$0xff] }
 0xec8   :  { %v2922_v24 = vsel %vm2921_vm9, %v5082_v57, %v2918_v0  ;;  %v3098_v57 = vld [vmem:[#allocation13 + $0x100] sm:$0xff]  ;;  %v3095_v0 = vld [vmem:[#allocation13 + $0xe8] sm:$0xff] }
 0xec9   :  { %v2933_v12 = vmul.f32 %v2922_v24, %v2899_v30  ;;  %3126 = vmatpush.msrb.mxu2 %v3098_v57  ;;  %3151 = vmatpush.msrb.mxu3 %v3095_v0  ;;  %v3093_v24 = vld [vmem:[#allocation13 + $0xd8] sm:$0xff] }
 0xecb   :  { %v2938_v8 = vmul.f32 %v4955_v22, %v2933_v12  ;;  %3127 = vmatpush.msrb.mxu2 %v3096_v25  ;;  %v3090_v12 = vld [vmem:[#allocation13 + $0xc0] sm:$0xff]  ;;  %3152 = vmatpush.msrb.mxu3 %v3093_v24 }
 0xecd   :  { %v2943_v26 = vadd.f32 %v4956_v7, %v2938_v8  ;;  %3128 = vmatpush.msrb.mxu2 %v3094_v62 }
 0xecf   :  { %4745 = vmatmul.msk.f32.vlgmr.msrb.gmra.mxu0 %vm387_vm1, %v2943_v26 }
 0xf02   :  { %v2908_v10 = vpop.xlane.xlu1 %2907 }
 0xf03   :  { %v2910_v46 = vmul.f32 %v2908_v10, %v6197_v60 }
 0xf05   :  { %v2912_v3 = vadd.f32 1e-05, %v2910_v46 }
 0xf07   :  { %5083 = vrsqrt.f32 %v2912_v3  ;;  %vm2929_vm11 = vweird.f32 %v2912_v3 }
 0xf0d   :  { %v5084_v34 = vpop.eup %5083 }
 0xf0e   :  { %v2924_v14 = vmul.f32 %v5084_v34, %v2912_v3  ;;  %vm2930_vm10 = vweird.f32 %v5084_v34 }
 0xf0f   :  { %vm2931_vm12 = vmor %vm2929_vm11, %vm2930_vm10 }
 0xf10   :  { %v2925_v31 = vmul.f32 %v5084_v34, %v2924_v14  ;;  %v4959_v14 = vld [vmem:[%s7095_s16 + $0x1] ss:$0 sm:$0xff] }
 0xf12   :  { %v2926_v35 = vmul.f32 0.5, %v2925_v31 }
 0xf14   :  { %v2927_v61 = vsub.f32 1.5, %v2926_v35 }
 0xf16   :  { %v2928_v59 = vmul.f32 %v5084_v34, %v2927_v61  ;;  %v4960_v61 = vld [vmem:[#allocation23 + $0x1] ss:$0 sm:$0xff] }
 0xf18   :  { %v2932_v58 = vsel %vm2931_vm12, %v5084_v34, %v2928_v59 }
 0xf19   :  { %v2934_v42 = vmul.f32 %v2932_v58, %v2900_v32 }
 0xf1b   :  { %v2939_v36 = vmul.f32 %v4955_v22, %v2934_v42  ;;  %v3092_v22 = vld [vmem:[#allocation13 + $0xd0] sm:$0xff] }
 0xf1c   :  { %3129 = vmatpush.msrb.mxu2 %v3092_v22 }
 0xf1d   :  { %v2944_v29 = vadd.f32 %v4956_v7, %v2939_v36  ;;  %v3091_v7 = vld [vmem:[#allocation13 + $0xc8] sm:$0xff] }
 0xf1e   :  { %3130 = vmatpush.msrb.mxu2 %v3090_v12  ;;  %3153 = vmatpush.msrb.mxu3 %v3091_v7 }
 0xf1f   :  { %4746 = vmatmul.msk.f32.gmra.mxu0 %vm387_vm1, %v2944_v29 }
 0xf4c   :  { %v2980_v39 = vpop.f32.mrf.mxu0 }
 0xf4d   :  { %v2981_v41 = vadd.f32 %v4957_v38, %v2980_v39 }
 0xf4f   :  { %v2986_v11 = vmax.f32 %v2981_v41, 0.0 }
 0xf51   :  { %4747 = vmatmul.msk.f32.vlgmr.msra.gmra.mxu2 %vm387_vm1, %v2986_v11 }
 0xf9c   :  { %v2983_v28 = vpop.f32.mrf.mxu0 }
 0xf9d   :  { %v2984_v45 = vadd.f32 %v4957_v38, %v2983_v28 }
 0xf9f   :  { %v2987_v48 = vmax.f32 %v2984_v45, 0.0 }
 0xfa1   :  { %4748 = vmatmul.msk.f32.gmra.mxu2 %vm387_vm1, %v2987_v48 }
 0xfd4   :  { %v3023_v54 = vpop.f32.mrf.mxu2 }
 0xfd5   :  { %v3024_v23 = vadd.f32 %v4958_v51, %v3023_v54 }
 0xfd7   :  { %v3029_v52 = vadd.f32 %v3024_v23, %v2943_v26 }
 0xfd9   :  { %v3035_v30 = vsel %vm387_vm1, %v3029_v52, 0.0 }
 0xfda   :  { %3036 = vadd.xlane.f32.xlu2 %v3035_v30 }
0x1024   :  { %v3026_v13 = vpop.f32.mrf.mxu2 }
0x1025   :  { %v3027_v49 = vadd.f32 %v4958_v51, %v3026_v13  ;;  %v4750_v51 = vld [vmem:[%s7125_s28 + $0x4] sm:$0x3] }
0x1026   :  { %v3105_v54 = vperm.slane %v4750_v51, 0  ;;  %v3106_v13 = vperm.slane %v4750_v51, 1 }
0x1027   :  { %v3030_v5 = vadd.f32 %v3027_v49, %v2944_v29 }
0x1029   :  { %v3038_v27 = vsel %vm387_vm1, %v3030_v5, 0.0 }
0x102a   :  { %3039 = vadd.xlane.f32.xlu0 %v3038_v27 }
0x104d   :  { %v3037_v32 = vpop.xlane.xlu2 %3036 }
0x104e   :  { %v3041_v21 = vmul.f32 %v3037_v32, %v6197_v60 }
0x1050   :  { %v3043_v1 = vsub.f32 %v3029_v52, %v3041_v21 }
0x1052   :  { %v3045_v53 = vmul.f32 %v3043_v1, %v3043_v1 }
0x1054   :  { %v3047_v44 = vsel %vm387_vm1, %v3045_v53, 0.0 }
0x1055   :  { %3048 = vadd.xlane.f32.xlu1 %v3047_v44 }
0x109d   :  { %v3040_v55 = vpop.xlane.xlu0 %3039 }
0x109e   :  { %v3042_v43 = vmul.f32 %v3040_v55, %v6197_v60 }
0x10a0   :  { %v6594_v33 = vsub.f32 %v3030_v5, %v3042_v43 }
0x10a2   :  { %v3046_v40 = vmul.f32 %v6594_v33, %v6594_v33 }
0x10a4   :  { %v3050_v37 = vsel %vm387_vm1, %v3046_v40, 0.0 }
0x10a5   :  { %3051 = vadd.xlane.f32.xlu2 %v3050_v37 }
0x10c8   :  { %v3049_v8 = vpop.xlane.xlu1 %3048 }
0x10c9   :  { %v3053_v26 = vmul.f32 %v3049_v8, %v6197_v60 }
0x10cb   :  { %v3055_v47 = vadd.f32 1e-05, %v3053_v26 }
0x10cd   :  { %5085 = vrsqrt.f32 %v3055_v47  ;;  %vm3063_vm14 = vweird.f32 %v3055_v47 }
0x10d3   :  { %v5086_v19 = vpop.eup %5085 }
0x10d4   :  { %v3058_v9 = vmul.f32 %v5086_v19, %v3055_v47  ;;  %vm3064_vm13 = vweird.f32 %v5086_v19 }
0x10d5   :  { %vm3065_vm15 = vmor %vm3063_vm14, %vm3064_vm13 }
0x10d6   :  { %v3059_v10 = vmul.f32 %v5086_v19, %v3058_v9 }
0x10d8   :  { %v3060_v46 = vmul.f32 0.5, %v3059_v10 }
0x10da   :  { %v3061_v3 = vsub.f32 1.5, %v3060_v46 }
0x10dc   :  { %v3062_v34 = vmul.f32 %v5086_v19, %v3061_v3 }
0x10de   :  { %v3066_v31 = vsel %vm3065_vm15, %v5086_v19, %v3062_v34 }
0x10df   :  { %v3077_v35 = vmul.f32 %v3066_v31, %v3043_v1 }
0x10e1   :  { %v3082_v59 = vmul.f32 %v4959_v14, %v3077_v35 }
0x10e3   :  { %v6603_v58 = vadd.f32 %v4960_v61, %v3082_v59 }
0x10e5   :  { %4751 = vmatmul.msk.f32.vlgmr.msrb.gmra.mxu2 %vm387_vm1, %v6603_v58  ;;  %4753 = vmatmul.msk.f32.vlgmr.msrb.gmra.mxu3 %vm387_vm1, %v6603_v58 }
0x1118   :  { %v3052_v42 = vpop.xlane.xlu2 %3051 }
0x1119   :  { %v3054_v36 = vmul.f32 %v3052_v42, %v6197_v60 }
0x111b   :  { %v3056_v29 = vadd.f32 1e-05, %v3054_v36 }
0x111d   :  { %5087 = vrsqrt.f32 %v3056_v29  ;;  %vm3073_vm7 = vweird.f32 %v3056_v29 }
0x1123   :  { %v5088_v15 = vpop.eup %5087 }
0x1124   :  { %v3068_v50 = vmul.f32 %v5088_v15, %v3056_v29  ;;  %vm3074_vm5 = vweird.f32 %v5088_v15 }
0x1125   :  { %vm3075_vm8 = vmor %vm3073_vm7, %vm3074_vm5 }
0x1126   :  { %v3069_v56 = vmul.f32 %v5088_v15, %v3068_v50 }
0x1128   :  { %v3070_v38 = vmul.f32 0.5, %v3069_v56 }
0x112a   :  { %v3071_v39 = vsub.f32 1.5, %v3070_v38 }
0x112c   :  { %v3072_v41 = vmul.f32 %v5088_v15, %v3071_v39 }
0x112e   :  { %v3076_v11 = vsel %vm3075_vm8, %v5088_v15, %v3072_v41 }
0x112f   :  { %v3078_v28 = vmul.f32 %v3076_v11, %v6594_v33 }
0x1131   :  { %v3083_v45 = vmul.f32 %v4959_v14, %v3078_v28 }
0x1133   :  { %v6611_v48 = vadd.f32 %v4960_v61, %v3083_v45 }
0x1135   :  { %4752 = vmatmul.msk.f32.gmra.mxu2 %vm387_vm1, %v6611_v48  ;;  %4754 = vmatmul.msk.f32.gmra.mxu3 %vm387_vm1, %v6611_v48 }
0x1168   :  { %v3132_v23 = vpop.f32.mrf.mxu2  ;;  %v3155_v30 = vpop.f32.mrf.mxu3 }
0x1169   :  { %v6620_v52 = vadd.f32 %v3132_v23, %v3105_v54  ;;  %v3156_v27 = vadd.f32 %v3155_v30, %v3106_v13 }
0x116b   :  { %3171 = vrot.lane.b32.xlu1 %v6620_v52, %s5638_s30  ;;  %3163 = vrot.lane.b32.xlu0 %v6620_v52, %s5639_s0 }
0x1173   :  { %3179 = vrot.lane.b32.xlu0 %v6620_v52, %s5640_s11 }
0x117b   :  { %3167 = vrot.lane.b32.xlu0 %v6620_v52, %s5641_s3 }
0x1183   :  { %3175 = vrot.lane.b32.xlu0 %v6620_v52, %s5642_s8 }
0x11b8   :  { %v3135_v49 = vpop.f32.mrf.mxu2  ;;  %v3158_v5 = vpop.f32.mrf.mxu3 }
0x11b9   :  { %v6632_v32 = vadd.f32 %v3135_v49, %v3105_v54  ;;  %v3159_v21 = vadd.f32 %v3158_v5, %v3106_v13 }
0x11bb   :  { %v6634_v1 = vpack.i.bf16 %v3159_v21, %v3156_v27  ;;  %3165 = vrot.lane.b32.xlu1 %v6632_v32, %s5639_s0  ;;  %3169 = vrot.lane.b32.xlu2 %v6632_v32, %s5641_s3  ;;  %s7144_s0 = sld [smem:[#allocation50_spill]] }
0x11c3   :  { %3173 = vrot.lane.b32.xlu1 %v6632_v32, %s5638_s30  ;;  %3177 = vrot.lane.b32.xlu2 %v6632_v32, %s5642_s8 }
0x11cb   :  { %3181 = vrot.lane.b32.xlu2 %v6632_v32, %s5640_s11 }
0x11d3   :  { %3193 = vrot.lane.b32.xlu2 %v6620_v52, %s5637_s2 }
0x11dd   :  { %v6648_v53 = vpop.permute.xlu1 %3171  ;;  %v6650_v44 = vpop.permute.xlu0 %3163 }
0x11de   :  { %3245 = vrot.lane.b32.xlu0 %v6650_v44, %s5637_s2  ;;  %3349 = vrot.lane.b32.xlu1 %v6648_v53, %s5637_s2 }
0x11e5   :  { %v3180_v55 = vpop.permute.xlu0 %3179 }
0x11e6   :  { %3219 = vrot.lane.b32.xlu0 %v6632_v32, %s5637_s2  ;;  %3453 = vrot.lane.b32.xlu2 %v3180_v55, %s5637_s2 }
0x11ed   :  { %v6659_v43 = vpop.permute.xlu0 %3167 }
0x11ee   :  { %3297 = vrot.lane.b32.xlu0 %v6659_v43, %s5637_s2 }
0x11f5   :  { %v3176_v33 = vpop.permute.xlu0 %3175 }
0x11f6   :  { %3401 = vrot.lane.b32.xlu0 %v3176_v33, %s5637_s2 }
0x11fe   :  { %4910 = vrot.lane.b32.xlu0 %v6634_v1, %s5640_s11 }
0x1215   :  { %v6666_v40 = vpop.permute.xlu2 %3169 }
0x1216   :  { %3323 = vrot.lane.b32.xlu1 %v6666_v40, %s5637_s2 }
0x121d   :  { %v3178_v37 = vpop.permute.xlu2 %3177 }
0x121e   :  { %3427 = vrot.lane.b32.xlu2 %v3178_v37, %s5637_s2 }
0x1225   :  { %v3182_v20 = vpop.permute.xlu2 %3181 }
0x1226   :  { %3479 = vrot.lane.b32.xlu2 %v3182_v20, %s5637_s2 }
0x122d   :  { %v6672_v17 = vpop.permute.xlu1 %3165  ;;  %v3194_v57 = vpop.permute.xlu2 %3193 }
0x122e   :  { %3271 = vrot.lane.b32.xlu1 %v6672_v17, %s5637_s2  ;;  %4755 = vmatpush.xpose.msk.msra.mxu0 %vm548_vm6, %v3194_v57  ;;  %v4919_v57 = vpack.i.bf16 %v6620_v52, %v6650_v44 }
0x1231   :  { %4756 = vmatmul.msk.f32.vlgmr.msra.gmra.mxu0 %vm548_vm6, %v6620_v52 }
0x1235   :  { %v6679_v63 = vpop.permute.xlu1 %3173 }
0x1236   :  { %3375 = vrot.lane.b32.xlu1 %v6679_v63, %s5637_s2 }
0x1240   :  { %v3454_v62 = vpop.permute.xlu2 %3453 }
0x1250   :  { %v3246_v25 = vpop.permute.xlu0 %3245  ;;  %v3350_v18 = vpop.permute.xlu1 %3349 }
0x1251   :  { %4759 = vmatpush.xpose.msk.msra.mxu2 %vm548_vm6, %v3246_v25  ;;  %4767 = vmatpush.xpose.msk.msra.mxu3 %vm548_vm6, %v3350_v18  ;;  %v4924_v18 = vpack.i.bf16 %v6648_v53, %v6632_v32 }
0x1254   :  { %4760 = vmatmul.msk.f32.vlgmr.msra.gmra.mxu2 %vm548_vm6, %v6650_v44  ;;  %4768 = vmatmul.msk.f32.vlgmr.msra.gmra.mxu3 %vm548_vm6, %v6648_v53 }
0x1255   :  { %4775 = vmatpush.xpose.msk.msrb.mxu3 %vm548_vm6, %v3454_v62 }
0x1258   :  { %v3220_v0 = vpop.permute.xlu0 %3219 }
0x1259   :  { %4757 = vmatpush.xpose.msk.msrb.mxu1 %vm548_vm6, %v3220_v0 }
0x125c   :  { %4758 = vmatmul.msk.f32.vlgmr.msrb.gmra.mxu1 %vm548_vm6, %v6632_v32  ;;  %4776 = vmatmul.msk.f32.vlgmr.msrb.gmra.mxu3 %vm548_vm6, %v3180_v55 }
0x1260   :  { %v3298_v22 = vpop.permute.xlu0 %3297 }
0x1261   :  { %4763 = vmatpush.xpose.msk.msra.mxu1 %vm548_vm6, %v3298_v22 }
0x1264   :  { %4764 = vmatmul.msk.f32.vlgmr.msra.gmra.mxu1 %vm548_vm6, %v6659_v43 }
0x1268   :  { %v3402_v24 = vpop.permute.xlu0 %3401 }
0x1269   :  { %4771 = vmatpush.xpose.msk.msrb.mxu1 %vm548_vm6, %v3402_v24 }
0x126c   :  { %4772 = vmatmul.msk.f32.vlgmr.msrb.gmra.mxu1 %vm548_vm6, %v3176_v33 }
0x1278   :  { %v3428_v7 = vpop.permute.xlu2 %3427 }
0x1280   :  { %v3480_v47 = vpop.permute.xlu2 %3479 }
0x1288   :  { %v3324_v12 = vpop.permute.xlu1 %3323 }
0x1289   :  { %4765 = vmatpush.xpose.msk.msrb.mxu2 %vm548_vm6, %v3324_v12 }
0x128c   :  { %4766 = vmatmul.msk.f32.vlgmr.msrb.gmra.mxu2 %vm548_vm6, %v6666_v40 }
0x128d   :  { %4773 = vmatpush.xpose.msk.msra.mxu2 %vm548_vm6, %v3428_v7 }
0x1294   :  { %4774 = vmatmul.msk.f32.vlgmr.msra.gmra.mxu2 %vm548_vm6, %v3178_v37 }
0x12a0   :  { %v3272_v8 = vpop.permute.xlu1 %3271 }
0x12a1   :  { %4761 = vmatpush.xpose.msk.msrb.mxu0 %vm548_vm6, %v3272_v8 }
0x12a4   :  { %4762 = vmatmul.msk.f32.vlgmr.msrb.gmra.mxu0 %vm548_vm6, %v6672_v17 }
0x12a8   :  { %v3376_v26 = vpop.permute.xlu1 %3375 }
0x12a9   :  { %4769 = vmatpush.xpose.msk.msra.mxu0 %vm548_vm6, %v3376_v26 }
0x12ac   :  { %4770 = vmatmul.msk.f32.vlgmr.msra.gmra.mxu0 %vm548_vm6, %v6679_v63 }
0x12ad   :  { %4777 = vmatpush.xpose.msk.msrb.mxu0 %vm548_vm6, %v3480_v47 }
0x12ae   :  { %v3216_v19 = vpop.f32.mrf.mxu0 }
0x12af   :  { %v3505_v9 = vmul.f32 0.35355338, %v3216_v19 }
0x12b1   :  { %v3517_v10 = vsel %vm548_vm6, %v3505_v9, -inf }
0x12b2   :  { %3518 = vmax.xlane.f32.xlu1 %v3517_v10 }
0x12b4   :  { %4778 = vmatmul.msk.f32.vlgmr.msrb.gmra.mxu0 %vm548_vm6, %v3182_v20  ;;  %v6749_v20 = vpop.permute.xlu0 %4910 }
0x12d7   :  { %v3268_v46 = vpop.f32.mrf.mxu2  ;;  %v3372_v35 = vpop.f32.mrf.mxu3 }
0x12d8   :  { %v6713_v3 = vmul.f32 0.35355338, %v3268_v46  ;;  %v3511_v59 = vmul.f32 0.35355338, %v3372_v35 }
0x12d9   :  { %v3242_v34 = vpop.f32.mrf.mxu1 }
0x12da   :  { %v6715_v14 = vmul.f32 0.35355338, %v3242_v34  ;;  %v3523_v31 = vsel %vm548_vm6, %v6713_v3, -inf  ;;  %v3535_v29 = vsel %vm548_vm6, %v3511_v59, -inf }
0x12db   :  { %3524 = vmax.xlane.f32.xlu0 %v3523_v31 }
0x12dc   :  { %v3520_v61 = vsel %vm548_vm6, %v6715_v14, -inf }
0x12dd   :  { %3521 = vmax.xlane.f32.xlu2 %v3520_v61 }
0x12df   :  { %v3476_v50 = vpop.f32.mrf.mxu3 }
0x12e0   :  { %v6726_v56 = vmul.f32 0.35355338, %v3476_v50 }
0x12e1   :  { %v3320_v42 = vpop.f32.mrf.mxu1 }
0x12e2   :  { %v6721_v36 = vmul.f32 0.35355338, %v3320_v42  ;;  %v3547_v11 = vsel %vm548_vm6, %v6726_v56, -inf }
0x12e3   :  { %3536 = vmax.xlane.f32.xlu0 %v3535_v29 }
0x12e4   :  { %v3529_v15 = vsel %vm548_vm6, %v6721_v36, -inf }
0x12e5   :  { %3530 = vmax.xlane.f32.xlu2 %v3529_v15 }
0x12e9   :  { %v3424_v38 = vpop.f32.mrf.mxu1 }
0x12ea   :  { %v3513_v39 = vmul.f32 0.35355338, %v3424_v38 }
0x12ec   :  { %v3541_v41 = vsel %vm548_vm6, %v3513_v39, -inf }
0x12ed   :  { %3542 = vmax.xlane.f32.xlu1 %v3541_v41  ;;  %3548 = vmax.xlane.f32.xlu2 %v3547_v11 }
0x130f   :  { %v3346_v28 = vpop.f32.mrf.mxu2 }
0x1310   :  { %v6731_v45 = vmul.f32 0.35355338, %v3346_v28 }
0x1312   :  { %v3532_v51 = vsel %vm548_vm6, %v6731_v45, -inf }
0x1313   :  { %3533 = vmax.xlane.f32.xlu0 %v3532_v51 }
0x1317   :  { %v3450_v35 = vpop.f32.mrf.mxu2 }
0x1321   :  { %v3294_v54 = vpop.f32.mrf.mxu0 }
0x1322   :  { %v6735_v23 = vmul.f32 0.35355338, %v3294_v54 }
0x1324   :  { %v3526_v30 = vsel %vm548_vm6, %v6735_v23, -inf }
0x1325   :  { %v3519_v13 = vpop.xlane.xlu1 %3518  ;;  %3527 = vmax.xlane.f32.xlu1 %v3526_v30 }
0x1326   :  { %v3553_v49 = vsub.f32 %v3505_v9, %v3519_v13 }
0x1328   :  { %v3565_v5 = vmul.f32 1.442695, %v3553_v49 }
0x1329   :  { %v3398_v27 = vpop.f32.mrf.mxu0 }
0x132a   :  { %5089 = vpow2.f32 %v3565_v5  ;;  %v6739_v21 = vmul.f32 0.35355338, %v3398_v27 }
0x132c   :  { %v3538_v55 = vsel %vm548_vm6, %v6739_v21, -inf }
0x132d   :  { %3539 = vmax.xlane.f32.xlu0 %v3538_v55 }
0x1330   :  { %v6743_v33 = vpop.eup %5089 }
0x1331   :  { %v3589_v37 = vsel %vm548_vm6, %v6743_v33, 0.0  ;;  %v3502_v24 = vpop.f32.mrf.mxu0 }
0x1332   :  { %3590 = vadd.xlane.f32.xlu2 %v3589_v37  ;;  %v6761_v44 = vmul.f32 0.35355338, %v3502_v24 }
0x1334   :  { %v3550_v53 = vsel %vm548_vm6, %v6761_v44, -inf }
0x133e   :  { %4915 = vrot.lane.b32.xlu1 %v6634_v1, %s5642_s8  ;;  %s7145_s8 = sld [smem:[#allocation51_spill]] }
0x134a   :  { %4920 = vrot.lane.b32.xlu2 %v4919_v57, %s5643_s24 }
0x134e   :  { %v3525_v25 = vpop.xlane.xlu0 %3524 }
0x1350   :  { %v3522_v32 = vpop.xlane.xlu2 %3521 }
0x1351   :  { %v3554_v26 = vsub.f32 %v6715_v14, %v3522_v32  ;;  %v6775_v14 = vmul.f32 0.35355338, %v3450_v35 }
0x1352   :  { %4925 = vrot.lane.b32.xlu2 %v4924_v18, %s5643_s24 }
0x1353   :  { %v3567_v9 = vmul.f32 1.442695, %v3554_v26  ;;  %v3544_v42 = vsel %vm548_vm6, %v6775_v14, -inf }
0x1356   :  { %v3537_v62 = vpop.xlane.xlu0 %3536 }
0x1357   :  { %v3559_v0 = vsub.f32 %v3511_v59, %v3537_v62  ;;  %v3555_v59 = vsub.f32 %v6713_v3, %v3525_v25 }
0x1358   :  { %v3531_v10 = vpop.xlane.xlu2 %3530 }
0x1359   :  { %v3577_v22 = vmul.f32 1.442695, %v3559_v0  ;;  %v3557_v34 = vsub.f32 %v6721_v36, %v3531_v10  ;;  %v3569_v29 = vmul.f32 1.442695, %v3555_v59 }
0x135b   :  { %5091 = vpow2.f32 %v3577_v22  ;;  %v3573_v61 = vmul.f32 1.442695, %v3557_v34 }
0x1360   :  { %v3543_v12 = vpop.xlane.xlu1 %3542  ;;  %v3549_v15 = vpop.xlane.xlu2 %3548 }
0x1361   :  { %v6757_v1 = vpop.eup %5091  ;;  %v3561_v7 = vsub.f32 %v3513_v39, %v3543_v12  ;;  %v3563_v36 = vsub.f32 %v6726_v56, %v3549_v15  ;;  %v4913_v15 = vunpack.i.h.bf16 %v6749_v20 }
0x1362   :  { %v3607_v52 = vsel %vm548_vm6, %v6757_v1, 0.0 }
0x1363   :  { %v3581_v8 = vmul.f32 1.442695, %v3561_v7  ;;  %3608 = vadd.xlane.f32.xlu0 %v3607_v52  ;;  %v3585_v39 = vmul.f32 1.442695, %v3563_v36 }
0x1365   :  { %5093 = vpow2.f32 %v3581_v8 }
0x1366   :  { %5095 = vpow2.f32 %v3567_v9 }
0x1367   :  { %5097 = vpow2.f32 %v3573_v61 }
0x1368   :  { %3551 = vmax.xlane.f32.xlu1 %v3550_v53  ;;  %5099 = vpow2.f32 %v3569_v29 }
0x1369   :  { %5101 = vpow2.f32 %v3585_v39 }
0x136b   :  { %v6766_v47 = vpop.eup %5093 }
0x136c   :  { %v3613_v19 = vsel %vm548_vm6, %v6766_v47, 0.0  ;;  %v6770_v46 = vpop.eup %5095 }
0x136d   :  { %3614 = vadd.xlane.f32.xlu0 %v3613_v19  ;;  %v3592_v31 = vsel %vm548_vm6, %v6770_v46, 0.0  ;;  %v6780_v50 = vpop.eup %5097  ;;  %v4912_v19 = vunpack.i.l.bf16 %v6749_v20 }
0x136e   :  { %v3601_v38 = vsel %vm548_vm6, %v6780_v50, 0.0  ;;  %v6785_v11 = vpop.eup %5099 }
0x136f   :  { %v3595_v28 = vsel %vm548_vm6, %v6785_v11, 0.0  ;;  %v6790_v54 = vpop.eup %5101  ;;  %v4934_v59 = vpack.i.bf16 %v4912_v19, %v6666_v40 }
0x1370   :  { %v3619_v13 = vsel %vm548_vm6, %v6790_v54, 0.0 }
0x137b   :  { %3593 = vadd.xlane.f32.xlu2 %v3592_v31 }
0x1383   :  { %3545 = vmax.xlane.f32.xlu2 %v3544_v42 }
0x1386   :  { %v3534_v41 = vpop.xlane.xlu0 %3533 }
0x1387   :  { %v3558_v3 = vsub.f32 %v6731_v45, %v3534_v41 }
0x1389   :  { %v3575_v51 = vmul.f32 1.442695, %v3558_v3 }
0x138b   :  { %3602 = vadd.xlane.f32.xlu2 %v3601_v38  ;;  %5103 = vpow2.f32 %v3575_v51 }
0x1391   :  { %v6795_v5 = vpop.eup %5103 }
0x1392   :  { %v3604_v55 = vsel %vm548_vm6, %v6795_v5, 0.0 }
0x1393   :  { %3596 = vadd.xlane.f32.xlu2 %v3595_v28 }
0x1398   :  { %v3528_v30 = vpop.xlane.xlu1 %3527 }
0x1399   :  { %v3556_v56 = vsub.f32 %v6735_v23, %v3528_v30 }
0x139b   :  { %v3571_v49 = vmul.f32 1.442695, %v3556_v56  ;;  %3620 = vadd.xlane.f32.xlu2 %v3619_v13 }
0x139d   :  { %5105 = vpow2.f32 %v3571_v49 }
0x13a0   :  { %v3540_v45 = vpop.xlane.xlu0 %3539 }
0x13a1   :  { %v3560_v27 = vsub.f32 %v6739_v21, %v3540_v45 }
0x13a3   :  { %v6800_v37 = vpop.eup %5105  ;;  %v3579_v57 = vmul.f32 1.442695, %v3560_v27  ;;  %3605 = vadd.xlane.f32.xlu2 %v3604_v55 }
0x13a4   :  { %v3598_v23 = vsel %vm548_vm6, %v6800_v37, 0.0 }
0x13a5   :  { %5107 = vpow2.f32 %v3579_v57  ;;  %3599 = vadd.xlane.f32.xlu1 %v3598_v23  ;;  %v3591_v25 = vpop.xlane.xlu2 %3590 }
0x13a6   :  { %5109 = vrcp.f32 %v3591_v25  ;;  %v3636_v52 = vand.u32 2147483648, %v3591_v25  ;;  %v3634_v32 = vand.u32 2147483647, %v3591_v25  ;;  %vm3630_vm10 = vweird.f32 %v3591_v25 }
0x13a8   :  { %v3637_v26 = vor.u32 1.1754944e-38, %v3636_v52  ;;  %vm3635_vm12 = vcmp.eq.f32.partialorder %v3634_v32, 8.507059e+37 }
0x13ab   :  { %v6804_v18 = vpop.eup %5107 }
0x13ac   :  { %v5110_v62 = vpop.eup %5109  ;;  %v3610_v21 = vsel %vm548_vm6, %v6804_v18, 0.0 }
0x13ad   :  { %v3626_v0 = vmul.f32 %v5110_v62, %v3591_v25  ;;  %3611 = vadd.xlane.f32.xlu0 %v3610_v21  ;;  %v4921_v22 = vpop.permute.xlu2 %4920  ;;  %vm3631_vm9 = vweird.f32 %v5110_v62 }
0x13ae   :  { %v4923_v24 = vunpack.i.h.bf16 %v4921_v22  ;;  %v4922_v12 = vunpack.i.l.bf16 %v4921_v22  ;;  %vm3632_vm11 = vmor %vm3630_vm10, %vm3631_vm9 }
0x13af   :  { %v3627_v7 = vsub.f32 1.0, %v3626_v0 }
0x13b0   :  { %3826 = vmatpush.msra.mxu1 %v4923_v24  ;;  %3878 = vmatpush.msra.mxu3 %v4922_v12  ;;  %v4916_v42 = vpop.permute.xlu1 %4915 }
0x13b1   :  { %v3628_v8 = vmul.f32 %v5110_v62, %v3627_v7  ;;  %v4918_v29 = vunpack.i.h.bf16 %v4916_v42  ;;  %v4917_v28 = vunpack.i.l.bf16 %v4916_v42 }
0x13b3   :  { %v3629_v53 = vadd.f32 %v5110_v62, %v3628_v8 }
0x13b5   :  { %v3633_v9 = vsel %vm3632_vm11, %v5110_v62, %v3629_v53  ;;  %v4926_v10 = vpop.permute.xlu2 %4925 }
0x13b6   :  { %v3638_v34 = vsel %vm3635_vm12, %v3637_v26, %v3633_v9  ;;  %v4928_v31 = vunpack.i.h.bf16 %v4926_v10  ;;  %v4927_v35 = vunpack.i.l.bf16 %v4926_v10 }
0x13b7   :  { %v3639_v61 = vmul.f32 %v6743_v33, %v3638_v34 }
0x13b8   :  { %3852 = vmatpush.msrb.mxu2 %v4927_v35  ;;  %3982 = vmatpush.msrb.mxu3 %v4928_v31 }
0x13b9   :  { %4779 = vmatmul.msk.f32.vlgmr.msra.gmra.mxu1 %vm548_vm6, %v3639_v61 }
0x13bb   :  { %4935 = vrot.lane.b32.xlu2 %v4934_v59, %s5643_s24 }
0x13c3   :  { %4039 = vrot.lane.b32.xlu2 %v4918_v29, %s5643_s24 }
0x13cb   :  { %4091 = vrot.lane.b32.xlu2 %v4913_v15, %s5643_s24 }
0x13d6   :  { %v3609_v23 = vpop.xlane.xlu0 %3608 }
0x13d7   :  { %v3726_v29 = vand.u32 2147483648, %v3609_v23  ;;  %vm3720_vm12 = vweird.f32 %v3609_v23 }
0x13db   :  { %v3552_v36 = vpop.xlane.xlu1 %3551 }
0x13dc   :  { %v3564_v38 = vsub.f32 %v6761_v44, %v3552_v36  ;;  %v4939_v44 = vpack.i.bf16 %v6679_v63, %v4917_v28  ;;  %v3724_v36 = vand.u32 2147483647, %v3609_v23  ;;  %v3727_v28 = vor.u32 1.1754944e-38, %v3726_v29 }
0x13de   :  { %v3587_v33 = vmul.f32 1.442695, %v3564_v38 }
0x13e0   :  { %5111 = vpow2.f32 %v3587_v33 }
0x13e6   :  { %v6817_v39 = vpop.eup %5111 }
0x13e7   :  { %v3622_v40 = vsel %vm548_vm6, %v6817_v39, 0.0 }
0x13e8   :  { %3623 = vadd.xlane.f32.xlu0 %v3622_v40  ;;  %v4929_v40 = vpack.i.bf16 %v6672_v17, %v6659_v43 }
0x13ee   :  { %v3594_v41 = vpop.xlane.xlu2 %3593 }
0x13ef   :  { %5113 = vrcp.f32 %v3594_v41  ;;  %v3651_v13 = vand.u32 2147483648, %v3594_v41  ;;  %v3649_v27 = vand.u32 2147483647, %v3594_v41  ;;  %vm3645_vm14 = vweird.f32 %v3594_v41 }
0x13f1   :  { %v3652_v57 = vor.u32 1.1754944e-38, %v3651_v13  ;;  %vm3650_vm5 = vcmp.eq.f32.partialorder %v3649_v27, 8.507059e+37 }
0x13f5   :  { %v5114_v3 = vpop.eup %5113 }
0x13f6   :  { %v3641_v51 = vmul.f32 %v5114_v3, %v3594_v41  ;;  %v3546_v30 = vpop.xlane.xlu2 %3545  ;;  %vm3646_vm13 = vweird.f32 %v5114_v3 }
0x13f7   :  { %v3562_v20 = vsub.f32 %v6775_v14, %v3546_v30  ;;  %vm3647_vm15 = vmor %vm3645_vm14, %vm3646_vm13  ;;  %vm3725_vm14 = vcmp.eq.f32.partialorder %v3724_v36, 8.507059e+37 }
0x13f8   :  { %v3642_v56 = vsub.f32 1.0, %v3641_v51 }
0x13f9   :  { %v3583_v49 = vmul.f32 1.442695, %v3562_v20 }
0x13fa   :  { %v3643_v45 = vmul.f32 %v5114_v3, %v3642_v56 }
0x13fb   :  { %5115 = vpow2.f32 %v3583_v49 }
0x13fc   :  { %v3644_v55 = vadd.f32 %v5114_v3, %v3643_v45  ;;  %4940 = vrot.lane.b32.xlu0 %v4939_v44, %s5643_s24  ;;  %5117 = vrcp.f32 %v3609_v23 }
0x13fe   :  { %v3648_v25 = vsel %vm3647_vm15, %v5114_v3, %v3644_v55  ;;  %v6824_v62 = vpop.xlane.xlu2 %3602 }
0x13ff   :  { %v3653_v14 = vsel %vm3650_vm5, %v3652_v57, %v3648_v25 }
0x1400   :  { %v3654_v21 = vmul.f32 %v6770_v46, %v3653_v14 }
0x1401   :  { %v6827_v0 = vpop.eup %5115 }
0x1402   :  { %4780 = vmatmul.msk.f32.vlgmr.msrb.gmra.mxu2 %vm548_vm6, %v3654_v21  ;;  %v3616_v63 = vsel %vm548_vm6, %v6827_v0, 0.0  ;;  %v5118_v24 = vpop.eup %5117 }
0x1403   :  { %3617 = vadd.xlane.f32.xlu1 %v3616_v63  ;;  %v3716_v12 = vmul.f32 %v5118_v24, %v3609_v23  ;;  %vm3721_vm9 = vweird.f32 %v5118_v24 }
0x1404   :  { %vm3722_vm13 = vmor %vm3720_vm12, %vm3721_vm9 }
0x1405   :  { %v3717_v52 = vsub.f32 1.0, %v3716_v12 }
0x1406   :  { %v3597_v22 = vpop.xlane.xlu2 %3596 }
0x1407   :  { %5119 = vrcp.f32 %v3597_v22  ;;  %v3666_v46 = vand.u32 2147483648, %v3597_v22  ;;  %v3718_v26 = vmul.f32 %v5118_v24, %v3717_v52  ;;  %v3664_v9 = vand.u32 2147483647, %v3597_v22 }
0x1408   :  { %vm3660_vm8 = vweird.f32 %v3597_v22 }
0x1409   :  { %v3667_v31 = vor.u32 1.1754944e-38, %v3666_v46  ;;  %v3719_v35 = vadd.f32 %v5118_v24, %v3718_v26  ;;  %vm3665_vm11 = vcmp.eq.f32.partialorder %v3664_v9, 8.507059e+37 }
0x140b   :  { %v3723_v41 = vsel %vm3722_vm13, %v5118_v24, %v3719_v35 }
0x140c   :  { %v3728_v30 = vsel %vm3725_vm14, %v3727_v28, %v3723_v41 }
0x140d   :  { %v5120_v7 = vpop.eup %5119  ;;  %v3729_v45 = vmul.f32 %v6757_v1, %v3728_v30 }
0x140e   :  { %v3656_v8 = vmul.f32 %v5120_v7, %v3597_v22  ;;  %v3621_v32 = vpop.xlane.xlu2 %3620  ;;  %vm3661_vm7 = vweird.f32 %v5120_v7 }
0x140f   :  { %5121 = vrcp.f32 %v3621_v32  ;;  %vm3662_vm10 = vmor %vm3660_vm8, %vm3661_vm7  ;;  %vm3780_vm5 = vweird.f32 %v3621_v32  ;;  %v3784_v43 = vand.u32 2147483647, %v3621_v32 }
0x1410   :  { %v3657_v53 = vsub.f32 1.0, %v3656_v8  ;;  %v6846_v8 = vpop.xlane.xlu0 %3614 }
0x1411   :  { %vm3785_vm9 = vcmp.eq.f32.partialorder %v3784_v43, 8.507059e+37  ;;  %v3694_v43 = vand.u32 2147483647, %v6824_v62 }
0x1412   :  { %v3658_v19 = vmul.f32 %v5120_v7, %v3657_v53 }
0x1414   :  { %v3659_v10 = vadd.f32 %v5120_v7, %v3658_v19 }
0x1415   :  { %v5122_v34 = vpop.eup %5121 }
0x1416   :  { %v3663_v61 = vsel %vm3662_vm10, %v5120_v7, %v3659_v10  ;;  %v3776_v59 = vmul.f32 %v5122_v34, %v3621_v32  ;;  %v3606_v42 = vpop.xlane.xlu2 %3605  ;;  %vm3781_vm15 = vweird.f32 %v5122_v34 }
0x1417   :  { %v3668_v15 = vsel %vm3665_vm11, %v3667_v31, %v3663_v61  ;;  %5123 = vrcp.f32 %v3606_v42  ;;  %vm3782_vm7 = vmor %vm3780_vm5, %vm3781_vm15  ;;  %v3711_v27 = vand.u32 2147483648, %v3606_v42  ;;  %v3709_v23 = vand.u32 2147483647, %v3606_v42 }
0x1418   :  { %v3777_v38 = vsub.f32 1.0, %v3776_v59  ;;  %v3669_v33 = vmul.f32 %v6785_v11, %v3668_v15  ;;  %v3786_v11 = vand.u32 2147483648, %v3621_v32  ;;  %vm3705_vm10 = vweird.f32 %v3606_v42  ;;  %v6844_v52 = vpop.xlane.xlu1 %3599 }
0x1419   :  { %v3712_v1 = vor.u32 1.1754944e-38, %v3711_v27  ;;  %vm3710_vm12 = vcmp.eq.f32.partialorder %v3709_v23, 8.507059e+37  ;;  %5125 = vrcp.f32 %v6824_v62 }
0x141a   :  { %v3778_v3 = vmul.f32 %v5122_v34, %v3777_v38  ;;  %4781 = vmatmul.msk.f32.vlgmr.msra.gmra.mxu3 %vm548_vm6, %v3669_v33  ;;  %v3787_v25 = vor.u32 1.1754944e-38, %v3786_v11  ;;  %5127 = vrcp.f32 %v6844_v52  ;;  %v3696_v11 = vand.u32 2147483648, %v6824_v62 }
0x141b   :  { %5129 = vrcp.f32 %v6846_v8 }
0x141c   :  { %4930 = vrot.lane.b32.xlu1 %v4929_v40, %s5643_s24  ;;  %v3779_v20 = vadd.f32 %v5122_v34, %v3778_v3 }
0x141d   :  { %v5124_v51 = vpop.eup %5123 }
0x141e   :  { %v3701_v56 = vmul.f32 %v5124_v51, %v3606_v42  ;;  %v4936_v13 = vpop.permute.xlu2 %4935  ;;  %v3783_v55 = vsel %vm3782_vm7, %v5122_v34, %v3779_v20  ;;  %vm3706_vm8 = vweird.f32 %v5124_v51 }
0x141f   :  { %v4938_v49 = vunpack.i.h.bf16 %v4936_v13  ;;  %v4937_v44 = vunpack.i.l.bf16 %v4936_v13  ;;  %v3788_v21 = vsel %vm3785_vm9, %v3787_v25, %v3783_v55  ;;  %vm3707_vm11 = vmor %vm3705_vm10, %vm3706_vm8  ;;  %v6850_v32 = vpop.eup %5125  ;;  %vm3690_vm9 = vweird.f32 %v6824_v62 }
0x1420   :  { %v3702_v17 = vsub.f32 1.0, %v3701_v56  ;;  %v3789_v12 = vmul.f32 %v6790_v54, %v3788_v21  ;;  %v6852_v53 = vpop.eup %5127  ;;  %v6855_v54 = vpop.xlane.xlu0 %3611  ;;  %v3686_v46 = vmul.f32 %v6850_v32, %v6824_v62  ;;  %vm3691_vm15 = vweird.f32 %v6850_v32 }
0x1421   :  { %3956 = vmatpush.msra.mxu2 %v4937_v44  ;;  %4086 = vmatpush.msra.mxu3 %v4938_v49  ;;  %v3671_v26 = vmul.f32 %v6852_v53, %v6844_v52  ;;  %v6862_v19 = vpop.eup %5129  ;;  %vm3676_vm5 = vweird.f32 %v6852_v53  ;;  %v3681_v49 = vand.u32 2147483648, %v6844_v52  ;;  %vm6884_vm10 = vmor %vm3690_vm9, %vm3691_vm15  ;;  %v3754_v21 = vand.u32 2147483647, %v6846_v8 }
0x1422   :  { %v3703_v57 = vmul.f32 %v5124_v51, %v3702_v17  ;;  %4785 = vmatmul.msk.f32.vlgmr.msrb.gmra.mxu3 %vm548_vm6, %v3729_v45  ;;  %v3687_v10 = vsub.f32 1.0, %v3686_v46  ;;  %v3746_v59 = vmul.f32 %v6862_v19, %v6846_v8  ;;  %v3679_v17 = vand.u32 2147483647, %v6844_v52 }
0x1423   :  { %v3672_v34 = vsub.f32 1.0, %v3671_v26  ;;  %vm3735_vm9 = vweird.f32 %v6855_v54 }
0x1424   :  { %v3704_v14 = vadd.f32 %v5124_v51, %v3703_v57  ;;  %v3688_v29 = vmul.f32 %v6850_v32, %v3687_v10  ;;  %v3747_v41 = vsub.f32 1.0, %v3746_v59  ;;  %vm3680_vm15 = vcmp.eq.f32.partialorder %v3679_v17, 8.507059e+37  ;;  %v4173_v17 = vld [vmem:[#allocation14 + $0x88] sm:$0xff] }
0x1425   :  { %v3673_v15 = vmul.f32 %v6852_v53, %v3672_v34  ;;  %v3739_v10 = vand.u32 2147483647, %v6855_v54 }
0x1426   :  { %v3708_v63 = vsel %vm3707_vm11, %v5124_v51, %v3704_v14  ;;  %v4040_v22 = vpop.permute.xlu2 %4039  ;;  %v3689_v28 = vadd.f32 %v6850_v32, %v3688_v29  ;;  %vm3675_vm11 = vweird.f32 %v6844_v52  ;;  %v3748_v55 = vmul.f32 %v6862_v19, %v3747_v41 }
0x1427   :  { %v3713_v24 = vsel %vm3710_vm12, %v3712_v1, %v3708_v63  ;;  %4060 = vmatpush.msrb.mxu2 %v4040_v22  ;;  %v3674_v30 = vadd.f32 %v6852_v53, %v3673_v15  ;;  %vm3677_vm12 = vmor %vm3675_vm11, %vm3676_vm5  ;;  %v3697_v14 = vor.u32 1.1754944e-38, %v3696_v11  ;;  %vm3751_vm5 = vweird.f32 %v6862_v19 }
0x1428   :  { %v3714_v7 = vmul.f32 %v6795_v5, %v3713_v24  ;;  %v3693_v57 = vsel %vm6884_vm10, %v6850_v32, %v3689_v28  ;;  %v3749_v22 = vadd.f32 %v6862_v19, %v3748_v55  ;;  %v3756_v32 = vand.u32 2147483648, %v6846_v8  ;;  %v4171_v55 = vld [vmem:[#allocation14 + $0x78] sm:$0xff] }
0x1429   :  { %v3678_v23 = vsel %vm3677_vm12, %v6852_v53, %v3674_v30  ;;  %v3741_v53 = vand.u32 2147483648, %v6855_v54  ;;  %vm3755_vm11 = vcmp.eq.f32.partialorder %v3754_v21, 8.507059e+37  ;;  %vm3740_vm12 = vcmp.eq.f32.partialorder %v3739_v10, 8.507059e+37  ;;  %v4471_v21 = vld [vmem:[#allocation28 + $0x18] sm:$0xff] }
0x142a   :  { %4784 = vmatmul.msk.f32.vlgmr.msra.gmra.mxu2 %vm548_vm6, %v3714_v7  ;;  %4789 = vmatmul.msk.f32.vlgmr.msra.gmra.mxu3 %vm548_vm6, %v3789_v12 }
0x142b   :  { %v3742_v29 = vor.u32 1.1754944e-38, %v3741_v53 }
0x142e   :  { %v4092_v15 = vpop.permute.xlu2 %4091 }
0x145b   :  { %v6864_v31 = vpop.xlane.xlu0 %3623 }
0x146e   :  { %v4941_v7 = vpop.permute.xlu0 %4940 }
0x146f   :  { %v4943_v59 = vunpack.i.h.bf16 %v4941_v7 }
0x1476   :  { %v3618_v5 = vpop.xlane.xlu1 %3617 }
0x1477   :  { %5131 = vrcp.f32 %v3618_v5  ;;  %v3771_v36 = vand.u32 2147483648, %v3618_v5  ;;  %v3769_v40 = vand.u32 2147483647, %v3618_v5  ;;  %vm3765_vm14 = vweird.f32 %v3618_v5 }
0x1478   :  { %5133 = vrcp.f32 %v6855_v54 }
0x1479   :  { %5135 = vrcp.f32 %v6864_v31  ;;  %v3772_v51 = vor.u32 1.1754944e-38, %v3771_v36  ;;  %vm3770_vm8 = vcmp.eq.f32.partialorder %v3769_v40, 8.507059e+37  ;;  %v3799_v40 = vand.u32 2147483647, %v6864_v31 }
0x147d   :  { %v5132_v9 = vpop.eup %5131 }
0x147e   :  { %v3761_v35 = vmul.f32 %v5132_v9, %v3618_v5  ;;  %v6866_v61 = vpop.eup %5133  ;;  %vm3766_vm13 = vweird.f32 %v5132_v9 }
0x147f   :  { %v3731_v38 = vmul.f32 %v6866_v61, %v6855_v54  ;;  %vm3767_vm7 = vmor %vm3765_vm14, %vm3766_vm13  ;;  %v6879_v13 = vpop.eup %5135  ;;  %vm3750_vm13 = vweird.f32 %v6846_v8  ;;  %vm3695_vm14 = vcmp.eq.f32.partialorder %v3694_v43, 8.507059e+37 }
0x1480   :  { %v3762_v42 = vsub.f32 1.0, %v3761_v35  ;;  %v3791_v62 = vmul.f32 %v6879_v13, %v6864_v31  ;;  %v3698_v1 = vsel %vm3695_vm14, %v3697_v14, %v3693_v57  ;;  %vm3795_vm14 = vweird.f32 %v6864_v31  ;;  %v4170_v57 = vld [vmem:[#allocation14 + $0x70] sm:$0xff] }
0x1481   :  { %v3732_v20 = vsub.f32 1.0, %v3731_v38  ;;  %v3699_v34 = vmul.f32 %v6780_v50, %v3698_v1  ;;  %v3757_v50 = vor.u32 1.1754944e-38, %v3756_v32  ;;  %v4472_v14 = vld [vmem:[#allocation28 + $0x20] sm:$0xff] }
0x1482   :  { %v3763_v33 = vmul.f32 %v5132_v9, %v3762_v42  ;;  %v3792_v12 = vsub.f32 1.0, %v3791_v62  ;;  %v4942_v42 = vunpack.i.l.bf16 %v4941_v7  ;;  %v4473_v62 = vld [vmem:[#allocation28 + $0x28] sm:$0xff]  ;;  %v4415_v1 = vld [vmem:[#allocation25 + $0x10] sm:$0xff] }
0x1483   :  { %v3733_v25 = vmul.f32 %v6866_v61, %v3732_v20  ;;  %v4468_v7 = vld [vmem:[#allocation28] sm:$0xff] }
0x1484   :  { %v3764_v3 = vadd.f32 %v5132_v9, %v3763_v33  ;;  %v3793_v54 = vmul.f32 %v6879_v13, %v3792_v12  ;;  %v6958_v12 = vld [vmem:[#allocation5] sm:$0x3] }
0x1485   :  { %v3734_v24 = vadd.f32 %v6866_v61, %v3733_v25  ;;  %v4168_v25 = vld [vmem:[#allocation14 + $0x60] sm:$0xff] }
0x1486   :  { %v3768_v56 = vsel %vm3767_vm7, %v5132_v9, %v3764_v3  ;;  %vm3736_vm7 = vweird.f32 %v6866_v61  ;;  %v3794_v38 = vadd.f32 %v6879_v13, %v3793_v54 }
0x1487   :  { %v3773_v44 = vsel %vm3770_vm8, %v3772_v51, %v3768_v56  ;;  %vm6913_vm8 = vmor %vm3750_vm13, %vm3751_vm5  ;;  %vm3796_vm13 = vweird.f32 %v6879_v13  ;;  %vm3800_vm5 = vcmp.eq.f32.partialorder %v3799_v40, 8.507059e+37 }
0x1488   :  { %v3774_v27 = vmul.f32 %v6827_v0, %v3773_v44  ;;  %v3682_v0 = vor.u32 1.1754944e-38, %v3681_v49  ;;  %vm6921_vm10 = vmor %vm3735_vm9, %vm3736_vm7  ;;  %v3753_v8 = vsel %vm6913_vm8, %v6862_v19, %v3749_v22  ;;  %v4413_v22 = vld [vmem:[#allocation25] sm:$0xff] }
0x1489   :  { %v3758_v36 = vsel %vm3755_vm11, %v3757_v50, %v3753_v8 }
0x148a   :  { %4788 = vmatmul.msk.f32.vlgmr.msrb.gmra.mxu2 %vm548_vm6, %v3774_v27  ;;  %v3683_v63 = vsel %vm3680_vm15, %v3682_v0, %v3678_v23  ;;  %v3759_v41 = vmul.f32 %v6766_v47, %v3758_v36  ;;  %vm3797_vm15 = vmor %vm3795_vm14, %vm3796_vm13  ;;  %v3828_v47 = vpop.f32.mrf.mxu1  ;;  %v4172_v27 = vld [vmem:[#allocation14 + $0x80] sm:$0xff]  ;;  %v4169_v23 = vld [vmem:[#allocation14 + $0x68] sm:$0xff] }
0x148b   :  { %v3684_v9 = vmul.f32 %v6800_v37, %v3683_v63  ;;  %v3738_v37 = vsel %vm6921_vm10, %v6866_v61, %v3734_v24  ;;  %v3801_v61 = vand.u32 2147483648, %v6864_v31  ;;  %v3798_v3 = vsel %vm3797_vm15, %v6879_v13, %v3794_v38  ;;  %v6947_v31 = vpop.f32.mrf.mxu2  ;;  %v4417_v0 = vld [vmem:[#allocation25 + $0x20] sm:$0xff]  ;;  %v4961_v38 = vld [vmem:[%s7088_s9 + $0x2] ss:$0 sm:$0xff] }
0x148c   :  { %v3743_v19 = vsel %vm3740_vm12, %v3742_v29, %v3738_v37  ;;  %v4470_v63 = vld [vmem:[#allocation28 + $0x10] sm:$0xff]  ;;  %v4469_v24 = vld [vmem:[#allocation28 + $0x8] sm:$0xff]  ;;  %vm4533_vm10 = vcmask 1040384  }
0x148d   :  { %v3744_v33 = vmul.f32 %v6804_v18, %v3743_v19  ;;  %v3802_v28 = vor.u32 1.1754944e-38, %v3801_v61 }
0x148e   :  { %v4931_v52 = vpop.permute.xlu1 %4930 }
0x148f   :  { %v4933_v5 = vunpack.i.h.bf16 %v4931_v52  ;;  %v4932_v46 = vunpack.i.l.bf16 %v4931_v52  ;;  %v3803_v51 = vsel %vm3800_vm5, %v3802_v28, %v3798_v3 }
0x1490   :  { %v3804_v20 = vmul.f32 %v6817_v39, %v3803_v51 }
0x1491   :  { %3904 = vmatpush.msra.mxu0 %v4933_v5  ;;  %3930 = vmatpush.msrb.mxu1 %v4932_v46 }
0x1492   :  { %4782 = vmatmul.msk.f32.vlgmr.msra.gmra.mxu0 %vm548_vm6, %v3684_v9  ;;  %4783 = vmatmul.msk.f32.vlgmr.msrb.gmra.mxu1 %vm548_vm6, %v3699_v34 }
0x1493   :  { %4008 = vmatpush.msrb.mxu0 %v4943_v59  ;;  %4034 = vmatpush.msra.mxu1 %v4942_v42 }
0x1495   :  { %4112 = vmatpush.msra.mxu0 %v4092_v15  ;;  %4195 = vmatpush.msrb.mxu1 %v4173_v17 }
0x1497   :  { %4196 = vmatpush.msrb.mxu1 %v4172_v27  ;;  %v4317_v27 = vld [vmem:[#allocation20 + $0x88] sm:$0xff] }
0x1498   :  { %4339 = vmatpush.msrb.mxu3 %v4317_v27 }
0x1499   :  { %4197 = vmatpush.msrb.mxu1 %v4171_v55  ;;  %v4316_v55 = vld [vmem:[#allocation20 + $0x80] sm:$0xff] }
0x149a   :  { %4786 = vmatmul.msk.f32.vlgmr.msrb.gmra.mxu0 %vm548_vm6, %v3744_v33  ;;  %4787 = vmatmul.msk.f32.vlgmr.msra.gmra.mxu1 %vm548_vm6, %v3759_v41 }
0x149b   :  { %4198 = vmatpush.msrb.mxu1 %v4170_v57  ;;  %4441 = vmatpush.msrb.mxu0 %v4417_v0 }
0x149c   :  { %4340 = vmatpush.msrb.mxu3 %v4316_v55 }
0x149d   :  { %v3880_v30 = vpop.f32.mrf.mxu3  ;;  %4199 = vmatpush.msrb.mxu1 %v4169_v23  ;;  %4442 = vmatpush.msrb.mxu0 %v4415_v1  ;;  %v4315_v23 = vld [vmem:[#allocation20 + $0x78] sm:$0xff] }
0x149e   :  { %4341 = vmatpush.msrb.mxu3 %v4315_v23 }
0x149f   :  { %4200 = vmatpush.msrb.mxu1 %v4168_v25  ;;  %4443 = vmatpush.msrb.mxu0 %v4413_v22 }
0x14a1   :  { %4494 = vmatpush.msra.mxu1 %v4473_v62 }
0x14a2   :  { %4790 = vmatmul.msk.f32.vlgmr.msra.gmra.mxu0 %vm548_vm6, %v3804_v20 }
0x14a3   :  { %4495 = vmatpush.msra.mxu1 %v4472_v14 }
0x14a5   :  { %v3984_v18 = vpop.f32.mrf.mxu3  ;;  %4496 = vmatpush.msra.mxu1 %v4471_v21 }
0x14a6   :  { %4135 = vrot.lane.b32.xlu2 %v3984_v18, %s5644_s13 }
0x14a7   :  { %4497 = vmatpush.msra.mxu1 %v4470_v63 }
0x14a9   :  { %4498 = vmatpush.msra.mxu1 %v4469_v24  ;;  %v4963_v24 = vld [vmem:[%s7089_s10 + $0x2] ss:$0 sm:$0xff] }
0x14aa   :  { %4800 = vmatmul.msk.f32.vlgmr.msrb.gmra.mxu0 %vm1516_vm3, %v6958_v12 }
0x14ab   :  { %4499 = vmatpush.msra.mxu1 %v4468_v7 }
0x14ad   :  { %v3958_v56 = vpop.f32.mrf.mxu2  ;;  %v4088_v45 = vpop.f32.mrf.mxu3 }
0x1500   :  { %v4136_v53 = vpop.permute.xlu2 %4135 }
0x150d   :  { %v4062_v49 = vpop.f32.mrf.mxu2 }
0x150f   :  { %v3906_v13 = vpop.f32.mrf.mxu0  ;;  %v3932_v11 = vpop.f32.mrf.mxu1 }
0x1510   :  { %4127 = vrot.lane.b32.xlu0 %v3932_v11, %s5622_s23  ;;  %4121 = vrot.lane.b32.xlu2 %v3906_v13, %s5618_s4  ;;  %v4273_v13 = vld [vmem:[#allocation17 + $0x80] sm:$0xff]  ;;  %v4272_v11 = vld [vmem:[#allocation17 + $0x78] sm:$0xff] }
0x1517   :  { %v4036_v44 = vpop.f32.mrf.mxu1  ;;  %v4010_v39 = vpop.f32.mrf.mxu0 }
0x1518   :  { %4143 = vrot.lane.b32.xlu1 %v4036_v44, %s5643_s24  ;;  %4145 = vrot.lane.b32.xlu2 %v4062_v49, %s5643_s24  ;;  %v4271_v49 = vld [vmem:[#allocation17 + $0x70] sm:$0xff]  ;;  %v4270_v44 = vld [vmem:[#allocation17 + $0x68] sm:$0xff] }
0x1519   :  { %4151 = vrot.lane.b32.xlu0 %v4088_v45, %s5645_s17  ;;  %v4269_v45 = vld [vmem:[#allocation17 + $0x60] sm:$0xff] }
0x151f   :  { %v4114_v43 = vpop.f32.mrf.mxu0 }
0x1520   :  { %4119 = vrot.lane.b32.xlu1 %v3880_v30, %s5618_s4 }
0x1521   :  { %4137 = vrot.lane.b32.xlu0 %v4010_v39, %s5644_s13 }
0x1528   :  { %4129 = vrot.lane.b32.xlu1 %v3958_v56, %s5622_s23 }
0x1530   :  { %4153 = vrot.lane.b32.xlu1 %v4114_v43, %s5645_s17 }
0x156a   :  { %v4122_v35 = vpop.permute.xlu2 %4121 }
0x156b   :  { %v4158_v8 = vsel %vm548_vm6, %v6947_v31, %v4122_v35 }
0x1572   :  { %v4146_v29 = vpop.permute.xlu2 %4145 }
0x1582   :  { %v4128_v52 = vpop.permute.xlu0 %4127 }
0x158a   :  { %v4144_v32 = vpop.permute.xlu1 %4143 }
0x158b   :  { %v4152_v26 = vpop.permute.xlu0 %4151 }
0x1592   :  { %v4120_v5 = vpop.permute.xlu1 %4119 }
0x1593   :  { %v4157_v46 = vsel %vm548_vm6, %v3828_v47, %v4120_v5  ;;  %v4138_v54 = vpop.permute.xlu0 %4137 }
0x1594   :  { %v4159_v9 = vsel %vm1513_vm2, %v4157_v46, %v4128_v52 }
0x1595   :  { %v4161_v10 = vsel %vm1516_vm3, %v4159_v9, %v4136_v53 }
0x1596   :  { %v4163_v34 = vsel %vm357_vm0, %v4161_v10, %v4144_v32  ;;  %v4964_v32 = vld [vmem:[#allocation16 + $0x2] ss:$0 sm:$0xff] }
0x1597   :  { %v4165_v59 = vsel %vm1521_vm4, %v4163_v34, %v4152_v26 }
0x1598   :  { %4792 = vmatmul.msk.f32.vlgmr.msrb.gmra.mxu1 %vm387_vm1, %v4165_v59 }
0x159a   :  { %v4130_v42 = vpop.permute.xlu1 %4129 }
0x159b   :  { %v4160_v37 = vsel %vm1513_vm2, %v4158_v8, %v4130_v42 }
0x159c   :  { %v4162_v50 = vsel %vm1516_vm3, %v4160_v37, %v4138_v54  ;;  %v4314_v54 = vld [vmem:[#allocation20 + $0x70] sm:$0xff] }
0x159d   :  { %v4164_v36 = vsel %vm357_vm0, %v4162_v50, %v4146_v29  ;;  %4342 = vmatpush.msrb.mxu3 %v4314_v54  ;;  %v4313_v50 = vld [vmem:[#allocation20 + $0x68] sm:$0xff]  ;;  %v4312_v29 = vld [vmem:[#allocation20 + $0x60] sm:$0xff] }
0x159f   :  { %4343 = vmatpush.msrb.mxu3 %v4313_v50 }
0x15a1   :  { %4344 = vmatpush.msrb.mxu3 %v4312_v29 }
0x15a2   :  { %v4154_v15 = vpop.permute.xlu1 %4153 }
0x15a3   :  { %v4166_v19 = vsel %vm1521_vm4, %v4164_v36, %v4154_v15  ;;  %v4418_v15 = vld [vmem:[#allocation25 + $0x28] sm:$0xff]  ;;  %v4416_v36 = vld [vmem:[#allocation25 + $0x18] sm:$0xff] }
0x15a4   :  { %4793 = vmatmul.msk.f32.gmra.mxu1 %vm387_vm1, %v4166_v19  ;;  %4461 = vmatpush.msra.mxu0 %v4418_v15  ;;  %v4414_v19 = vld [vmem:[#allocation25 + $0x8] sm:$0xff] }
0x15a6   :  { %4462 = vmatpush.msra.mxu0 %v4416_v36 }
0x15a8   :  { %4463 = vmatpush.msra.mxu0 %v4414_v19 }
0x15a9   :  { %4801 = vmatmul.msk.f32.vlgmr.msra.gmra.mxu0 %vm1516_vm3, %v6958_v12  ;;  %vm4535_vm3 = vcmask 1041409  }
0x15ac   :  { %4802 = vmatmul.msk.f32.vlgmr.msra.gmra.mxu1 %vm387_vm1, %v5867_v4 }
0x15b4   :  { %4803 = vmatmul.msk.f32.gmra.mxu1 %vm387_vm1, %v5873_v6 }
0x15bc   :  { %4804 = vmatmul.msk.f32.gmra.mxu1 %vm387_vm1, %v6227_v2 }
0x15c4   :  { %4805 = vmatmul.msk.f32.gmra.mxu1 %vm387_vm1, %v6234_v16 }
0x15cc   :  { %4806 = vmatmul.msk.f32.gmra.mxu1 %vm387_vm1, %v6603_v58 }
0x15d4   :  { %4807 = vmatmul.msk.f32.gmra.mxu1 %vm387_vm1, %v6611_v48 }
0x1615   :  { %v4202_v4 = vpop.f32.mrf.mxu1 }
0x1616   :  { %v4203_v61 = vadd.f32 %v4961_v38, %v4202_v4 }
0x1618   :  { %v4208_v6 = vadd.f32 %v4203_v61, %v6603_v58 }
0x161a   :  { %v4214_v33 = vsel %vm387_vm1, %v4208_v6, 0.0 }
0x161b   :  { %4215 = vadd.xlane.f32.xlu0 %v4214_v33 }
0x1621   :  { %v4205_v2 = vpop.f32.mrf.mxu1 }
0x1622   :  { %v4206_v40 = vadd.f32 %v4961_v38, %v4205_v2  ;;  %v4965_v38 = vld [vmem:[#allocation19 + $0x2] ss:$0 sm:$0xff] }
0x1624   :  { %v4209_v16 = vadd.f32 %v4206_v40, %v6611_v48  ;;  %v4274_v48 = vld [vmem:[#allocation17 + $0x88] sm:$0xff] }
0x1625   :  { %4296 = vmatpush.msra.mxu2 %v4274_v48 }
0x1626   :  { %v4217_v41 = vsel %vm387_vm1, %v4209_v16, 0.0 }
0x1627   :  { %4218 = vadd.xlane.f32.xlu2 %v4217_v41  ;;  %4297 = vmatpush.msra.mxu2 %v4273_v13 }
0x1629   :  { %4298 = vmatpush.msra.mxu2 %v4272_v11 }
0x162b   :  { %4299 = vmatpush.msra.mxu2 %v4271_v49 }
0x162d   :  { %4300 = vmatpush.msra.mxu2 %v4270_v44 }
0x162f   :  { %4301 = vmatpush.msra.mxu2 %v4269_v45 }
0x168e   :  { %v4216_v3 = vpop.xlane.xlu0 %4215 }
0x168f   :  { %v4220_v28 = vmul.f32 %v4216_v3, %v6197_v60 }
0x1691   :  { %v4222_v51 = vsub.f32 %v4208_v6, %v4220_v28 }
0x1693   :  { %v4224_v30 = vmul.f32 %v4222_v51, %v4222_v51 }
0x1695   :  { %v4226_v20 = vsel %vm387_vm1, %v4224_v30, 0.0 }
0x1696   :  { %4227 = vadd.xlane.f32.xlu1 %v4226_v20 }
0x169a   :  { %v4219_v18 = vpop.xlane.xlu2 %4218 }
0x169b   :  { %v4221_v58 = vmul.f32 %v4219_v18, %v6197_v60 }
0x169d   :  { %v4223_v31 = vsub.f32 %v4209_v16, %v4221_v58  ;;  %v4966_v16 = vld [vmem:[#allocation22 + $0x2] ss:$0 sm:$0xff]  ;;  %v4445_v58 = vpop.f32.mrf.mxu0 }
0x169f   :  { %v4225_v47 = vmul.f32 %v4223_v31, %v4223_v31 }
0x16a1   :  { %v4229_v56 = vsel %vm387_vm1, %v4225_v47, 0.0 }
0x16a2   :  { %4230 = vadd.xlane.f32.xlu2 %v4229_v56 }
0x16a5   :  { %v4465_v56 = vpop.f32.mrf.mxu0 }
0x1709   :  { %v4228_v39 = vpop.xlane.xlu1 %4227 }
0x170a   :  { %v4232_v43 = vmul.f32 %v4228_v39, %v6197_v60 }
0x170c   :  { %v4234_v17 = vadd.f32 1e-05, %v4232_v43 }
0x170e   :  { %5137 = vrsqrt.f32 %v4234_v17  ;;  %vm4242_vm2 = vweird.f32 %v4234_v17 }
0x1714   :  { %v5138_v57 = vpop.eup %5137 }
0x1715   :  { %v4237_v25 = vmul.f32 %v5138_v57, %v4234_v17  ;;  %v4231_v62 = vpop.xlane.xlu2 %4230  ;;  %vm4243_vm6 = vweird.f32 %v5138_v57 }
0x1716   :  { %v4233_v14 = vmul.f32 %v4231_v62, %v6197_v60  ;;  %vm4244_vm4 = vmor %vm4242_vm2, %vm4243_vm6 }
0x1717   :  { %v4238_v0 = vmul.f32 %v5138_v57, %v4237_v25 }
0x1718   :  { %v4235_v21 = vadd.f32 1e-05, %v4233_v14  ;;  %v4501_v14 = vpop.f32.mrf.mxu1 }
0x1719   :  { %v4239_v1 = vmul.f32 0.5, %v4238_v0 }
0x171a   :  { %5139 = vrsqrt.f32 %v4235_v21  ;;  %vm4252_vm8 = vweird.f32 %v4235_v21 }
0x171b   :  { %v4240_v63 = vsub.f32 1.5, %v4239_v1 }
0x171d   :  { %v4241_v22 = vmul.f32 %v5138_v57, %v4240_v63 }
0x171f   :  { %v4245_v7 = vsel %vm4244_vm4, %v5138_v57, %v4241_v22 }
0x1720   :  { %v5140_v52 = vpop.eup %5139  ;;  %v4256_v53 = vmul.f32 %v4245_v7, %v4222_v51 }
0x1721   :  { %v4247_v5 = vmul.f32 %v5140_v52, %v4235_v21  ;;  %vm4253_vm7 = vweird.f32 %v5140_v52 }
0x1722   :  { %v4261_v46 = vmul.f32 %v4963_v24, %v4256_v53  ;;  %vm4254_vm9 = vmor %vm4252_vm8, %vm4253_vm7  ;;  %v7027_v53 = vld [vmem:[#allocation29] ss:$0 sm:$0xff] }
0x1723   :  { %v4248_v26 = vmul.f32 %v5140_v52, %v4247_v5  ;;  %v4502_v50 = vadd.f32 %v7027_v53, %v4501_v14  ;;  %v4969_v14 = vld [vmem:[#allocation23 + $0x2] ss:$0 sm:$0xff] }
0x1724   :  { %v4266_v9 = vadd.f32 %v4964_v32, %v4261_v46 }
0x1725   :  { %v4249_v10 = vmul.f32 0.5, %v4248_v26 }
0x1726   :  { %4795 = vmatmul.msk.f32.vlgmr.msra.gmra.mxu2 %vm387_vm1, %v4266_v9 }
0x1727   :  { %v4250_v34 = vsub.f32 1.5, %v4249_v10 }
0x1729   :  { %v4251_v35 = vmul.f32 %v5140_v52, %v4250_v34 }
0x172b   :  { %v4255_v59 = vsel %vm4254_vm9, %v5140_v52, %v4251_v35 }
0x172c   :  { %v4257_v42 = vmul.f32 %v4255_v59, %v4223_v31  ;;  %v4419_v31 = vld [vmem:[#allocation26] sm:$0x3]  ;;  %v7035_v59 = vld [vmem:[%s7144_s0] ss:$0 sm:$0xff] }
0x172d   :  { %v4422_v47 = vperm.slane %v4419_v31, 1  ;;  %v4421_v13 = vperm.slane %v4419_v31, 0 }
0x172e   :  { %v4262_v8 = vmul.f32 %v4963_v24, %v4257_v42  ;;  %v4504_v24 = vpop.f32.mrf.mxu1 }
0x172f   :  { %v4466_v48 = vadd.f32 %v4465_v56, %v4422_v47  ;;  %v4446_v49 = vadd.f32 %v4445_v58, %v4421_v13  ;;  %v4505_v36 = vadd.f32 %v7027_v53, %v4504_v24 }
0x1730   :  { %v4267_v37 = vadd.f32 %v4964_v32, %v4262_v8 }
0x1731   :  { %v4532_v11 = vrot.slane %v4466_v48, 7  ;;  %v4527_v45 = vperm.slane %v4446_v49, 0  ;;  %v4542_v17 = vrot.slane %v4466_v48, 1  ;;  %v4526_v7 = vrot.slane %v4446_v49, 1 }
0x1732   :  { %4796 = vmatmul.msk.f32.gmra.mxu2 %vm387_vm1, %v4267_v37  ;;  %v4543_v54 = vperm.slane %v4466_v48, 0 }
0x1733   :  { %v4536_v44 = vsel %vm4535_vm3, %v4446_v49, %v4532_v11  ;;  %v4544_v27 = vperm.slane %v4542_v17, 0  ;;  %v4528_v52 = vperm.slane %v4526_v7, 0  ;;  %v4534_v5 = vsel %vm4533_vm10, %v4446_v49, %v4532_v11 }
0x1734   :  { %v4537_v39 = vrot.slane %v4536_v44, 1  ;;  %v4539_v35 = vperm.slane %v4534_v5, 1  ;;  %v4569_v29 = vadd.f32 %v4527_v45, %v4502_v50 }
0x1736   :  { %v4540_v43 = vperm.slane %v4537_v39, 0  ;;  %v4507_v32 = vpop.f32.mrf.mxu1  ;;  %v4541_v10 = vperm.slane %v4537_v39, 1 }
0x1737   :  { %v4508_v46 = vadd.f32 %v7027_v53, %v4507_v32 }
0x17a9   :  { %v4303_v4 = vpop.f32.mrf.mxu2 }
0x17aa   :  { %v4304_v61 = vadd.f32 %v4965_v38, %v4303_v4 }
0x17ac   :  { %v4309_v6 = vmax.f32 %v4304_v61, 0.0 }
0x17ae   :  { %4797 = vmatmul.msk.f32.vlgmr.msrb.gmra.mxu3 %vm387_vm1, %v4309_v6 }
0x17b5   :  { %v4306_v33 = vpop.f32.mrf.mxu2 }
0x17b6   :  { %v4307_v2 = vadd.f32 %v4965_v38, %v4306_v33  ;;  %v4570_v38 = vadd.f32 %v4528_v52, %v4505_v36 }
0x17b8   :  { %v4310_v40 = vmax.f32 %v4307_v2, 0.0  ;;  %v4510_v2 = vpop.f32.mrf.mxu1 }
0x17ba   :  { %4798 = vmatmul.msk.f32.gmra.mxu3 %vm387_vm1, %v4310_v40 }
0x1831   :  { %v4346_v41 = vpop.f32.mrf.mxu3 }
0x1832   :  { %v4347_v3 = vadd.f32 %v4966_v16, %v4346_v41  ;;  %v4513_v41 = vpop.f32.mrf.mxu1 }
0x1834   :  { %v4352_v28 = vadd.f32 %v4347_v3, %v4266_v9  ;;  %v4538_v9 = vperm.slane %v4534_v5, 0 }
0x1836   :  { %v4358_v51 = vsel %vm387_vm1, %v4352_v28, 0.0 }
0x1837   :  { %4359 = vadd.xlane.f32.xlu0 %v4358_v51 }
0x183a   :  { %v4516_v58 = vpop.f32.mrf.mxu1 }
0x183b   :  { %v4517_v13 = vadd.f32 %v7027_v53, %v4516_v58 }
0x183d   :  { %v4349_v30 = vpop.f32.mrf.mxu3 }
0x183e   :  { %v4350_v12 = vadd.f32 %v4966_v16, %v4349_v30 }
0x1840   :  { %v4353_v20 = vadd.f32 %v4350_v12, %v4267_v37 }
0x1842   :  { %v4361_v18 = vsel %vm387_vm1, %v4353_v20, 0.0 }
0x1843   :  { %4362 = vadd.xlane.f32.xlu1 %v4361_v18 }
0x185c   :  { %4545 = vrot.lane.b32.xlu1 %v4527_v45, %s5637_s2 }
0x1864   :  { %4555 = vrot.lane.b32.xlu1 %v4540_v43, %s5643_s24 }
0x186c   :  { %4565 = vrot.lane.b32.xlu1 %v4544_v27, %s5641_s3 }
0x18aa   :  { %v4360_v55 = vpop.xlane.xlu0 %4359 }
0x18ab   :  { %v4364_v57 = vmul.f32 %v4360_v55, %v6197_v60  ;;  %v4968_v55 = vld [vmem:[%s7095_s16 + $0x2] ss:$0 sm:$0xff] }
0x18ad   :  { %v7015_v23 = vsub.f32 %v4352_v28, %v4364_v57  ;;  %v4511_v28 = vadd.f32 %v7027_v53, %v4510_v2 }
0x18af   :  { %v4368_v25 = vmul.f32 %v7015_v23, %v7015_v23 }
0x18b1   :  { %v4370_v62 = vsel %vm387_vm1, %v4368_v25, 0.0 }
0x18b2   :  { %4371 = vadd.xlane.f32.xlu2 %v4370_v62 }
0x18b6   :  { %v4363_v0 = vpop.xlane.xlu1 %4362 }
0x18b7   :  { %v4365_v21 = vmul.f32 %v4363_v0, %v6197_v60 }
0x18b9   :  { %v7021_v1 = vsub.f32 %v4353_v20, %v4365_v21 }
0x18bb   :  { %v4369_v63 = vmul.f32 %v7021_v1, %v7021_v1 }
0x18bd   :  { %v4373_v22 = vsel %vm387_vm1, %v4369_v63, 0.0 }
0x18be   :  { %4374 = vadd.xlane.f32.xlu0 %v4373_v22 }
0x18ca   :  { %4547 = vrot.lane.b32.xlu2 %v4528_v52, %s5637_s2 }
0x18ce   :  { %v4546_v26 = vpop.permute.xlu1 %4545 }
0x18cf   :  { %v4571_v34 = vadd.f32 %v4546_v26, %v4508_v46 }
0x18d1   :  { %5141 = vtanh.f32 %v4571_v34  ;;  %v4514_v34 = vadd.f32 %v7027_v53, %v4513_v41 }
0x18d2   :  { %4551 = vrot.lane.b32.xlu0 %v4538_v9, %s5643_s24  ;;  %4557 = vrot.lane.b32.xlu2 %v4541_v10, %s5643_s24  ;;  %5143 = vtanh.f32 %v4569_v29 }
0x18d3   :  { %5145 = vtanh.f32 %v4570_v38 }
0x18d6   :  { %v4556_v56 = vpop.permute.xlu1 %4555 }
0x18d7   :  { %v5142_v42 = vpop.eup %5141 }
0x18d8   :  { %v4591_v8 = vmul.f32 %v5142_v42, %v7035_v59  ;;  %v5144_v15 = vpop.eup %5143 }
0x18d9   :  { %v4589_v19 = vmul.f32 %v5144_v15, %v7035_v59  ;;  %v5146_v61 = vpop.eup %5145 }
0x18da   :  { %4553 = vrot.lane.b32.xlu0 %v4539_v35, %s5643_s24  ;;  %v4603_v37 = vsel %vm387_vm1, %v4591_v8, 0.0  ;;  %v4590_v6 = vmul.f32 %v5146_v61, %v7035_v59 }
0x18db   :  { %4604 = vadd.xlane.f32.xlu1 %v4603_v37  ;;  %v4597_v4 = vsel %vm387_vm1, %v4589_v19, 0.0 }
0x18dc   :  { %v4600_v33 = vsel %vm387_vm1, %v4590_v6, 0.0 }
0x18e2   :  { %4563 = vrot.lane.b32.xlu0 %v4543_v54, %s5641_s3 }
0x18fb   :  { %4598 = vadd.xlane.f32.xlu2 %v4597_v4 }
0x190c   :  { %4601 = vadd.xlane.f32.xlu0 %v4600_v33  ;;  %v4566_v33 = vpop.permute.xlu1 %4565 }
0x1925   :  { %v4372_v40 = vpop.xlane.xlu2 %4371 }
0x1926   :  { %v4376_v16 = vmul.f32 %v4372_v40, %v6197_v60 }
0x1928   :  { %v4378_v3 = vadd.f32 1e-05, %v4376_v16 }
0x192a   :  { %5147 = vrsqrt.f32 %v4378_v3  ;;  %vm4386_vm12 = vweird.f32 %v4378_v3 }
0x192d   :  { %v4548_v51 = vpop.permute.xlu2 %4547 }
0x192e   :  { %v4572_v30 = vadd.f32 %v4548_v51, %v4511_v28 }
0x1930   :  { %v5148_v12 = vpop.eup %5147  ;;  %5149 = vtanh.f32 %v4572_v30 }
0x1931   :  { %v4381_v20 = vmul.f32 %v5148_v12, %v4378_v3  ;;  %v4375_v18 = vpop.xlane.xlu0 %4374  ;;  %vm4387_vm11 = vweird.f32 %v5148_v12 }
0x1932   :  { %v4377_v31 = vmul.f32 %v4375_v18, %v6197_v60  ;;  %vm4388_vm13 = vmor %vm4386_vm12, %vm4387_vm11 }
0x1933   :  { %v4382_v47 = vmul.f32 %v5148_v12, %v4381_v20 }
0x1934   :  { %v4379_v48 = vadd.f32 1e-05, %v4377_v31  ;;  %v4970_v31 = vld [vmem:[#allocation2] ss:$0 sm:$0xff] }
0x1935   :  { %v4383_v11 = vmul.f32 0.5, %v4382_v47  ;;  %v4558_v49 = vpop.permute.xlu2 %4557 }
0x1936   :  { %v5150_v44 = vpop.eup %5149  ;;  %5151 = vrsqrt.f32 %v4379_v48  ;;  %v4560_v45 = vsel %vm357_vm0, %v4556_v56, %v4558_v49  ;;  %vm4396_vm15 = vweird.f32 %v4379_v48 }
0x1937   :  { %v4384_v39 = vsub.f32 1.5, %v4383_v11  ;;  %v4574_v43 = vadd.f32 %v4560_v45, %v4517_v13  ;;  %v4592_v17 = vmul.f32 %v5150_v44, %v7035_v59 }
0x1939   :  { %v4385_v27 = vmul.f32 %v5148_v12, %v4384_v39  ;;  %5153 = vtanh.f32 %v4574_v43  ;;  %v4606_v60 = vsel %vm387_vm1, %v4592_v17, 0.0 }
0x193a   :  { %4607 = vadd.xlane.f32.xlu2 %v4606_v60 }
0x193b   :  { %v4389_v57 = vsel %vm4388_vm13, %v5148_v12, %v4385_v27 }
0x193c   :  { %v5152_v25 = vpop.eup %5151  ;;  %v4400_v62 = vmul.f32 %v4389_v57, %v7015_v23 }
0x193d   :  { %v4391_v0 = vmul.f32 %v5152_v25, %v4379_v48  ;;  %vm4397_vm14 = vweird.f32 %v5152_v25 }
0x193e   :  { %v4405_v21 = vmul.f32 %v4968_v55, %v4400_v62  ;;  %vm4398_vm5 = vmor %vm4396_vm15, %vm4397_vm14 }
0x193f   :  { %v5154_v63 = vpop.eup %5153  ;;  %v4392_v22 = vmul.f32 %v5152_v25, %v4391_v0 }
0x1940   :  { %v4410_v24 = vadd.f32 %v4969_v14, %v4405_v21  ;;  %v4594_v7 = vmul.f32 %v5154_v63, %v7035_v59 }
0x1941   :  { %v4393_v52 = vmul.f32 0.5, %v4392_v22 }
0x1942   :  { %4808 = vmatmul.msk.f32.gmra.mxu1 %vm387_vm1, %v4410_v24  ;;  %v4612_v32 = vsel %vm387_vm1, %v4594_v7, 0.0 }
0x1943   :  { %v4394_v5 = vsub.f32 1.5, %v4393_v52  ;;  %4613 = vadd.xlane.f32.xlu1 %v4612_v32 }
0x1944   :  { %v4552_v46 = vpop.permute.xlu0 %4551 }
0x1945   :  { %v4395_v26 = vmul.f32 %v5152_v25, %v4394_v5 }
0x1947   :  { %v4399_v23 = vsel %vm4398_vm5, %v5152_v25, %v4395_v26 }
0x1948   :  { %v4401_v9 = vmul.f32 %v4399_v23, %v7021_v1 }
0x194a   :  { %v4406_v10 = vmul.f32 %v4968_v55, %v4401_v9 }
0x194c   :  { %v4554_v35 = vpop.permute.xlu0 %4553  ;;  %v4411_v42 = vadd.f32 %v4969_v14, %v4406_v10 }
0x194d   :  { %v4559_v8 = vsel %vm357_vm0, %v4552_v46, %v4554_v35  ;;  %vm4635_vm0 = vcmask 7168  }
0x194e   :  { %v4573_v37 = vadd.f32 %v4559_v8, %v4514_v34  ;;  %4809 = vmatmul.msk.f32.gmra.mxu1 %vm387_vm1, %v4411_v42  ;;  %v4605_v12 = vpop.xlane.xlu1 %4604 }
0x1950   :  { %5155 = vtanh.f32 %v4573_v37 }
0x1954   :  { %v4564_v36 = vpop.permute.xlu0 %4563 }
0x1956   :  { %v5156_v54 = vpop.eup %5155 }
0x1957   :  { %v4593_v50 = vmul.f32 %v5156_v54, %v7035_v59 }
0x1959   :  { %v4609_v29 = vsel %vm387_vm1, %v4593_v50, 0.0 }
0x195a   :  { %4610 = vadd.xlane.f32.xlu0 %v4609_v29 }
0x196e   :  { %v4599_v28 = vpop.xlane.xlu2 %4598 }
0x196f   :  { %v4621_v18 = vadd.f32 %v4605_v12, %v4599_v28 }
0x197f   :  { %v4602_v51 = vpop.xlane.xlu0 %4601 }
0x19ad   :  { %v4608_v30 = vpop.xlane.xlu2 %4607 }
0x19ae   :  { %v4622_v13 = vadd.f32 %v4608_v30, %v4602_v51 }
0x19bf   :  { %v4519_v15 = vpop.f32.mrf.mxu1 }
0x19c0   :  { %v4520_v1 = vadd.f32 %v7027_v53, %v4519_v15 }
0x19c2   :  { %v4575_v19 = vadd.f32 %v4564_v36, %v4520_v1 }
0x19c4   :  { %5157 = vtanh.f32 %v4575_v19 }
0x19ca   :  { %v5158_v38 = vpop.eup %5157 }
0x19cb   :  { %v4522_v4 = vpop.f32.mrf.mxu1  ;;  %v4595_v61 = vmul.f32 %v5158_v38, %v7035_v59 }
0x19cc   :  { %v4523_v6 = vadd.f32 %v7027_v53, %v4522_v4 }
0x19cd   :  { %v4615_v2 = vsel %vm387_vm1, %v4595_v61, 0.0  ;;  %v4611_v20 = vpop.xlane.xlu0 %4610 }
0x19ce   :  { %v4576_v40 = vadd.f32 %v4566_v33, %v4523_v6  ;;  %4616 = vadd.xlane.f32.xlu2 %v4615_v2  ;;  %v4623_v58 = vadd.f32 %v4621_v18, %v4611_v20 }
0x19d0   :  { %5159 = vtanh.f32 %v4576_v40 }
0x19d6   :  { %v5160_v16 = vpop.eup %5159 }
0x19d7   :  { %v4596_v41 = vmul.f32 %v5160_v16, %v7035_v59  ;;  %v4614_v59 = vpop.xlane.xlu1 %4613 }
0x19d8   :  { %v4624_v11 = vadd.f32 %v4622_v13, %v4614_v59 }
0x19d9   :  { %v4618_v3 = vsel %vm387_vm1, %v4596_v41, 0.0 }
0x19da   :  { %4619 = vadd.xlane.f32.xlu0 %v4618_v3 }
0x1a41   :  { %v4617_v53 = vpop.xlane.xlu2 %4616 }
0x1a42   :  { %v4625_v47 = vadd.f32 %v4623_v58, %v4617_v53 }
0x1a44   :  { %v4627_v56 = vmul.f32 0.25, %v4625_v47 }
0x1a46   :  { %v4633_v48 = vadd.f32 %v4970_v31, %v4627_v56 }
0x1a48   :  { %4636 = vst.msk [vmem:[%s7145_s8] sm:$0xff] %vm4635_vm0, %v4633_v48 }
0x1a4d   :  { %v4620_v49 = vpop.xlane.xlu0 %4619 }
0x1a4e   :  { %v4626_v44 = vadd.f32 %v4624_v11, %v4620_v49 }
0x1a50   :  { %v4628_v45 = vmul.f32 0.25, %v4626_v44 }
0x1a52   :  { %v4634_v39 = vadd.f32 %v4970_v31, %v4628_v45 }
0x1a54   :  { %4637 = vst.msk [vmem:[%s7145_s8 + $0x8] sm:$0xff] %vm4635_vm0, %v4634_v39 }
0x1a55   :  { %4642 = vsyncpa [#allocation4], 1 }
0x1a56   :  { %4643 = vsyncpa [#allocation6], 1 }
0x1a57   :  { %4644 = vsyncpa [#allocation9], 1 }
0x1a58   :  { %4645 = vsyncpa [#allocation12], 1 }
0x1a59   :  { %4646 = vsyncpa [#allocation15], 1 }
0x1a5a   :  { %4647 = vsyncpa [#allocation18], 1 }
0x1a5b   :  { %4648 = vsyncpa [#allocation21], 1 }
0x1a5c   :  { %4649 = vsyncpa [#allocation24], 1 }
0x1a5d   :  { %4650 = vsyncpa [#allocation27], 1 }
0x1a5e   :  { %4651 = vsyncpa [#allocation30], 1 }

</bundles_post_ra>
